<compile_context>
chip_gen: v7x
topology: tpu7x:2x2x1
jax: 0.10.0
libtpu: 0.0.40
codegen_flags: <defaults>
</compile_context>

<pallas_src>
import functools

import jax
import jax.numpy as jnp
from jax.experimental import pallas as pl
from jax.experimental.pallas import tpu as pltpu

# --- config (cfg.*) -------------------------------------------------------------------
IMG_HIST_LEN = 4
IMG_HEIGHT = 48
IMG_WIDTH = 48
BATCH = 2
N_EXTRA = 12          # speed(1)+gear(1)+rpm(1)+action1(3)+action2(3)+action(3)
HID = 512

# conv stack hyper-parameters (match the torch nn.Conv2d definitions)
C1, K1, S1 = 32, 8, 4
C2, K2, S2 = 64, 4, 2
C3, K3, S3 = 64, 3, 1
assert S3 == 1        # the conv3 tap slicing below assumes a stride-1 conv3

OH1 = (IMG_HEIGHT - K1) // S1 + 1     # 11
OW1 = (IMG_WIDTH - K1) // S1 + 1      # 11
OH2 = (OH1 - K2) // S2 + 1            # 4
OW2 = (OW1 - K2) // S2 + 1            # 4
OH3 = (OH2 - K3) // S3 + 1            # 2
OW3 = (OW2 - K3) // S3 + 1            # 2

KIN1 = IMG_HIST_LEN * K1 * K1         # 256: conv1 patch length, columns (c, kh1, kw1)
NP2 = K2 * K2                         # 16 conv2 taps
NP3 = K3 * K3                         # 9  conv3 taps
NSP = OH3 * OW3                       # 4  conv3 output spatial positions
FEATS = C3 * NSP                      # 256 flattened conv features (torch NCHW flatten)


# --- the fused Pallas kernel ----------------------------------------------------------
def _qnet_kernel(p_ref, scal_ref, w1_ref, b1_ref, w2_ref, b2_ref, w3_ref, b3_ref,
                 ws_ref, bf1_ref, bf2_ref, wf3_ref, bf3_ref, wc_hbm, wf2_hbm,
                 o_ref, y1_ref, wc_ref, wf2_ref, sem, *, batch):
    bf16 = jnp.bfloat16
    rows_p = OH2 * OW2 * batch            # 32: rows per conv2 tap inside P / y1

    # Prefetch the two big fc operands (wc 256 KB, wf2 512 KB) while the convs run.
    wc_cp = pltpu.make_async_copy(wc_hbm, wc_ref, sem.at[0])
    wf2_cp = pltpu.make_async_copy(wf2_hbm, wf2_ref, sem.at[1])
    wc_cp.start()
    wf2_cp.start()

    # ---- conv1: one im2col matmul over all 512 (conv2-tap-ordered) patch rows ----------
    y1 = jnp.dot(p_ref[...], w1_ref[...], preferred_element_type=jnp.float32)
    y1_ref[...] = jnp.maximum(y1 + b1_ref[...], 0.0).astype(bf16)

    # ---- conv2: 16 tap-accumulation matmuls over contiguous y1 row blocks --------------
    acc2 = jnp.zeros((rows_p, C2), jnp.float32)
    for p in range(NP2):
        acc2 = acc2 + jnp.dot(y1_ref[pl.ds(p * rows_p, rows_p), :], w2_ref[p],
                              preferred_element_type=jnp.float32)
    y2 = jnp.maximum(acc2 + b2_ref[...], 0.0).astype(bf16)    # (32, 64), rows (oh2,ow2,b)

    # ---- conv3: 9 taps; each conv3 output row (oh3) reads one contiguous y2 block ------
    half = OW3 * batch                                        # 4 rows per oh3 half
    acc3t = jnp.zeros((half, C3), jnp.float32)                # oh3 = 0 rows (ow3, b)
    acc3b = jnp.zeros((half, C3), jnp.float32)                # oh3 = 1 rows (ow3, b)
    for kh3 in range(K3):
        for kw3 in range(K3):
            w3q = w3_ref[kh3 * K3 + kw3]
            t0 = (kh3 * OW2 + kw3) * batch
            b0 = ((kh3 + 1) * OW2 + kw3) * batch
            acc3t = acc3t + jnp.dot(y2[t0:t0 + half, :], w3q,
                                    preferred_element_type=jnp.float32)
            acc3b = acc3b + jnp.dot(y2[b0:b0 + half, :], w3q,
                                    preferred_element_type=jnp.float32)
    y3t = jnp.maximum(acc3t + b3_ref[...], 0.0).astype(bf16)  # (4, 64)
    y3b = jnp.maximum(acc3b + b3_ref[...], 0.0).astype(bf16)  # (4, 64)

    # ---- fc1: scalar-feature block + one (C3 -> 512) block per conv3 spatial position --
    wc_cp.wait()                                              # wc needed from here on
    acc1 = jnp.dot(scal_ref[...], ws_ref[...], preferred_element_type=jnp.float32)
    y3_blocks = (y3t[0:batch], y3t[batch:2 * batch],          # s = 0, 1  (oh3=0)
                 y3b[0:batch], y3b[batch:2 * batch])          # s = 2, 3  (oh3=1)
    for s in range(NSP):
        acc1 = acc1 + jnp.dot(y3_blocks[s], wc_ref[s], preferred_element_type=jnp.float32)
    h1 = jnp.maximum(acc1 + bf1_ref[...], 0.0).astype(bf16)

    # ---- fc2 ----------------------------------------------------------------------------
    wf2_cp.wait()
    h2 = jnp.dot(h1, wf2_ref[...], preferred_element_type=jnp.float32)
    h2 = jnp.maximum(h2 + bf2_ref[...], 0.0)

    # ---- fc3 (N=1): elementwise mul + lane reduction, no 1-lane matmul ------------------
    q_out = jnp.sum(h2 * wf3_ref[...], axis=-1, keepdims=True) + bf3_ref[...]
    o_ref[...] = q_out.astype(o_ref.dtype)


def _full_spec(shape):
    zeros = (0,) * len(shape)
    return pl.BlockSpec(shape, lambda i, _z=zeros: _z)


def _qnet_pallas(P, scal, prep, batch):
    vmem_args = (P, scal,
                 prep["w1"], prep["b1"], prep["w2"], prep["b2"], prep["w3"], prep["b3"],
                 prep["ws"], prep["bf1"], prep["bf2"], prep["wf3"], prep["bf3"])
    hbm_args = (prep["wc"], prep["wf2"])      # prefetched manually inside the kernel
    return pl.pallas_call(
        functools.partial(_qnet_kernel, batch=batch),
        out_shape=jax.ShapeDtypeStruct((batch, 1), jnp.float32),
        grid=(1,),
        in_specs=[_full_spec(a.shape) for a in vmem_args]
                 + [pl.BlockSpec(memory_space=pl.ANY) for _ in hbm_args],
        out_specs=_full_spec((batch, 1)),
        scratch_shapes=[pltpu.VMEM((NP2 * OH2 * OW2 * batch, C1), jnp.bfloat16),  # y1
                        pltpu.VMEM(prep["wc"].shape, jnp.bfloat16),    # wc prefetch buf
                        pltpu.VMEM(prep["wf2"].shape, jnp.bfloat16),   # wf2 prefetch buf
                        pltpu.SemaphoreType.DMA((2,))],
        compiler_params=pltpu.CompilerParams(dimension_semantics=("arbitrary",)),
    )(*vmem_args, *hbm_args)


# --- XLA-side glue: deduplicated conv1 patch matrix ------------------------------------
def _build_conv1_patches(images):
    """Conv1 im2col, rows ordered (kh2, kw2, oh2, ow2, b), columns (c, kh1, kw1)."""
    b = images.shape[0]
    # Full conv1 im2col over the 11x11 conv1 grid.
    # TODO(synk): lax.conv_general_dilated_patches would fuse these 64 slices into one op;
    #             the explicit form is kept so the (c, kh1, kw1) column order stays obvious.
    cols = []
    for kh in range(K1):
        for kw in range(K1):
            cols.append(images[:, :, kh: kh + S1 * OH1: S1, kw: kw + S1 * OW1: S1])
    pat = jnp.stack(cols, axis=0).reshape(K1, K1, b, IMG_HIST_LEN, OH1, OW1)
    pat = pat.transpose(2, 4, 5, 3, 0, 1).reshape(b, OH1, OW1, KIN1)
    # One contiguous row block per conv2 tap (kh2, kw2): that tap consumes the stride-2
    # 4x4 sub-grid of conv1 positions starting at (kh2, kw2).
    blocks = []
    for kh2 in range(K2):
        for kw2 in range(K2):
            blk = pat[:, kh2: kh2 + S2 * OH2: S2, kw2: kw2 + S2 * OW2: S2, :]
            blocks.append(blk.transpose(1, 2, 0, 3))          # (oh2, ow2, b, KIN1)
    P = jnp.stack(blocks, axis=0).reshape(NP2 * OH2 * OW2 * b, KIN1)
    return P.astype(jnp.bfloat16)


# --- parameters (deterministic, PyTorch default-init style; torch layouts) -------------
def _uniform(key, shape, fan_in):
    bound = 1.0 / jnp.sqrt(jnp.float32(fan_in))
    return jax.random.uniform(key, shape, jnp.float32, -bound, bound)


def init_params(key):
    sizes = [FEATS + N_EXTRA, HID, HID, 1]
    ks = jax.random.split(key, 12)
    p = {}
    p["w1"] = _uniform(ks[0], (C1, IMG_HIST_LEN, K1, K1), IMG_HIST_LEN * K1 * K1)
    p["b1"] = _uniform(ks[1], (C1,), IMG_HIST_LEN * K1 * K1)
    p["w2"] = _uniform(ks[2], (C2, C1, K2, K2), C1 * K2 * K2)
    p["b2"] = _uniform(ks[3], (C2,), C1 * K2 * K2)
    p["w3"] = _uniform(ks[4], (C3, C2, K3, K3), C2 * K3 * K3)
    p["b3"] = _uniform(ks[5], (C3,), C2 * K3 * K3)
    # MLP stored as (in, out) since both the kernel and the reference compute x @ w
    p["fc1_w"] = _uniform(ks[6], (sizes[0], sizes[1]), sizes[0])
    p["fc1_b"] = _uniform(ks[7], (sizes[1],), sizes[0])
    p["fc2_w"] = _uniform(ks[8], (sizes[1], sizes[2]), sizes[1])
    p["fc2_b"] = _uniform(ks[9], (sizes[2],), sizes[1])
    p["fc3_w"] = _uniform(ks[10], (sizes[2], sizes[3]), sizes[2])
    p["fc3_b"] = _uniform(ks[11], (sizes[3],), sizes[2])
    return p


def prepare_params(p):
    """One-time re-layout of torch-convention params into kernel-ready bf16 operands."""
    bf16 = jnp.bfloat16
    prep = {}
    prep["w1"] = p["w1"].reshape(C1, KIN1).T.astype(bf16)                         # (256, 32)
    prep["b1"] = p["b1"].reshape(1, C1).astype(jnp.float32)
    prep["w2"] = p["w2"].transpose(2, 3, 1, 0).reshape(NP2, C1, C2).astype(bf16)  # (16,32,64)
    prep["b2"] = p["b2"].reshape(1, C2).astype(jnp.float32)
    prep["w3"] = p["w3"].transpose(2, 3, 1, 0).reshape(NP3, C2, C3).astype(bf16)  # (9,64,64)
    prep["b3"] = p["b3"].reshape(1, C3).astype(jnp.float32)
    # fc1 split: conv-feature rows permuted from torch NCHW flatten order (c3*NSP + s) to
    # the kernel's (spatial s, channel c3) order; plus the 12 scalar-feature rows.
    wconv = p["fc1_w"][3:3 + FEATS]
    prep["wc"] = wconv.reshape(C3, NSP, HID).transpose(1, 0, 2).astype(bf16)      # (4,64,512)
    prep["ws"] = jnp.concatenate([p["fc1_w"][0:3], p["fc1_w"][3 + FEATS:]],
                                 axis=0).astype(bf16)                             # (12, 512)
    prep["bf1"] = p["fc1_b"].reshape(1, HID).astype(jnp.float32)
    prep["wf2"] = p["fc2_w"].astype(bf16)                                         # (512, 512)
    prep["bf2"] = p["fc2_b"].reshape(1, HID).astype(jnp.float32)
    prep["wf3"] = p["fc3_w"].reshape(1, HID).astype(jnp.float32)                  # (1, 512)
    prep["bf3"] = p["fc3_b"].reshape(1, 1).astype(jnp.float32)
    return prep


# --- QNetCNN.forward --------------------------------------------------------------------
def qnet_forward(prep, obs, action):
    speed, gear, rpm, images, action1, action2 = obs
    P = _build_conv1_patches(images)                                       # (512, 256) bf16
    scal = jnp.concatenate([speed, gear, rpm, action1, action2, action],
                           axis=-1).astype(jnp.bfloat16)                   # (B, 12)
    q = _qnet_pallas(P, scal, prep, images.shape[0])                       # (B, 1) f32
    return jnp.squeeze(q, -1)                                              # (B,)


# --- pure-JAX f32 reference, faithful to the PyTorch module -----------------------------
def qnet_reference(p, obs, action):
    speed, gear, rpm, images, action1, action2 = obs
    dn = ("NCHW", "OIHW", "NCHW")
    x = jax.lax.conv_general_dilated(images, p["w1"], (S1, S1), "VALID",
                                     dimension_numbers=dn)
    x = jax.nn.relu(x + p["b1"][None, :, None, None])
    x = jax.lax.conv_general_dilated(x, p["w2"], (S2, S2), "VALID", dimension_numbers=dn)
    x = jax.nn.relu(x + p["b2"][None, :, None, None])
    x = jax.lax.conv_general_dilated(x, p["w3"], (S3, S3), "VALID", dimension_numbers=dn)
    x = jax.nn.relu(x + p["b3"][None, :, None, None])
    x = x.reshape(x.shape[0], -1)                              # torch .view(B, -1) on NCHW
    x = jnp.concatenate([speed, gear, rpm, x, action1, action2, action], axis=-1)
    h1 = jax.nn.relu(x @ p["fc1_w"] + p["fc1_b"])
    h2 = jax.nn.relu(h1 @ p["fc2_w"] + p["fc2_b"])
    q = h2 @ p["fc3_w"] + p["fc3_b"]
    return jnp.squeeze(q, -1)


if __name__ == "__main__":
    key = jax.random.PRNGKey(0)
    pkey, dkey = jax.random.split(key)
    params = init_params(pkey)
    prep = prepare_params(params)

    dks = jax.random.split(dkey, 7)
    speed   = jax.random.normal(dks[0], (BATCH, 1), jnp.float32)
    gear    = jax.random.normal(dks[1], (BATCH, 1), jnp.float32)
    rpm     = jax.random.normal(dks[2], (BATCH, 1), jnp.float32)
    images  = jax.random.normal(dks[3], (BATCH, IMG_HIST_LEN, IMG_HEIGHT, IMG_WIDTH),
                                jnp.float32)
    action1 = jax.random.normal(dks[4], (BATCH, 3), jnp.float32)
    action2 = jax.random.normal(dks[5], (BATCH, 3), jnp.float32)
    action  = jax.random.normal(dks[6], (BATCH, 3), jnp.float32)

    obs = (speed, gear, rpm, images, action1, action2)
    q = jax.jit(qnet_forward)(prep, obs, action)
    q = jax.block_until_ready(q)
    assert q.shape == (BATCH,), q.shape
    assert bool(jnp.all(jnp.isfinite(q)))

    # bf16-tolerance check of the fused kernel against the torch-faithful f32 reference.
    q_ref = jax.block_until_ready(jax.jit(qnet_reference)(params, obs, action))
    err = float(jnp.max(jnp.abs(q - q_ref)))
    assert err < 3e-2, (err, q, q_ref)

    print("KERNEL_OK")
</pallas_src>

<mosaic_0001>
module attributes {stable_mosaic.version = 11 : i64} {
  func.func @_qnet_kernel(%arg0: i32, %arg1: memref<512x256xbf16, #tpu.memory_space<vmem>>, %arg2: memref<2x12xbf16, #tpu.memory_space<vmem>>, %arg3: memref<256x32xbf16, #tpu.memory_space<vmem>>, %arg4: memref<1x32xf32, #tpu.memory_space<vmem>>, %arg5: memref<16x32x64xbf16, #tpu.memory_space<vmem>>, %arg6: memref<1x64xf32, #tpu.memory_space<vmem>>, %arg7: memref<9x64x64xbf16, #tpu.memory_space<vmem>>, %arg8: memref<1x64xf32, #tpu.memory_space<vmem>>, %arg9: memref<12x512xbf16, #tpu.memory_space<vmem>>, %arg10: memref<1x512xf32, #tpu.memory_space<vmem>>, %arg11: memref<1x512xf32, #tpu.memory_space<vmem>>, %arg12: memref<1x512xf32, #tpu.memory_space<vmem>>, %arg13: memref<1x1xf32, #tpu.memory_space<vmem>>, %arg14: memref<4x64x512xbf16, #tpu.memory_space<any>>, %arg15: memref<512x512xbf16, #tpu.memory_space<any>>, %arg16: memref<2x1xf32, #tpu.memory_space<vmem>>, %arg17: memref<512x32xbf16, #tpu.memory_space<vmem>>, %arg18: memref<4x64x512xbf16, #tpu.memory_space<vmem>>, %arg19: memref<512x512xbf16, #tpu.memory_space<vmem>>, %arg20: memref<2x!tpu.dma_semaphore, #tpu.memory_space<semaphore_mem>>) attributes {dimension_semantics = [#tpu.dimension_semantics<arbitrary>], iteration_bounds = array<i64: 1>, scalar_prefetch = 0 : i64, scratch_operands = 4 : i64, tpu.core_type = #tpu.core_type<tc>, window_params = [{pipeline_mode = #tpu.pipeline_mode<synchronous>, transform_indices = @transform_0, window_bounds = array<i64: 512, 256>}, {pipeline_mode = #tpu.pipeline_mode<synchronous>, transform_indices = @transform_1, window_bounds = array<i64: 2, 12>}, {pipeline_mode = #tpu.pipeline_mode<synchronous>, transform_indices = @transform_2, window_bounds = array<i64: 256, 32>}, {pipeline_mode = #tpu.pipeline_mode<synchronous>, transform_indices = @transform_3, window_bounds = array<i64: 1, 32>}, {pipeline_mode = #tpu.pipeline_mode<synchronous>, transform_indices = @transform_4, window_bounds = array<i64: 16, 32, 64>}, {pipeline_mode = #tpu.pipeline_mode<synchronous>, transform_indices = @transform_5, window_bounds = array<i64: 1, 64>}, {pipeline_mode = #tpu.pipeline_mode<synchronous>, transform_indices = @transform_6, window_bounds = array<i64: 9, 64, 64>}, {pipeline_mode = #tpu.pipeline_mode<synchronous>, transform_indices = @transform_7, window_bounds = array<i64: 1, 64>}, {pipeline_mode = #tpu.pipeline_mode<synchronous>, transform_indices = @transform_8, window_bounds = array<i64: 12, 512>}, {pipeline_mode = #tpu.pipeline_mode<synchronous>, transform_indices = @transform_9, window_bounds = array<i64: 1, 512>}, {pipeline_mode = #tpu.pipeline_mode<synchronous>, transform_indices = @transform_10, window_bounds = array<i64: 1, 512>}, {pipeline_mode = #tpu.pipeline_mode<synchronous>, transform_indices = @transform_11, window_bounds = array<i64: 1, 512>}, {pipeline_mode = #tpu.pipeline_mode<synchronous>, transform_indices = @transform_12, window_bounds = array<i64: 1, 1>}, {}, {}, {pipeline_mode = #tpu.pipeline_mode<synchronous>, transform_indices = @transform_15, window_bounds = array<i64: 2, 1>}]} {
    %c0_i32 = arith.constant 0 : i32
    %0 = tpu.memref_slice %arg20[%c0_i32] : memref<2x!tpu.dma_semaphore, #tpu.memory_space<semaphore_mem>> -> memref<1x!tpu.dma_semaphore, #tpu.memory_space<semaphore_mem>>
    %1 = tpu.memref_squeeze %0 : memref<1x!tpu.dma_semaphore, #tpu.memory_space<semaphore_mem>> -> memref<!tpu.dma_semaphore, #tpu.memory_space<semaphore_mem>>
    tpu.enqueue_dma source(%arg14 : memref<4x64x512xbf16, #tpu.memory_space<any>>) target(%arg18 : memref<4x64x512xbf16, #tpu.memory_space<vmem>>) target_semaphore(%1 : memref<!tpu.dma_semaphore, #tpu.memory_space<semaphore_mem>>)
    %c1_i32 = arith.constant 1 : i32
    %2 = tpu.memref_slice %arg20[%c1_i32] : memref<2x!tpu.dma_semaphore, #tpu.memory_space<semaphore_mem>> -> memref<1x!tpu.dma_semaphore, #tpu.memory_space<semaphore_mem>>
    %3 = tpu.memref_squeeze %2 : memref<1x!tpu.dma_semaphore, #tpu.memory_space<semaphore_mem>> -> memref<!tpu.dma_semaphore, #tpu.memory_space<semaphore_mem>>
    tpu.enqueue_dma source(%arg15 : memref<512x512xbf16, #tpu.memory_space<any>>) target(%arg19 : memref<512x512xbf16, #tpu.memory_space<vmem>>) target_semaphore(%3 : memref<!tpu.dma_semaphore, #tpu.memory_space<semaphore_mem>>)
    %c0 = arith.constant 0 : index
    %c0_0 = arith.constant 0 : index
    %4 = vector.load %arg1[%c0, %c0_0] : memref<512x256xbf16, #tpu.memory_space<vmem>>, vector<512x256xbf16>
    %c0_1 = arith.constant 0 : index
    %c0_2 = arith.constant 0 : index
    %5 = vector.load %arg3[%c0_1, %c0_2] : memref<256x32xbf16, #tpu.memory_space<vmem>>, vector<256x32xbf16>
    %cst = arith.constant dense<0.000000e+00> : vector<512x32xf32>
    %6 = tpu.matmul %4, %5, %cst {dimension_numbers = #tpu.dot_dimension_numbers<[1], [0], [0], [1], [0, 0, 1, 1], [], []>} : vector<512x256xbf16>, vector<256x32xbf16>, vector<512x32xf32> -> vector<512x32xf32>
    %c0_3 = arith.constant 0 : index
    %c0_4 = arith.constant 0 : index
    %7 = vector.load %arg4[%c0_3, %c0_4] : memref<1x32xf32, #tpu.memory_space<vmem>>, vector<1x32xf32>
    %8 = vector.broadcast %7 : vector<1x32xf32> to vector<512x32xf32>
    %9 = arith.addf %6, %8 : vector<512x32xf32>
    %cst_5 = arith.constant 0.000000e+00 : f32
    %10 = vector.broadcast %cst_5 : f32 to vector<512x32xf32>
    %11 = arith.maximumf %9, %10 : vector<512x32xf32>
    %12 = arith.truncf %11 : vector<512x32xf32> to vector<512x32xbf16>
    %c0_6 = arith.constant 0 : index
    %c0_7 = arith.constant 0 : index
    %13 = vector.load %arg17[%c0_6, %c0_7] : memref<512x32xbf16, #tpu.memory_space<vmem>>, vector<512x32xbf16>
    tpu.vector_store %arg17[%c0_6, %c0_7], %12 {strides = array<i32>} : memref<512x32xbf16, #tpu.memory_space<vmem>>, vector<512x32xbf16>,
    %cst_8 = arith.constant 0.000000e+00 : f32
    %14 = vector.broadcast %cst_8 : f32 to vector<32x64xf32>
    %c0_9 = arith.constant 0 : index
    %c0_10 = arith.constant 0 : index
    %15 = vector.load %arg17[%c0_9, %c0_10] : memref<512x32xbf16, #tpu.memory_space<vmem>>, vector<32x32xbf16>
    %c0_11 = arith.constant 0 : index
    %c0_12 = arith.constant 0 : index
    %c0_13 = arith.constant 0 : index
    %16 = vector.load %arg5[%c0_11, %c0_12, %c0_13] : memref<16x32x64xbf16, #tpu.memory_space<vmem>>, vector<1x32x64xbf16>
    %17 = vector.shape_cast %16 : vector<1x32x64xbf16> to vector<32x64xbf16>
    %cst_14 = arith.constant dense<0.000000e+00> : vector<32x64xf32>
    %18 = tpu.matmul %15, %17, %cst_14 {dimension_numbers = #tpu.dot_dimension_numbers<[1], [0], [0], [1], [0, 0, 1, 1], [], []>} : vector<32x32xbf16>, vector<32x64xbf16>, vector<32x64xf32> -> vector<32x64xf32>
    %19 = arith.addf %14, %18 : vector<32x64xf32>
    %c32 = arith.constant 32 : index
    %c0_15 = arith.constant 0 : index
    %20 = vector.load %arg17[%c32, %c0_15] : memref<512x32xbf16, #tpu.memory_space<vmem>>, vector<32x32xbf16>
    %c1 = arith.constant 1 : index
    %c0_16 = arith.constant 0 : index
    %c0_17 = arith.constant 0 : index
    %21 = vector.load %arg5[%c1, %c0_16, %c0_17] : memref<16x32x64xbf16, #tpu.memory_space<vmem>>, vector<1x32x64xbf16>
    %22 = vector.shape_cast %21 : vector<1x32x64xbf16> to vector<32x64xbf16>
    %cst_18 = arith.constant dense<0.000000e+00> : vector<32x64xf32>
    %23 = tpu.matmul %20, %22, %cst_18 {dimension_numbers = #tpu.dot_dimension_numbers<[1], [0], [0], [1], [0, 0, 1, 1], [], []>} : vector<32x32xbf16>, vector<32x64xbf16>, vector<32x64xf32> -> vector<32x64xf32>
    %24 = arith.addf %19, %23 : vector<32x64xf32>
    %c64 = arith.constant 64 : index
    %c0_19 = arith.constant 0 : index
    %25 = vector.load %arg17[%c64, %c0_19] : memref<512x32xbf16, #tpu.memory_space<vmem>>, vector<32x32xbf16>
    %c2 = arith.constant 2 : index
    %c0_20 = arith.constant 0 : index
    %c0_21 = arith.constant 0 : index
    %26 = vector.load %arg5[%c2, %c0_20, %c0_21] : memref<16x32x64xbf16, #tpu.memory_space<vmem>>, vector<1x32x64xbf16>
    %27 = vector.shape_cast %26 : vector<1x32x64xbf16> to vector<32x64xbf16>
    %cst_22 = arith.constant dense<0.000000e+00> : vector<32x64xf32>
    %28 = tpu.matmul %25, %27, %cst_22 {dimension_numbers = #tpu.dot_dimension_numbers<[1], [0], [0], [1], [0, 0, 1, 1], [], []>} : vector<32x32xbf16>, vector<32x64xbf16>, vector<32x64xf32> -> vector<32x64xf32>
    %29 = arith.addf %24, %28 : vector<32x64xf32>
    %c96 = arith.constant 96 : index
    %c0_23 = arith.constant 0 : index
    %30 = vector.load %arg17[%c96, %c0_23] : memref<512x32xbf16, #tpu.memory_space<vmem>>, vector<32x32xbf16>
    %c3 = arith.constant 3 : index
    %c0_24 = arith.constant 0 : index
    %c0_25 = arith.constant 0 : index
    %31 = vector.load %arg5[%c3, %c0_24, %c0_25] : memref<16x32x64xbf16, #tpu.memory_space<vmem>>, vector<1x32x64xbf16>
    %32 = vector.shape_cast %31 : vector<1x32x64xbf16> to vector<32x64xbf16>
    %cst_26 = arith.constant dense<0.000000e+00> : vector<32x64xf32>
    %33 = tpu.matmul %30, %32, %cst_26 {dimension_numbers = #tpu.dot_dimension_numbers<[1], [0], [0], [1], [0, 0, 1, 1], [], []>} : vector<32x32xbf16>, vector<32x64xbf16>, vector<32x64xf32> -> vector<32x64xf32>
    %34 = arith.addf %29, %33 : vector<32x64xf32>
    %c128 = arith.constant 128 : index
    %c0_27 = arith.constant 0 : index
    %35 = vector.load %arg17[%c128, %c0_27] : memref<512x32xbf16, #tpu.memory_space<vmem>>, vector<32x32xbf16>
    %c4 = arith.constant 4 : index
    %c0_28 = arith.constant 0 : index
    %c0_29 = arith.constant 0 : index
    %36 = vector.load %arg5[%c4, %c0_28, %c0_29] : memref<16x32x64xbf16, #tpu.memory_space<vmem>>, vector<1x32x64xbf16>
    %37 = vector.shape_cast %36 : vector<1x32x64xbf16> to vector<32x64xbf16>
    %cst_30 = arith.constant dense<0.000000e+00> : vector<32x64xf32>
    %38 = tpu.matmul %35, %37, %cst_30 {dimension_numbers = #tpu.dot_dimension_numbers<[1], [0], [0], [1], [0, 0, 1, 1], [], []>} : vector<32x32xbf16>, vector<32x64xbf16>, vector<32x64xf32> -> vector<32x64xf32>
    %39 = arith.addf %34, %38 : vector<32x64xf32>
    %c160 = arith.constant 160 : index
    %c0_31 = arith.constant 0 : index
    %40 = vector.load %arg17[%c160, %c0_31] : memref<512x32xbf16, #tpu.memory_space<vmem>>, vector<32x32xbf16>
    %c5 = arith.constant 5 : index
    %c0_32 = arith.constant 0 : index
    %c0_33 = arith.constant 0 : index
    %41 = vector.load %arg5[%c5, %c0_32, %c0_33] : memref<16x32x64xbf16, #tpu.memory_space<vmem>>, vector<1x32x64xbf16>
    %42 = vector.shape_cast %41 : vector<1x32x64xbf16> to vector<32x64xbf16>
    %cst_34 = arith.constant dense<0.000000e+00> : vector<32x64xf32>
    %43 = tpu.matmul %40, %42, %cst_34 {dimension_numbers = #tpu.dot_dimension_numbers<[1], [0], [0], [1], [0, 0, 1, 1], [], []>} : vector<32x32xbf16>, vector<32x64xbf16>, vector<32x64xf32> -> vector<32x64xf32>
    %44 = arith.addf %39, %43 : vector<32x64xf32>
    %c192 = arith.constant 192 : index
    %c0_35 = arith.constant 0 : index
    %45 = vector.load %arg17[%c192, %c0_35] : memref<512x32xbf16, #tpu.memory_space<vmem>>, vector<32x32xbf16>
    %c6 = arith.constant 6 : index
    %c0_36 = arith.constant 0 : index
    %c0_37 = arith.constant 0 : index
    %46 = vector.load %arg5[%c6, %c0_36, %c0_37] : memref<16x32x64xbf16, #tpu.memory_space<vmem>>, vector<1x32x64xbf16>
    %47 = vector.shape_cast %46 : vector<1x32x64xbf16> to vector<32x64xbf16>
    %cst_38 = arith.constant dense<0.000000e+00> : vector<32x64xf32>
    %48 = tpu.matmul %45, %47, %cst_38 {dimension_numbers = #tpu.dot_dimension_numbers<[1], [0], [0], [1], [0, 0, 1, 1], [], []>} : vector<32x32xbf16>, vector<32x64xbf16>, vector<32x64xf32> -> vector<32x64xf32>
    %49 = arith.addf %44, %48 : vector<32x64xf32>
    %c224 = arith.constant 224 : index
    %c0_39 = arith.constant 0 : index
    %50 = vector.load %arg17[%c224, %c0_39] : memref<512x32xbf16, #tpu.memory_space<vmem>>, vector<32x32xbf16>
    %c7 = arith.constant 7 : index
    %c0_40 = arith.constant 0 : index
    %c0_41 = arith.constant 0 : index
    %51 = vector.load %arg5[%c7, %c0_40, %c0_41] : memref<16x32x64xbf16, #tpu.memory_space<vmem>>, vector<1x32x64xbf16>
    %52 = vector.shape_cast %51 : vector<1x32x64xbf16> to vector<32x64xbf16>
    %cst_42 = arith.constant dense<0.000000e+00> : vector<32x64xf32>
    %53 = tpu.matmul %50, %52, %cst_42 {dimension_numbers = #tpu.dot_dimension_numbers<[1], [0], [0], [1], [0, 0, 1, 1], [], []>} : vector<32x32xbf16>, vector<32x64xbf16>, vector<32x64xf32> -> vector<32x64xf32>
    %54 = arith.addf %49, %53 : vector<32x64xf32>
    %c256 = arith.constant 256 : index
    %c0_43 = arith.constant 0 : index
    %55 = vector.load %arg17[%c256, %c0_43] : memref<512x32xbf16, #tpu.memory_space<vmem>>, vector<32x32xbf16>
    %c8 = arith.constant 8 : index
    %c0_44 = arith.constant 0 : index
    %c0_45 = arith.constant 0 : index
    %56 = vector.load %arg5[%c8, %c0_44, %c0_45] : memref<16x32x64xbf16, #tpu.memory_space<vmem>>, vector<1x32x64xbf16>
    %57 = vector.shape_cast %56 : vector<1x32x64xbf16> to vector<32x64xbf16>
    %cst_46 = arith.constant dense<0.000000e+00> : vector<32x64xf32>
    %58 = tpu.matmul %55, %57, %cst_46 {dimension_numbers = #tpu.dot_dimension_numbers<[1], [0], [0], [1], [0, 0, 1, 1], [], []>} : vector<32x32xbf16>, vector<32x64xbf16>, vector<32x64xf32> -> vector<32x64xf32>
    %59 = arith.addf %54, %58 : vector<32x64xf32>
    %c288 = arith.constant 288 : index
    %c0_47 = arith.constant 0 : index
    %60 = vector.load %arg17[%c288, %c0_47] : memref<512x32xbf16, #tpu.memory_space<vmem>>, vector<32x32xbf16>
    %c9 = arith.constant 9 : index
    %c0_48 = arith.constant 0 : index
    %c0_49 = arith.constant 0 : index
    %61 = vector.load %arg5[%c9, %c0_48, %c0_49] : memref<16x32x64xbf16, #tpu.memory_space<vmem>>, vector<1x32x64xbf16>
    %62 = vector.shape_cast %61 : vector<1x32x64xbf16> to vector<32x64xbf16>
    %cst_50 = arith.constant dense<0.000000e+00> : vector<32x64xf32>
    %63 = tpu.matmul %60, %62, %cst_50 {dimension_numbers = #tpu.dot_dimension_numbers<[1], [0], [0], [1], [0, 0, 1, 1], [], []>} : vector<32x32xbf16>, vector<32x64xbf16>, vector<32x64xf32> -> vector<32x64xf32>
    %64 = arith.addf %59, %63 : vector<32x64xf32>
    %c320 = arith.constant 320 : index
    %c0_51 = arith.constant 0 : index
    %65 = vector.load %arg17[%c320, %c0_51] : memref<512x32xbf16, #tpu.memory_space<vmem>>, vector<32x32xbf16>
    %c10 = arith.constant 10 : index
    %c0_52 = arith.constant 0 : index
    %c0_53 = arith.constant 0 : index
    %66 = vector.load %arg5[%c10, %c0_52, %c0_53] : memref<16x32x64xbf16, #tpu.memory_space<vmem>>, vector<1x32x64xbf16>
    %67 = vector.shape_cast %66 : vector<1x32x64xbf16> to vector<32x64xbf16>
    %cst_54 = arith.constant dense<0.000000e+00> : vector<32x64xf32>
    %68 = tpu.matmul %65, %67, %cst_54 {dimension_numbers = #tpu.dot_dimension_numbers<[1], [0], [0], [1], [0, 0, 1, 1], [], []>} : vector<32x32xbf16>, vector<32x64xbf16>, vector<32x64xf32> -> vector<32x64xf32>
    %69 = arith.addf %64, %68 : vector<32x64xf32>
    %c352 = arith.constant 352 : index
    %c0_55 = arith.constant 0 : index
    %70 = vector.load %arg17[%c352, %c0_55] : memref<512x32xbf16, #tpu.memory_space<vmem>>, vector<32x32xbf16>
    %c11 = arith.constant 11 : index
    %c0_56 = arith.constant 0 : index
    %c0_57 = arith.constant 0 : index
    %71 = vector.load %arg5[%c11, %c0_56, %c0_57] : memref<16x32x64xbf16, #tpu.memory_space<vmem>>, vector<1x32x64xbf16>
    %72 = vector.shape_cast %71 : vector<1x32x64xbf16> to vector<32x64xbf16>
    %cst_58 = arith.constant dense<0.000000e+00> : vector<32x64xf32>
    %73 = tpu.matmul %70, %72, %cst_58 {dimension_numbers = #tpu.dot_dimension_numbers<[1], [0], [0], [1], [0, 0, 1, 1], [], []>} : vector<32x32xbf16>, vector<32x64xbf16>, vector<32x64xf32> -> vector<32x64xf32>
    %74 = arith.addf %69, %73 : vector<32x64xf32>
    %c384 = arith.constant 384 : index
    %c0_59 = arith.constant 0 : index
    %75 = vector.load %arg17[%c384, %c0_59] : memref<512x32xbf16, #tpu.memory_space<vmem>>, vector<32x32xbf16>
    %c12 = arith.constant 12 : index
    %c0_60 = arith.constant 0 : index
    %c0_61 = arith.constant 0 : index
    %76 = vector.load %arg5[%c12, %c0_60, %c0_61] : memref<16x32x64xbf16, #tpu.memory_space<vmem>>, vector<1x32x64xbf16>
    %77 = vector.shape_cast %76 : vector<1x32x64xbf16> to vector<32x64xbf16>
    %cst_62 = arith.constant dense<0.000000e+00> : vector<32x64xf32>
    %78 = tpu.matmul %75, %77, %cst_62 {dimension_numbers = #tpu.dot_dimension_numbers<[1], [0], [0], [1], [0, 0, 1, 1], [], []>} : vector<32x32xbf16>, vector<32x64xbf16>, vector<32x64xf32> -> vector<32x64xf32>
    %79 = arith.addf %74, %78 : vector<32x64xf32>
    %c416 = arith.constant 416 : index
    %c0_63 = arith.constant 0 : index
    %80 = vector.load %arg17[%c416, %c0_63] : memref<512x32xbf16, #tpu.memory_space<vmem>>, vector<32x32xbf16>
    %c13 = arith.constant 13 : index
    %c0_64 = arith.constant 0 : index
    %c0_65 = arith.constant 0 : index
    %81 = vector.load %arg5[%c13, %c0_64, %c0_65] : memref<16x32x64xbf16, #tpu.memory_space<vmem>>, vector<1x32x64xbf16>
    %82 = vector.shape_cast %81 : vector<1x32x64xbf16> to vector<32x64xbf16>
    %cst_66 = arith.constant dense<0.000000e+00> : vector<32x64xf32>
    %83 = tpu.matmul %80, %82, %cst_66 {dimension_numbers = #tpu.dot_dimension_numbers<[1], [0], [0], [1], [0, 0, 1, 1], [], []>} : vector<32x32xbf16>, vector<32x64xbf16>, vector<32x64xf32> -> vector<32x64xf32>
    %84 = arith.addf %79, %83 : vector<32x64xf32>
    %c448 = arith.constant 448 : index
    %c0_67 = arith.constant 0 : index
    %85 = vector.load %arg17[%c448, %c0_67] : memref<512x32xbf16, #tpu.memory_space<vmem>>, vector<32x32xbf16>
    %c14 = arith.constant 14 : index
    %c0_68 = arith.constant 0 : index
    %c0_69 = arith.constant 0 : index
    %86 = vector.load %arg5[%c14, %c0_68, %c0_69] : memref<16x32x64xbf16, #tpu.memory_space<vmem>>, vector<1x32x64xbf16>
    %87 = vector.shape_cast %86 : vector<1x32x64xbf16> to vector<32x64xbf16>
    %cst_70 = arith.constant dense<0.000000e+00> : vector<32x64xf32>
    %88 = tpu.matmul %85, %87, %cst_70 {dimension_numbers = #tpu.dot_dimension_numbers<[1], [0], [0], [1], [0, 0, 1, 1], [], []>} : vector<32x32xbf16>, vector<32x64xbf16>, vector<32x64xf32> -> vector<32x64xf32>
    %89 = arith.addf %84, %88 : vector<32x64xf32>
    %c480 = arith.constant 480 : index
    %c0_71 = arith.constant 0 : index
    %90 = vector.load %arg17[%c480, %c0_71] : memref<512x32xbf16, #tpu.memory_space<vmem>>, vector<32x32xbf16>
    %c15 = arith.constant 15 : index
    %c0_72 = arith.constant 0 : index
    %c0_73 = arith.constant 0 : index
    %91 = vector.load %arg5[%c15, %c0_72, %c0_73] : memref<16x32x64xbf16, #tpu.memory_space<vmem>>, vector<1x32x64xbf16>
    %92 = vector.shape_cast %91 : vector<1x32x64xbf16> to vector<32x64xbf16>
    %cst_74 = arith.constant dense<0.000000e+00> : vector<32x64xf32>
    %93 = tpu.matmul %90, %92, %cst_74 {dimension_numbers = #tpu.dot_dimension_numbers<[1], [0], [0], [1], [0, 0, 1, 1], [], []>} : vector<32x32xbf16>, vector<32x64xbf16>, vector<32x64xf32> -> vector<32x64xf32>
    %94 = arith.addf %89, %93 : vector<32x64xf32>
    %c0_75 = arith.constant 0 : index
    %c0_76 = arith.constant 0 : index
    %95 = vector.load %arg6[%c0_75, %c0_76] : memref<1x64xf32, #tpu.memory_space<vmem>>, vector<1x64xf32>
    %96 = vector.broadcast %95 : vector<1x64xf32> to vector<32x64xf32>
    %97 = arith.addf %94, %96 : vector<32x64xf32>
    %cst_77 = arith.constant 0.000000e+00 : f32
    %98 = vector.broadcast %cst_77 : f32 to vector<32x64xf32>
    %99 = arith.maximumf %97, %98 : vector<32x64xf32>
    %100 = arith.truncf %99 : vector<32x64xf32> to vector<32x64xbf16>
    %cst_78 = arith.constant 0.000000e+00 : f32
    %101 = vector.broadcast %cst_78 : f32 to vector<4x64xf32>
    %cst_79 = arith.constant 0.000000e+00 : f32
    %102 = vector.broadcast %cst_79 : f32 to vector<4x64xf32>
    %c0_80 = arith.constant 0 : index
    %c0_81 = arith.constant 0 : index
    %c0_82 = arith.constant 0 : index
    %103 = vector.load %arg7[%c0_80, %c0_81, %c0_82] : memref<9x64x64xbf16, #tpu.memory_space<vmem>>, vector<1x64x64xbf16>
    %104 = vector.shape_cast %103 : vector<1x64x64xbf16> to vector<64x64xbf16>
    %105 = vector.extract_strided_slice %100 {offsets = [0, 0], sizes = [4, 64], strides = [1, 1]} : vector<32x64xbf16> to vector<4x64xbf16>
    %cst_83 = arith.constant dense<0.000000e+00> : vector<4x64xf32>
    %106 = tpu.matmul %105, %104, %cst_83 {dimension_numbers = #tpu.dot_dimension_numbers<[1], [0], [0], [1], [0, 0, 1, 1], [], []>} : vector<4x64xbf16>, vector<64x64xbf16>, vector<4x64xf32> -> vector<4x64xf32>
    %107 = arith.addf %101, %106 : vector<4x64xf32>
    %108 = vector.extract_strided_slice %100 {offsets = [8, 0], sizes = [4, 64], strides = [1, 1]} : vector<32x64xbf16> to vector<4x64xbf16>
    %cst_84 = arith.constant dense<0.000000e+00> : vector<4x64xf32>
    %109 = tpu.matmul %108, %104, %cst_84 {dimension_numbers = #tpu.dot_dimension_numbers<[1], [0], [0], [1], [0, 0, 1, 1], [], []>} : vector<4x64xbf16>, vector<64x64xbf16>, vector<4x64xf32> -> vector<4x64xf32>
    %110 = arith.addf %102, %109 : vector<4x64xf32>
    %c1_85 = arith.constant 1 : index
    %c0_86 = arith.constant 0 : index
    %c0_87 = arith.constant 0 : index
    %111 = vector.load %arg7[%c1_85, %c0_86, %c0_87] : memref<9x64x64xbf16, #tpu.memory_space<vmem>>, vector<1x64x64xbf16>
    %112 = vector.shape_cast %111 : vector<1x64x64xbf16> to vector<64x64xbf16>
    %113 = vector.extract_strided_slice %100 {offsets = [2, 0], sizes = [4, 64], strides = [1, 1]} : vector<32x64xbf16> to vector<4x64xbf16>
    %cst_88 = arith.constant dense<0.000000e+00> : vector<4x64xf32>
    %114 = tpu.matmul %113, %112, %cst_88 {dimension_numbers = #tpu.dot_dimension_numbers<[1], [0], [0], [1], [0, 0, 1, 1], [], []>} : vector<4x64xbf16>, vector<64x64xbf16>, vector<4x64xf32> -> vector<4x64xf32>
    %115 = arith.addf %107, %114 : vector<4x64xf32>
    %116 = vector.extract_strided_slice %100 {offsets = [10, 0], sizes = [4, 64], strides = [1, 1]} : vector<32x64xbf16> to vector<4x64xbf16>
    %cst_89 = arith.constant dense<0.000000e+00> : vector<4x64xf32>
    %117 = tpu.matmul %116, %112, %cst_89 {dimension_numbers = #tpu.dot_dimension_numbers<[1], [0], [0], [1], [0, 0, 1, 1], [], []>} : vector<4x64xbf16>, vector<64x64xbf16>, vector<4x64xf32> -> vector<4x64xf32>
    %118 = arith.addf %110, %117 : vector<4x64xf32>
    %c2_90 = arith.constant 2 : index
    %c0_91 = arith.constant 0 : index
    %c0_92 = arith.constant 0 : index
    %119 = vector.load %arg7[%c2_90, %c0_91, %c0_92] : memref<9x64x64xbf16, #tpu.memory_space<vmem>>, vector<1x64x64xbf16>
    %120 = vector.shape_cast %119 : vector<1x64x64xbf16> to vector<64x64xbf16>
    %121 = vector.extract_strided_slice %100 {offsets = [4, 0], sizes = [4, 64], strides = [1, 1]} : vector<32x64xbf16> to vector<4x64xbf16>
    %cst_93 = arith.constant dense<0.000000e+00> : vector<4x64xf32>
    %122 = tpu.matmul %121, %120, %cst_93 {dimension_numbers = #tpu.dot_dimension_numbers<[1], [0], [0], [1], [0, 0, 1, 1], [], []>} : vector<4x64xbf16>, vector<64x64xbf16>, vector<4x64xf32> -> vector<4x64xf32>
    %123 = arith.addf %115, %122 : vector<4x64xf32>
    %124 = vector.extract_strided_slice %100 {offsets = [12, 0], sizes = [4, 64], strides = [1, 1]} : vector<32x64xbf16> to vector<4x64xbf16>
    %cst_94 = arith.constant dense<0.000000e+00> : vector<4x64xf32>
    %125 = tpu.matmul %124, %120, %cst_94 {dimension_numbers = #tpu.dot_dimension_numbers<[1], [0], [0], [1], [0, 0, 1, 1], [], []>} : vector<4x64xbf16>, vector<64x64xbf16>, vector<4x64xf32> -> vector<4x64xf32>
    %126 = arith.addf %118, %125 : vector<4x64xf32>
    %c3_95 = arith.constant 3 : index
    %c0_96 = arith.constant 0 : index
    %c0_97 = arith.constant 0 : index
    %127 = vector.load %arg7[%c3_95, %c0_96, %c0_97] : memref<9x64x64xbf16, #tpu.memory_space<vmem>>, vector<1x64x64xbf16>
    %128 = vector.shape_cast %127 : vector<1x64x64xbf16> to vector<64x64xbf16>
    %129 = vector.extract_strided_slice %100 {offsets = [8, 0], sizes = [4, 64], strides = [1, 1]} : vector<32x64xbf16> to vector<4x64xbf16>
    %cst_98 = arith.constant dense<0.000000e+00> : vector<4x64xf32>
    %130 = tpu.matmul %129, %128, %cst_98 {dimension_numbers = #tpu.dot_dimension_numbers<[1], [0], [0], [1], [0, 0, 1, 1], [], []>} : vector<4x64xbf16>, vector<64x64xbf16>, vector<4x64xf32> -> vector<4x64xf32>
    %131 = arith.addf %123, %130 : vector<4x64xf32>
    %132 = vector.extract_strided_slice %100 {offsets = [16, 0], sizes = [4, 64], strides = [1, 1]} : vector<32x64xbf16> to vector<4x64xbf16>
    %cst_99 = arith.constant dense<0.000000e+00> : vector<4x64xf32>
    %133 = tpu.matmul %132, %128, %cst_99 {dimension_numbers = #tpu.dot_dimension_numbers<[1], [0], [0], [1], [0, 0, 1, 1], [], []>} : vector<4x64xbf16>, vector<64x64xbf16>, vector<4x64xf32> -> vector<4x64xf32>
    %134 = arith.addf %126, %133 : vector<4x64xf32>
    %c4_100 = arith.constant 4 : index
    %c0_101 = arith.constant 0 : index
    %c0_102 = arith.constant 0 : index
    %135 = vector.load %arg7[%c4_100, %c0_101, %c0_102] : memref<9x64x64xbf16, #tpu.memory_space<vmem>>, vector<1x64x64xbf16>
    %136 = vector.shape_cast %135 : vector<1x64x64xbf16> to vector<64x64xbf16>
    %137 = vector.extract_strided_slice %100 {offsets = [10, 0], sizes = [4, 64], strides = [1, 1]} : vector<32x64xbf16> to vector<4x64xbf16>
    %cst_103 = arith.constant dense<0.000000e+00> : vector<4x64xf32>
    %138 = tpu.matmul %137, %136, %cst_103 {dimension_numbers = #tpu.dot_dimension_numbers<[1], [0], [0], [1], [0, 0, 1, 1], [], []>} : vector<4x64xbf16>, vector<64x64xbf16>, vector<4x64xf32> -> vector<4x64xf32>
    %139 = arith.addf %131, %138 : vector<4x64xf32>
    %140 = vector.extract_strided_slice %100 {offsets = [18, 0], sizes = [4, 64], strides = [1, 1]} : vector<32x64xbf16> to vector<4x64xbf16>
    %cst_104 = arith.constant dense<0.000000e+00> : vector<4x64xf32>
    %141 = tpu.matmul %140, %136, %cst_104 {dimension_numbers = #tpu.dot_dimension_numbers<[1], [0], [0], [1], [0, 0, 1, 1], [], []>} : vector<4x64xbf16>, vector<64x64xbf16>, vector<4x64xf32> -> vector<4x64xf32>
    %142 = arith.addf %134, %141 : vector<4x64xf32>
    %c5_105 = arith.constant 5 : index
    %c0_106 = arith.constant 0 : index
    %c0_107 = arith.constant 0 : index
    %143 = vector.load %arg7[%c5_105, %c0_106, %c0_107] : memref<9x64x64xbf16, #tpu.memory_space<vmem>>, vector<1x64x64xbf16>
    %144 = vector.shape_cast %143 : vector<1x64x64xbf16> to vector<64x64xbf16>
    %145 = vector.extract_strided_slice %100 {offsets = [12, 0], sizes = [4, 64], strides = [1, 1]} : vector<32x64xbf16> to vector<4x64xbf16>
    %cst_108 = arith.constant dense<0.000000e+00> : vector<4x64xf32>
    %146 = tpu.matmul %145, %144, %cst_108 {dimension_numbers = #tpu.dot_dimension_numbers<[1], [0], [0], [1], [0, 0, 1, 1], [], []>} : vector<4x64xbf16>, vector<64x64xbf16>, vector<4x64xf32> -> vector<4x64xf32>
    %147 = arith.addf %139, %146 : vector<4x64xf32>
    %148 = vector.extract_strided_slice %100 {offsets = [20, 0], sizes = [4, 64], strides = [1, 1]} : vector<32x64xbf16> to vector<4x64xbf16>
    %cst_109 = arith.constant dense<0.000000e+00> : vector<4x64xf32>
    %149 = tpu.matmul %148, %144, %cst_109 {dimension_numbers = #tpu.dot_dimension_numbers<[1], [0], [0], [1], [0, 0, 1, 1], [], []>} : vector<4x64xbf16>, vector<64x64xbf16>, vector<4x64xf32> -> vector<4x64xf32>
    %150 = arith.addf %142, %149 : vector<4x64xf32>
    %c6_110 = arith.constant 6 : index
    %c0_111 = arith.constant 0 : index
    %c0_112 = arith.constant 0 : index
    %151 = vector.load %arg7[%c6_110, %c0_111, %c0_112] : memref<9x64x64xbf16, #tpu.memory_space<vmem>>, vector<1x64x64xbf16>
    %152 = vector.shape_cast %151 : vector<1x64x64xbf16> to vector<64x64xbf16>
    %153 = vector.extract_strided_slice %100 {offsets = [16, 0], sizes = [4, 64], strides = [1, 1]} : vector<32x64xbf16> to vector<4x64xbf16>
    %cst_113 = arith.constant dense<0.000000e+00> : vector<4x64xf32>
    %154 = tpu.matmul %153, %152, %cst_113 {dimension_numbers = #tpu.dot_dimension_numbers<[1], [0], [0], [1], [0, 0, 1, 1], [], []>} : vector<4x64xbf16>, vector<64x64xbf16>, vector<4x64xf32> -> vector<4x64xf32>
    %155 = arith.addf %147, %154 : vector<4x64xf32>
    %156 = vector.extract_strided_slice %100 {offsets = [24, 0], sizes = [4, 64], strides = [1, 1]} : vector<32x64xbf16> to vector<4x64xbf16>
    %cst_114 = arith.constant dense<0.000000e+00> : vector<4x64xf32>
    %157 = tpu.matmul %156, %152, %cst_114 {dimension_numbers = #tpu.dot_dimension_numbers<[1], [0], [0], [1], [0, 0, 1, 1], [], []>} : vector<4x64xbf16>, vector<64x64xbf16>, vector<4x64xf32> -> vector<4x64xf32>
    %158 = arith.addf %150, %157 : vector<4x64xf32>
    %c7_115 = arith.constant 7 : index
    %c0_116 = arith.constant 0 : index
    %c0_117 = arith.constant 0 : index
    %159 = vector.load %arg7[%c7_115, %c0_116, %c0_117] : memref<9x64x64xbf16, #tpu.memory_space<vmem>>, vector<1x64x64xbf16>
    %160 = vector.shape_cast %159 : vector<1x64x64xbf16> to vector<64x64xbf16>
    %161 = vector.extract_strided_slice %100 {offsets = [18, 0], sizes = [4, 64], strides = [1, 1]} : vector<32x64xbf16> to vector<4x64xbf16>
    %cst_118 = arith.constant dense<0.000000e+00> : vector<4x64xf32>
    %162 = tpu.matmul %161, %160, %cst_118 {dimension_numbers = #tpu.dot_dimension_numbers<[1], [0], [0], [1], [0, 0, 1, 1], [], []>} : vector<4x64xbf16>, vector<64x64xbf16>, vector<4x64xf32> -> vector<4x64xf32>
    %163 = arith.addf %155, %162 : vector<4x64xf32>
    %164 = vector.extract_strided_slice %100 {offsets = [26, 0], sizes = [4, 64], strides = [1, 1]} : vector<32x64xbf16> to vector<4x64xbf16>
    %cst_119 = arith.constant dense<0.000000e+00> : vector<4x64xf32>
    %165 = tpu.matmul %164, %160, %cst_119 {dimension_numbers = #tpu.dot_dimension_numbers<[1], [0], [0], [1], [0, 0, 1, 1], [], []>} : vector<4x64xbf16>, vector<64x64xbf16>, vector<4x64xf32> -> vector<4x64xf32>
    %166 = arith.addf %158, %165 : vector<4x64xf32>
    %c8_120 = arith.constant 8 : index
    %c0_121 = arith.constant 0 : index
    %c0_122 = arith.constant 0 : index
    %167 = vector.load %arg7[%c8_120, %c0_121, %c0_122] : memref<9x64x64xbf16, #tpu.memory_space<vmem>>, vector<1x64x64xbf16>
    %168 = vector.shape_cast %167 : vector<1x64x64xbf16> to vector<64x64xbf16>
    %169 = vector.extract_strided_slice %100 {offsets = [20, 0], sizes = [4, 64], strides = [1, 1]} : vector<32x64xbf16> to vector<4x64xbf16>
    %cst_123 = arith.constant dense<0.000000e+00> : vector<4x64xf32>
    %170 = tpu.matmul %169, %168, %cst_123 {dimension_numbers = #tpu.dot_dimension_numbers<[1], [0], [0], [1], [0, 0, 1, 1], [], []>} : vector<4x64xbf16>, vector<64x64xbf16>, vector<4x64xf32> -> vector<4x64xf32>
    %171 = arith.addf %163, %170 : vector<4x64xf32>
    %172 = vector.extract_strided_slice %100 {offsets = [28, 0], sizes = [4, 64], strides = [1, 1]} : vector<32x64xbf16> to vector<4x64xbf16>
    %cst_124 = arith.constant dense<0.000000e+00> : vector<4x64xf32>
    %173 = tpu.matmul %172, %168, %cst_124 {dimension_numbers = #tpu.dot_dimension_numbers<[1], [0], [0], [1], [0, 0, 1, 1], [], []>} : vector<4x64xbf16>, vector<64x64xbf16>, vector<4x64xf32> -> vector<4x64xf32>
    %174 = arith.addf %166, %173 : vector<4x64xf32>
    %c0_125 = arith.constant 0 : index
    %c0_126 = arith.constant 0 : index
    %175 = vector.load %arg8[%c0_125, %c0_126] : memref<1x64xf32, #tpu.memory_space<vmem>>, vector<1x64xf32>
    %176 = vector.broadcast %175 : vector<1x64xf32> to vector<4x64xf32>
    %177 = arith.addf %171, %176 : vector<4x64xf32>
    %cst_127 = arith.constant 0.000000e+00 : f32
    %178 = vector.broadcast %cst_127 : f32 to vector<4x64xf32>
    %179 = arith.maximumf %177, %178 : vector<4x64xf32>
    %180 = arith.truncf %179 : vector<4x64xf32> to vector<4x64xbf16>
    %c0_128 = arith.constant 0 : index
    %c0_129 = arith.constant 0 : index
    %181 = vector.load %arg8[%c0_128, %c0_129] : memref<1x64xf32, #tpu.memory_space<vmem>>, vector<1x64xf32>
    %182 = vector.broadcast %181 : vector<1x64xf32> to vector<4x64xf32>
    %183 = arith.addf %174, %182 : vector<4x64xf32>
    %cst_130 = arith.constant 0.000000e+00 : f32
    %184 = vector.broadcast %cst_130 : f32 to vector<4x64xf32>
    %185 = arith.maximumf %183, %184 : vector<4x64xf32>
    %186 = arith.truncf %185 : vector<4x64xf32> to vector<4x64xbf16>
    %c0_i32_131 = arith.constant 0 : i32
    %187 = tpu.memref_slice %arg20[%c0_i32_131] : memref<2x!tpu.dma_semaphore, #tpu.memory_space<semaphore_mem>> -> memref<1x!tpu.dma_semaphore, #tpu.memory_space<semaphore_mem>>
    %188 = tpu.memref_squeeze %187 : memref<1x!tpu.dma_semaphore, #tpu.memory_space<semaphore_mem>> -> memref<!tpu.dma_semaphore, #tpu.memory_space<semaphore_mem>>
    tpu.wait_dma2 semaphore(%188 : memref<!tpu.dma_semaphore, #tpu.memory_space<semaphore_mem>>) src(%arg14 : memref<4x64x512xbf16, #tpu.memory_space<any>>) dst(%arg18 : memref<4x64x512xbf16, #tpu.memory_space<vmem>>)
    %c0_132 = arith.constant 0 : index
    %c0_133 = arith.constant 0 : index
    %189 = vector.load %arg2[%c0_132, %c0_133] : memref<2x12xbf16, #tpu.memory_space<vmem>>, vector<2x12xbf16>
    %c0_134 = arith.constant 0 : index
    %c0_135 = arith.constant 0 : index
    %190 = vector.load %arg9[%c0_134, %c0_135] : memref<12x512xbf16, #tpu.memory_space<vmem>>, vector<12x512xbf16>
    %cst_136 = arith.constant dense<0.000000e+00> : vector<2x512xf32>
    %191 = tpu.matmul %189, %190, %cst_136 {dimension_numbers = #tpu.dot_dimension_numbers<[1], [0], [0], [1], [0, 0, 1, 1], [], []>} : vector<2x12xbf16>, vector<12x512xbf16>, vector<2x512xf32> -> vector<2x512xf32>
    %192 = vector.extract_strided_slice %180 {offsets = [0, 0], sizes = [2, 64], strides = [1, 1]} : vector<4x64xbf16> to vector<2x64xbf16>
    %193 = vector.extract_strided_slice %180 {offsets = [2, 0], sizes = [2, 64], strides = [1, 1]} : vector<4x64xbf16> to vector<2x64xbf16>
    %194 = vector.extract_strided_slice %186 {offsets = [0, 0], sizes = [2, 64], strides = [1, 1]} : vector<4x64xbf16> to vector<2x64xbf16>
    %195 = vector.extract_strided_slice %186 {offsets = [2, 0], sizes = [2, 64], strides = [1, 1]} : vector<4x64xbf16> to vector<2x64xbf16>
    %c0_137 = arith.constant 0 : index
    %c0_138 = arith.constant 0 : index
    %c0_139 = arith.constant 0 : index
    %196 = vector.load %arg18[%c0_137, %c0_138, %c0_139] : memref<4x64x512xbf16, #tpu.memory_space<vmem>>, vector<1x64x512xbf16>
    %197 = vector.shape_cast %196 : vector<1x64x512xbf16> to vector<64x512xbf16>
    %cst_140 = arith.constant dense<0.000000e+00> : vector<2x512xf32>
    %198 = tpu.matmul %192, %197, %cst_140 {dimension_numbers = #tpu.dot_dimension_numbers<[1], [0], [0], [1], [0, 0, 1, 1], [], []>} : vector<2x64xbf16>, vector<64x512xbf16>, vector<2x512xf32> -> vector<2x512xf32>
    %199 = arith.addf %191, %198 : vector<2x512xf32>
    %c1_141 = arith.constant 1 : index
    %c0_142 = arith.constant 0 : index
    %c0_143 = arith.constant 0 : index
    %200 = vector.load %arg18[%c1_141, %c0_142, %c0_143] : memref<4x64x512xbf16, #tpu.memory_space<vmem>>, vector<1x64x512xbf16>
    %201 = vector.shape_cast %200 : vector<1x64x512xbf16> to vector<64x512xbf16>
    %cst_144 = arith.constant dense<0.000000e+00> : vector<2x512xf32>
    %202 = tpu.matmul %193, %201, %cst_144 {dimension_numbers = #tpu.dot_dimension_numbers<[1], [0], [0], [1], [0, 0, 1, 1], [], []>} : vector<2x64xbf16>, vector<64x512xbf16>, vector<2x512xf32> -> vector<2x512xf32>
    %203 = arith.addf %199, %202 : vector<2x512xf32>
    %c2_145 = arith.constant 2 : index
    %c0_146 = arith.constant 0 : index
    %c0_147 = arith.constant 0 : index
    %204 = vector.load %arg18[%c2_145, %c0_146, %c0_147] : memref<4x64x512xbf16, #tpu.memory_space<vmem>>, vector<1x64x512xbf16>
    %205 = vector.shape_cast %204 : vector<1x64x512xbf16> to vector<64x512xbf16>
    %cst_148 = arith.constant dense<0.000000e+00> : vector<2x512xf32>
    %206 = tpu.matmul %194, %205, %cst_148 {dimension_numbers = #tpu.dot_dimension_numbers<[1], [0], [0], [1], [0, 0, 1, 1], [], []>} : vector<2x64xbf16>, vector<64x512xbf16>, vector<2x512xf32> -> vector<2x512xf32>
    %207 = arith.addf %203, %206 : vector<2x512xf32>
    %c3_149 = arith.constant 3 : index
    %c0_150 = arith.constant 0 : index
    %c0_151 = arith.constant 0 : index
    %208 = vector.load %arg18[%c3_149, %c0_150, %c0_151] : memref<4x64x512xbf16, #tpu.memory_space<vmem>>, vector<1x64x512xbf16>
    %209 = vector.shape_cast %208 : vector<1x64x512xbf16> to vector<64x512xbf16>
    %cst_152 = arith.constant dense<0.000000e+00> : vector<2x512xf32>
    %210 = tpu.matmul %195, %209, %cst_152 {dimension_numbers = #tpu.dot_dimension_numbers<[1], [0], [0], [1], [0, 0, 1, 1], [], []>} : vector<2x64xbf16>, vector<64x512xbf16>, vector<2x512xf32> -> vector<2x512xf32>
    %211 = arith.addf %207, %210 : vector<2x512xf32>
    %c0_153 = arith.constant 0 : index
    %c0_154 = arith.constant 0 : index
    %212 = vector.load %arg10[%c0_153, %c0_154] : memref<1x512xf32, #tpu.memory_space<vmem>>, vector<1x512xf32>
    %213 = vector.broadcast %212 : vector<1x512xf32> to vector<2x512xf32>
    %214 = arith.addf %211, %213 : vector<2x512xf32>
    %cst_155 = arith.constant 0.000000e+00 : f32
    %215 = vector.broadcast %cst_155 : f32 to vector<2x512xf32>
    %216 = arith.maximumf %214, %215 : vector<2x512xf32>
    %217 = arith.truncf %216 : vector<2x512xf32> to vector<2x512xbf16>
    %c1_i32_156 = arith.constant 1 : i32
    %218 = tpu.memref_slice %arg20[%c1_i32_156] : memref<2x!tpu.dma_semaphore, #tpu.memory_space<semaphore_mem>> -> memref<1x!tpu.dma_semaphore, #tpu.memory_space<semaphore_mem>>
    %219 = tpu.memref_squeeze %218 : memref<1x!tpu.dma_semaphore, #tpu.memory_space<semaphore_mem>> -> memref<!tpu.dma_semaphore, #tpu.memory_space<semaphore_mem>>
    tpu.wait_dma2 semaphore(%219 : memref<!tpu.dma_semaphore, #tpu.memory_space<semaphore_mem>>) src(%arg15 : memref<512x512xbf16, #tpu.memory_space<any>>) dst(%arg19 : memref<512x512xbf16, #tpu.memory_space<vmem>>)
    %c0_157 = arith.constant 0 : index
    %c0_158 = arith.constant 0 : index
    %220 = vector.load %arg19[%c0_157, %c0_158] : memref<512x512xbf16, #tpu.memory_space<vmem>>, vector<512x512xbf16>
    %cst_159 = arith.constant dense<0.000000e+00> : vector<2x512xf32>
    %221 = tpu.matmul %217, %220, %cst_159 {dimension_numbers = #tpu.dot_dimension_numbers<[1], [0], [0], [1], [0, 0, 1, 1], [], []>} : vector<2x512xbf16>, vector<512x512xbf16>, vector<2x512xf32> -> vector<2x512xf32>
    %c0_160 = arith.constant 0 : index
    %c0_161 = arith.constant 0 : index
    %222 = vector.load %arg11[%c0_160, %c0_161] : memref<1x512xf32, #tpu.memory_space<vmem>>, vector<1x512xf32>
    %223 = vector.broadcast %222 : vector<1x512xf32> to vector<2x512xf32>
    %224 = arith.addf %221, %223 : vector<2x512xf32>
    %cst_162 = arith.constant 0.000000e+00 : f32
    %225 = vector.broadcast %cst_162 : f32 to vector<2x512xf32>
    %226 = arith.maximumf %224, %225 : vector<2x512xf32>
    %c0_163 = arith.constant 0 : index
    %c0_164 = arith.constant 0 : index
    %227 = vector.load %arg12[%c0_163, %c0_164] : memref<1x512xf32, #tpu.memory_space<vmem>>, vector<1x512xf32>
    %228 = vector.broadcast %227 : vector<1x512xf32> to vector<2x512xf32>
    %229 = arith.mulf %226, %228 : vector<2x512xf32>
    %cst_165 = arith.constant dense<0.000000e+00> : vector<2xf32>
    %230 = vector.multi_reduction <add>, %229, %cst_165 [1] : vector<2x512xf32> to vector<2xf32>
    %231 = vector.shape_cast %230 : vector<2xf32> to vector<2x1xf32>
    %c0_166 = arith.constant 0 : index
    %c0_167 = arith.constant 0 : index
    %232 = vector.load %arg13[%c0_166, %c0_167] : memref<1x1xf32, #tpu.memory_space<vmem>>, vector<1x1xf32>
    %233 = vector.broadcast %232 : vector<1x1xf32> to vector<2x1xf32>
    %234 = arith.addf %231, %233 : vector<2x1xf32>
    %c0_168 = arith.constant 0 : index
    %c0_169 = arith.constant 0 : index
    %235 = vector.load %arg16[%c0_168, %c0_169] : memref<2x1xf32, #tpu.memory_space<vmem>>, vector<2x1xf32>
    tpu.vector_store %arg16[%c0_168, %c0_169], %234 {strides = array<i32>} : memref<2x1xf32, #tpu.memory_space<vmem>>, vector<2x1xf32>,
    return
  }
  func.func @transform_0(%arg0: i32) -> (i32, i32) {
    %c0_i32 = arith.constant 0 : i32
    %c0_i32_0 = arith.constant 0 : i32
    %c0_i32_1 = arith.constant 0 : i32
    return %c0_i32, %c0_i32_0 : i32, i32
  }
  func.func @transform_1(%arg0: i32) -> (i32, i32) {
    %c0_i32 = arith.constant 0 : i32
    %c0_i32_0 = arith.constant 0 : i32
    %c0_i32_1 = arith.constant 0 : i32
    return %c0_i32, %c0_i32_0 : i32, i32
  }
  func.func @transform_2(%arg0: i32) -> (i32, i32) {
    %c0_i32 = arith.constant 0 : i32
    %c0_i32_0 = arith.constant 0 : i32
    %c0_i32_1 = arith.constant 0 : i32
    return %c0_i32, %c0_i32_0 : i32, i32
  }
  func.func @transform_3(%arg0: i32) -> (i32, i32) {
    %c0_i32 = arith.constant 0 : i32
    %c0_i32_0 = arith.constant 0 : i32
    %c0_i32_1 = arith.constant 0 : i32
    return %c0_i32, %c0_i32_0 : i32, i32
  }
  func.func @transform_4(%arg0: i32) -> (i32, i32, i32) {
    %c0_i32 = arith.constant 0 : i32
    %c0_i32_0 = arith.constant 0 : i32
    %c0_i32_1 = arith.constant 0 : i32
    %c0_i32_2 = arith.constant 0 : i32
    return %c0_i32, %c0_i32_0, %c0_i32_1 : i32, i32, i32
  }
  func.func @transform_5(%arg0: i32) -> (i32, i32) {
    %c0_i32 = arith.constant 0 : i32
    %c0_i32_0 = arith.constant 0 : i32
    %c0_i32_1 = arith.constant 0 : i32
    return %c0_i32, %c0_i32_0 : i32, i32
  }
  func.func @transform_6(%arg0: i32) -> (i32, i32, i32) {
    %c0_i32 = arith.constant 0 : i32
    %c0_i32_0 = arith.constant 0 : i32
    %c0_i32_1 = arith.constant 0 : i32
    %c0_i32_2 = arith.constant 0 : i32
    return %c0_i32, %c0_i32_0, %c0_i32_1 : i32, i32, i32
  }
  func.func @transform_7(%arg0: i32) -> (i32, i32) {
    %c0_i32 = arith.constant 0 : i32
    %c0_i32_0 = arith.constant 0 : i32
    %c0_i32_1 = arith.constant 0 : i32
    return %c0_i32, %c0_i32_0 : i32, i32
  }
  func.func @transform_8(%arg0: i32) -> (i32, i32) {
    %c0_i32 = arith.constant 0 : i32
    %c0_i32_0 = arith.constant 0 : i32
    %c0_i32_1 = arith.constant 0 : i32
    return %c0_i32, %c0_i32_0 : i32, i32
  }
  func.func @transform_9(%arg0: i32) -> (i32, i32) {
    %c0_i32 = arith.constant 0 : i32
    %c0_i32_0 = arith.constant 0 : i32
    %c0_i32_1 = arith.constant 0 : i32
    return %c0_i32, %c0_i32_0 : i32, i32
  }
  func.func @transform_10(%arg0: i32) -> (i32, i32) {
    %c0_i32 = arith.constant 0 : i32
    %c0_i32_0 = arith.constant 0 : i32
    %c0_i32_1 = arith.constant 0 : i32
    return %c0_i32, %c0_i32_0 : i32, i32
  }
  func.func @transform_11(%arg0: i32) -> (i32, i32) {
    %c0_i32 = arith.constant 0 : i32
    %c0_i32_0 = arith.constant 0 : i32
    %c0_i32_1 = arith.constant 0 : i32
    return %c0_i32, %c0_i32_0 : i32, i32
  }
  func.func @transform_12(%arg0: i32) -> (i32, i32) {
    %c0_i32 = arith.constant 0 : i32
    %c0_i32_0 = arith.constant 0 : i32
    %c0_i32_1 = arith.constant 0 : i32
    return %c0_i32, %c0_i32_0 : i32, i32
  }
  func.func @transform_15(%arg0: i32) -> (i32, i32) {
    %c0_i32 = arith.constant 0 : i32
    %c0_i32_0 = arith.constant 0 : i32
    %c0_i32_1 = arith.constant 0 : i32
    return %c0_i32, %c0_i32_0 : i32, i32
  }
}

</mosaic_0001>

<bundles_post_ra>
// kernel: qnet_forward.1
= control target key start
LH: loop header
LB: loop body
LE: loop exit
PB: predicated region body
PF: predicated region fallthrough
CT: control target
= control target key end

     0   :  { %s9099_s0 = inlined_call_operand.vmem [shape: bf16[512,256], index: 0, kind: input, shape index: {}]   ;;  %s9100_s1 = inlined_call_operand.vmem [shape: bf16[2,12], index: 1, kind: input, shape index: {}]   ;;  %s9101_s2 = inlined_call_operand.vmem [shape: bf16[256,32], index: 2, kind: input, shape index: {}]   ;;  %s9102_s3 = inlined_call_operand.vmem [shape: f32[1,32], index: 3, kind: input, shape index: {}]   ;;  %s9103_s4 = inlined_call_operand.vmem [shape: bf16[16,32,64], index: 4, kind: input, shape index: {}]   ;;  %s9104_s5 = inlined_call_operand.vmem [shape: f32[1,64], index: 5, kind: input, shape index: {}]   ;;  %s9105_s6 = inlined_call_operand.vmem [shape: bf16[9,64,64], index: 6, kind: input, shape index: {}]   ;;  %s9106_s7 = inlined_call_operand.vmem [shape: f32[1,64], index: 7, kind: input, shape index: {}]   ;;  %s9107_s8 = inlined_call_operand.vmem [shape: bf16[12,512], index: 8, kind: input, shape index: {}]   ;;  %s9108_s9 = inlined_call_operand.vmem [shape: f32[1,512], index: 9, kind: input, shape index: {}]   ;;  %s9109_s10 = inlined_call_operand.vmem [shape: f32[1,512], index: 10, kind: input, shape index: {}]   ;;  %s9110_s11 = inlined_call_operand.vmem [shape: f32[1,512], index: 11, kind: input, shape index: {}]   ;;  %s9111_s12 = inlined_call_operand.<no memory space> [shape: f32[1,1], index: 12, kind: input, shape index: {}]   ;;  %s9112_s14 = inlined_call_operand.vmem [shape: bf16[512,512], index: 14, kind: input, shape index: {}]   ;;  %s9113_s15 = inlined_call_operand.vmem [shape: f32[2,1], index: 15, kind: output, shape index: {}]   ;;  %s9114_s13 = inlined_call_operand.vmem [shape: bf16[4,64,512], index: 13, kind: input, shape index: {}]  }
   0x1   :  { %v20_v0 = vstv %s9111_s12  ;;  %v66_v1 = vld [vmem:[%s9114_s13] sm:$0xf]  ;;  %v68_v2 = vld [vmem:[%s9114_s13 + $0x10] sm:$0xf]  ;;  %v70_v3 = vld [vmem:[%s9114_s13 + $0x4] sm:$0xf] }
   0x2   :  { %21 = vst [vmem:[#allocation6] sm:$0x1] %v20_v0  ;;  %67 = vst [vmem:[#allocation3] sm:$0xf] %v66_v1  ;;  %v72_v4 = vld [vmem:[%s9114_s13 + $0x14] sm:$0xf] }
   0x3   :  { %69 = vst [vmem:[#allocation3 + $0x4] sm:$0xf] %v68_v2  ;;  %71 = vst [vmem:[#allocation3 + $0x8] sm:$0xf] %v70_v3  ;;  %v74_v5 = vld [vmem:[%s9114_s13 + $0x8] sm:$0xf] }
   0x4   :  { %v76_v6 = vld [vmem:[%s9114_s13 + $0x18] sm:$0xf]  ;;  %73 = vst [vmem:[#allocation3 + $0xc] sm:$0xf] %v72_v4  ;;  %75 = vst [vmem:[#allocation3 + $0x10] sm:$0xf] %v74_v5 }
   0x5   :  { %77 = vst [vmem:[#allocation3 + $0x14] sm:$0xf] %v76_v6  ;;  %v78_v7 = vld [vmem:[%s9114_s13 + $0xc] sm:$0xf]  ;;  %v80_v8 = vld [vmem:[%s9114_s13 + $0x1c] sm:$0xff]  }
   0x6   :  { %v84_v9 = vld [vmem:[%s9114_s13 + $0x30] sm:$0xf]  ;;  %79 = vst [vmem:[#allocation3 + $0x18] sm:$0xf] %v78_v7  ;;  %81 = vst [vmem:[#allocation3 + $0x1c] sm:$0xff] %v80_v8   ;;  %v96_v15 = vld [vmem:[%s9114_s13 + $0x3c] sm:$0xff]  }
   0x7   :  { %85 = vst [vmem:[#allocation3 + $0x24] sm:$0xf] %v84_v9  ;;  %v86_v10 = vld [vmem:[%s9114_s13 + $0x24] sm:$0xf]  ;;  %v88_v11 = vld [vmem:[%s9114_s13 + $0x34] sm:$0xf] }
   0x8   :  { %v90_v12 = vld [vmem:[%s9114_s13 + $0x28] sm:$0xf]  ;;  %87 = vst [vmem:[#allocation3 + $0x28] sm:$0xf] %v86_v10  ;;  %89 = vst [vmem:[#allocation3 + $0x2c] sm:$0xf] %v88_v11 }
   0x9   :  { %91 = vst [vmem:[#allocation3 + $0x30] sm:$0xf] %v90_v12  ;;  %v92_v13 = vld [vmem:[%s9114_s13 + $0x38] sm:$0xf]  ;;  %v94_v14 = vld [vmem:[%s9114_s13 + $0x2c] sm:$0xf] }
   0xa   :  { %93 = vst [vmem:[#allocation3 + $0x34] sm:$0xf] %v92_v13  ;;  %95 = vst [vmem:[#allocation3 + $0x38] sm:$0xf] %v94_v14  ;;  %v100_v16 = vld [vmem:[%s9114_s13 + $0x50] sm:$0xf] }
   0xb   :  { %97 = vst [vmem:[#allocation3 + $0x3c] sm:$0xff] %v96_v15   ;;  %v102_v17 = vld [vmem:[%s9114_s13 + $0x44] sm:$0xf]  ;;  %v104_v18 = vld [vmem:[%s9114_s13 + $0x54] sm:$0xf]  ;;  %v112_v22 = vld [vmem:[%s9114_s13 + $0x5c] sm:$0xff]  }
   0xc   :  { %101 = vst [vmem:[#allocation3 + $0x44] sm:$0xf] %v100_v16  ;;  %103 = vst [vmem:[#allocation3 + $0x48] sm:$0xf] %v102_v17  ;;  %v106_v19 = vld [vmem:[%s9114_s13 + $0x48] sm:$0xf] }
   0xd   :  { %105 = vst [vmem:[#allocation3 + $0x4c] sm:$0xf] %v104_v18  ;;  %v108_v20 = vld [vmem:[%s9114_s13 + $0x58] sm:$0xf]  ;;  %v110_v21 = vld [vmem:[%s9114_s13 + $0x4c] sm:$0xf] }
   0xe   :  { %107 = vst [vmem:[#allocation3 + $0x50] sm:$0xf] %v106_v19  ;;  %109 = vst [vmem:[#allocation3 + $0x54] sm:$0xf] %v108_v20  ;;  %v116_v23 = vld [vmem:[%s9114_s13 + $0x70] sm:$0xf] }
   0xf   :  { %111 = vst [vmem:[#allocation3 + $0x58] sm:$0xf] %v110_v21  ;;  %v118_v24 = vld [vmem:[%s9114_s13 + $0x64] sm:$0xf]  ;;  %113 = vst [vmem:[#allocation3 + $0x5c] sm:$0xff] %v112_v22   ;;  %v128_v29 = vld [vmem:[%s9114_s13 + $0x7c] sm:$0xff]  }
  0x10   :  { %117 = vst [vmem:[#allocation3 + $0x64] sm:$0xf] %v116_v23  ;;  %119 = vst [vmem:[#allocation3 + $0x68] sm:$0xf] %v118_v24  ;;  %v120_v25 = vld [vmem:[%s9114_s13 + $0x74] sm:$0xf] }
  0x11   :  { %v122_v26 = vld [vmem:[%s9114_s13 + $0x68] sm:$0xf]  ;;  %v124_v27 = vld [vmem:[%s9114_s13 + $0x78] sm:$0xf]  ;;  %121 = vst [vmem:[#allocation3 + $0x6c] sm:$0xf] %v120_v25 }
  0x12   :  { %123 = vst [vmem:[#allocation3 + $0x70] sm:$0xf] %v122_v26  ;;  %125 = vst [vmem:[#allocation3 + $0x74] sm:$0xf] %v124_v27  ;;  %v126_v28 = vld [vmem:[%s9114_s13 + $0x6c] sm:$0xf] }
  0x13   :  { %v132_v30 = vld [vmem:[%s9114_s13 + $0x90] sm:$0xf]  ;;  %127 = vst [vmem:[#allocation3 + $0x78] sm:$0xf] %v126_v28  ;;  %129 = vst [vmem:[#allocation3 + $0x7c] sm:$0xff] %v128_v29   ;;  %v144_v36 = vld [vmem:[%s9114_s13 + $0x9c] sm:$0xff]  }
  0x14   :  { %133 = vst [vmem:[#allocation3 + $0x84] sm:$0xf] %v132_v30  ;;  %v134_v31 = vld [vmem:[%s9114_s13 + $0x84] sm:$0xf]  ;;  %v136_v32 = vld [vmem:[%s9114_s13 + $0x94] sm:$0xf] }
  0x15   :  { %v138_v33 = vld [vmem:[%s9114_s13 + $0x88] sm:$0xf]  ;;  %135 = vst [vmem:[#allocation3 + $0x88] sm:$0xf] %v134_v31  ;;  %137 = vst [vmem:[#allocation3 + $0x8c] sm:$0xf] %v136_v32 }
  0x16   :  { %139 = vst [vmem:[#allocation3 + $0x90] sm:$0xf] %v138_v33  ;;  %v140_v34 = vld [vmem:[%s9114_s13 + $0x98] sm:$0xf]  ;;  %v142_v35 = vld [vmem:[%s9114_s13 + $0x8c] sm:$0xf] }
  0x17   :  { %141 = vst [vmem:[#allocation3 + $0x94] sm:$0xf] %v140_v34  ;;  %143 = vst [vmem:[#allocation3 + $0x98] sm:$0xf] %v142_v35  ;;  %v148_v37 = vld [vmem:[%s9114_s13 + $0xb0] sm:$0xf] }
  0x18   :  { %145 = vst [vmem:[#allocation3 + $0x9c] sm:$0xff] %v144_v36   ;;  %v150_v38 = vld [vmem:[%s9114_s13 + $0xa4] sm:$0xf]  ;;  %v152_v39 = vld [vmem:[%s9114_s13 + $0xb4] sm:$0xf]  ;;  %v160_v43 = vld [vmem:[%s9114_s13 + $0xbc] sm:$0xff]  }
  0x19   :  { %149 = vst [vmem:[#allocation3 + $0xa4] sm:$0xf] %v148_v37  ;;  %151 = vst [vmem:[#allocation3 + $0xa8] sm:$0xf] %v150_v38  ;;  %v154_v40 = vld [vmem:[%s9114_s13 + $0xa8] sm:$0xf] }
  0x1a   :  { %153 = vst [vmem:[#allocation3 + $0xac] sm:$0xf] %v152_v39  ;;  %v156_v41 = vld [vmem:[%s9114_s13 + $0xb8] sm:$0xf]  ;;  %v158_v42 = vld [vmem:[%s9114_s13 + $0xac] sm:$0xf] }
  0x1b   :  { %155 = vst [vmem:[#allocation3 + $0xb0] sm:$0xf] %v154_v40  ;;  %157 = vst [vmem:[#allocation3 + $0xb4] sm:$0xf] %v156_v41  ;;  %v164_v44 = vld [vmem:[%s9114_s13 + $0xd0] sm:$0xf] }
  0x1c   :  { %159 = vst [vmem:[#allocation3 + $0xb8] sm:$0xf] %v158_v42  ;;  %v166_v45 = vld [vmem:[%s9114_s13 + $0xc4] sm:$0xf]  ;;  %161 = vst [vmem:[#allocation3 + $0xbc] sm:$0xff] %v160_v43   ;;  %v176_v50 = vld [vmem:[%s9114_s13 + $0xdc] sm:$0xff]  }
  0x1d   :  { %165 = vst [vmem:[#allocation3 + $0xc4] sm:$0xf] %v164_v44  ;;  %167 = vst [vmem:[#allocation3 + $0xc8] sm:$0xf] %v166_v45  ;;  %v168_v46 = vld [vmem:[%s9114_s13 + $0xd4] sm:$0xf] }
  0x1e   :  { %v170_v47 = vld [vmem:[%s9114_s13 + $0xc8] sm:$0xf]  ;;  %v172_v48 = vld [vmem:[%s9114_s13 + $0xd8] sm:$0xf]  ;;  %169 = vst [vmem:[#allocation3 + $0xcc] sm:$0xf] %v168_v46 }
  0x1f   :  { %171 = vst [vmem:[#allocation3 + $0xd0] sm:$0xf] %v170_v47  ;;  %173 = vst [vmem:[#allocation3 + $0xd4] sm:$0xf] %v172_v48  ;;  %v174_v49 = vld [vmem:[%s9114_s13 + $0xcc] sm:$0xf] }
  0x20   :  { %v180_v51 = vld [vmem:[%s9114_s13 + $0xf0] sm:$0xf]  ;;  %175 = vst [vmem:[#allocation3 + $0xd8] sm:$0xf] %v174_v49  ;;  %177 = vst [vmem:[#allocation3 + $0xdc] sm:$0xff] %v176_v50   ;;  %v192_v57 = vld [vmem:[%s9114_s13 + $0xfc] sm:$0xff]  }
  0x21   :  { %181 = vst [vmem:[#allocation3 + $0xe4] sm:$0xf] %v180_v51  ;;  %v182_v52 = vld [vmem:[%s9114_s13 + $0xe4] sm:$0xf]  ;;  %v184_v53 = vld [vmem:[%s9114_s13 + $0xf4] sm:$0xf] }
  0x22   :  { %v186_v54 = vld [vmem:[%s9114_s13 + $0xe8] sm:$0xf]  ;;  %183 = vst [vmem:[#allocation3 + $0xe8] sm:$0xf] %v182_v52  ;;  %185 = vst [vmem:[#allocation3 + $0xec] sm:$0xf] %v184_v53 }
  0x23   :  { %187 = vst [vmem:[#allocation3 + $0xf0] sm:$0xf] %v186_v54  ;;  %v188_v55 = vld [vmem:[%s9114_s13 + $0xf8] sm:$0xf]  ;;  %v190_v56 = vld [vmem:[%s9114_s13 + $0xec] sm:$0xf] }
  0x24   :  { %189 = vst [vmem:[#allocation3 + $0xf4] sm:$0xf] %v188_v55  ;;  %191 = vst [vmem:[#allocation3 + $0xf8] sm:$0xf] %v190_v56  ;;  %v196_v58 = vld [vmem:[%s9114_s13 + $0x110] sm:$0xf] }
  0x25   :  { %193 = vst [vmem:[#allocation3 + $0xfc] sm:$0xff] %v192_v57   ;;  %v198_v59 = vld [vmem:[%s9114_s13 + $0x104] sm:$0xf]  ;;  %v200_v60 = vld [vmem:[%s9114_s13 + $0x114] sm:$0xf]  ;;  %v208_v0 = vld [vmem:[%s9114_s13 + $0x11c] sm:$0xff]  }
  0x26   :  { %197 = vst [vmem:[#allocation3 + $0x104] sm:$0xf] %v196_v58  ;;  %199 = vst [vmem:[#allocation3 + $0x108] sm:$0xf] %v198_v59  ;;  %v202_v61 = vld [vmem:[%s9114_s13 + $0x108] sm:$0xf] }
  0x27   :  { %201 = vst [vmem:[#allocation3 + $0x10c] sm:$0xf] %v200_v60  ;;  %v204_v62 = vld [vmem:[%s9114_s13 + $0x118] sm:$0xf]  ;;  %v206_v63 = vld [vmem:[%s9114_s13 + $0x10c] sm:$0xf] }
  0x28   :  { %203 = vst [vmem:[#allocation3 + $0x110] sm:$0xf] %v202_v61  ;;  %205 = vst [vmem:[#allocation3 + $0x114] sm:$0xf] %v204_v62  ;;  %v212_v1 = vld [vmem:[%s9114_s13 + $0x130] sm:$0xf] }
  0x29   :  { %207 = vst [vmem:[#allocation3 + $0x118] sm:$0xf] %v206_v63  ;;  %v214_v2 = vld [vmem:[%s9114_s13 + $0x124] sm:$0xf]  ;;  %209 = vst [vmem:[#allocation3 + $0x11c] sm:$0xff] %v208_v0   ;;  %v224_v7 = vld [vmem:[%s9114_s13 + $0x13c] sm:$0xff]  }
  0x2a   :  { %213 = vst [vmem:[#allocation3 + $0x124] sm:$0xf] %v212_v1  ;;  %215 = vst [vmem:[#allocation3 + $0x128] sm:$0xf] %v214_v2  ;;  %v216_v3 = vld [vmem:[%s9114_s13 + $0x134] sm:$0xf] }
  0x2b   :  { %v218_v4 = vld [vmem:[%s9114_s13 + $0x128] sm:$0xf]  ;;  %v220_v5 = vld [vmem:[%s9114_s13 + $0x138] sm:$0xf]  ;;  %217 = vst [vmem:[#allocation3 + $0x12c] sm:$0xf] %v216_v3 }
  0x2c   :  { %219 = vst [vmem:[#allocation3 + $0x130] sm:$0xf] %v218_v4  ;;  %221 = vst [vmem:[#allocation3 + $0x134] sm:$0xf] %v220_v5  ;;  %v222_v6 = vld [vmem:[%s9114_s13 + $0x12c] sm:$0xf] }
  0x2d   :  { %v228_v8 = vld [vmem:[%s9114_s13 + $0x150] sm:$0xf]  ;;  %223 = vst [vmem:[#allocation3 + $0x138] sm:$0xf] %v222_v6  ;;  %225 = vst [vmem:[#allocation3 + $0x13c] sm:$0xff] %v224_v7   ;;  %v240_v14 = vld [vmem:[%s9114_s13 + $0x15c] sm:$0xff]  }
  0x2e   :  { %229 = vst [vmem:[#allocation3 + $0x144] sm:$0xf] %v228_v8  ;;  %v230_v9 = vld [vmem:[%s9114_s13 + $0x144] sm:$0xf]  ;;  %v232_v10 = vld [vmem:[%s9114_s13 + $0x154] sm:$0xf] }
  0x2f   :  { %v234_v11 = vld [vmem:[%s9114_s13 + $0x148] sm:$0xf]  ;;  %231 = vst [vmem:[#allocation3 + $0x148] sm:$0xf] %v230_v9  ;;  %233 = vst [vmem:[#allocation3 + $0x14c] sm:$0xf] %v232_v10 }
  0x30   :  { %235 = vst [vmem:[#allocation3 + $0x150] sm:$0xf] %v234_v11  ;;  %v236_v12 = vld [vmem:[%s9114_s13 + $0x158] sm:$0xf]  ;;  %v238_v13 = vld [vmem:[%s9114_s13 + $0x14c] sm:$0xf] }
  0x31   :  { %237 = vst [vmem:[#allocation3 + $0x154] sm:$0xf] %v236_v12  ;;  %239 = vst [vmem:[#allocation3 + $0x158] sm:$0xf] %v238_v13  ;;  %v244_v15 = vld [vmem:[%s9114_s13 + $0x170] sm:$0xf] }
  0x32   :  { %241 = vst [vmem:[#allocation3 + $0x15c] sm:$0xff] %v240_v14   ;;  %v246_v16 = vld [vmem:[%s9114_s13 + $0x164] sm:$0xf]  ;;  %v248_v17 = vld [vmem:[%s9114_s13 + $0x174] sm:$0xf]  ;;  %v256_v21 = vld [vmem:[%s9114_s13 + $0x17c] sm:$0xff]  }
  0x33   :  { %245 = vst [vmem:[#allocation3 + $0x164] sm:$0xf] %v244_v15  ;;  %247 = vst [vmem:[#allocation3 + $0x168] sm:$0xf] %v246_v16  ;;  %v250_v18 = vld [vmem:[%s9114_s13 + $0x168] sm:$0xf] }
  0x34   :  { %249 = vst [vmem:[#allocation3 + $0x16c] sm:$0xf] %v248_v17  ;;  %v252_v19 = vld [vmem:[%s9114_s13 + $0x178] sm:$0xf]  ;;  %v254_v20 = vld [vmem:[%s9114_s13 + $0x16c] sm:$0xf] }
  0x35   :  { %251 = vst [vmem:[#allocation3 + $0x170] sm:$0xf] %v250_v18  ;;  %253 = vst [vmem:[#allocation3 + $0x174] sm:$0xf] %v252_v19  ;;  %v260_v22 = vld [vmem:[%s9114_s13 + $0x190] sm:$0xf] }
  0x36   :  { %255 = vst [vmem:[#allocation3 + $0x178] sm:$0xf] %v254_v20  ;;  %v262_v23 = vld [vmem:[%s9114_s13 + $0x184] sm:$0xf]  ;;  %257 = vst [vmem:[#allocation3 + $0x17c] sm:$0xff] %v256_v21   ;;  %v272_v28 = vld [vmem:[%s9114_s13 + $0x19c] sm:$0xff]  }
  0x37   :  { %261 = vst [vmem:[#allocation3 + $0x184] sm:$0xf] %v260_v22  ;;  %263 = vst [vmem:[#allocation3 + $0x188] sm:$0xf] %v262_v23  ;;  %v264_v24 = vld [vmem:[%s9114_s13 + $0x194] sm:$0xf] }
  0x38   :  { %v266_v25 = vld [vmem:[%s9114_s13 + $0x188] sm:$0xf]  ;;  %v268_v26 = vld [vmem:[%s9114_s13 + $0x198] sm:$0xf]  ;;  %265 = vst [vmem:[#allocation3 + $0x18c] sm:$0xf] %v264_v24 }
  0x39   :  { %267 = vst [vmem:[#allocation3 + $0x190] sm:$0xf] %v266_v25  ;;  %269 = vst [vmem:[#allocation3 + $0x194] sm:$0xf] %v268_v26  ;;  %v270_v27 = vld [vmem:[%s9114_s13 + $0x18c] sm:$0xf] }
  0x3a   :  { %v276_v29 = vld [vmem:[%s9114_s13 + $0x1b0] sm:$0xf]  ;;  %271 = vst [vmem:[#allocation3 + $0x198] sm:$0xf] %v270_v27  ;;  %273 = vst [vmem:[#allocation3 + $0x19c] sm:$0xff] %v272_v28   ;;  %v288_v35 = vld [vmem:[%s9114_s13 + $0x1bc] sm:$0xff]  }
  0x3b   :  { %277 = vst [vmem:[#allocation3 + $0x1a4] sm:$0xf] %v276_v29  ;;  %v278_v30 = vld [vmem:[%s9114_s13 + $0x1a4] sm:$0xf]  ;;  %v280_v31 = vld [vmem:[%s9114_s13 + $0x1b4] sm:$0xf] }
  0x3c   :  { %v282_v32 = vld [vmem:[%s9114_s13 + $0x1a8] sm:$0xf]  ;;  %279 = vst [vmem:[#allocation3 + $0x1a8] sm:$0xf] %v278_v30  ;;  %281 = vst [vmem:[#allocation3 + $0x1ac] sm:$0xf] %v280_v31 }
  0x3d   :  { %283 = vst [vmem:[#allocation3 + $0x1b0] sm:$0xf] %v282_v32  ;;  %v284_v33 = vld [vmem:[%s9114_s13 + $0x1b8] sm:$0xf]  ;;  %v286_v34 = vld [vmem:[%s9114_s13 + $0x1ac] sm:$0xf] }
  0x3e   :  { %285 = vst [vmem:[#allocation3 + $0x1b4] sm:$0xf] %v284_v33  ;;  %287 = vst [vmem:[#allocation3 + $0x1b8] sm:$0xf] %v286_v34  ;;  %v292_v36 = vld [vmem:[%s9114_s13 + $0x1d0] sm:$0xf] }
  0x3f   :  { %289 = vst [vmem:[#allocation3 + $0x1bc] sm:$0xff] %v288_v35   ;;  %v294_v37 = vld [vmem:[%s9114_s13 + $0x1c4] sm:$0xf]  ;;  %v296_v38 = vld [vmem:[%s9114_s13 + $0x1d4] sm:$0xf]  ;;  %v304_v42 = vld [vmem:[%s9114_s13 + $0x1dc] sm:$0xff]  }
  0x40   :  { %293 = vst [vmem:[#allocation3 + $0x1c4] sm:$0xf] %v292_v36  ;;  %295 = vst [vmem:[#allocation3 + $0x1c8] sm:$0xf] %v294_v37  ;;  %v298_v39 = vld [vmem:[%s9114_s13 + $0x1c8] sm:$0xf] }
  0x41   :  { %297 = vst [vmem:[#allocation3 + $0x1cc] sm:$0xf] %v296_v38  ;;  %v300_v40 = vld [vmem:[%s9114_s13 + $0x1d8] sm:$0xf]  ;;  %v302_v41 = vld [vmem:[%s9114_s13 + $0x1cc] sm:$0xf] }
  0x42   :  { %299 = vst [vmem:[#allocation3 + $0x1d0] sm:$0xf] %v298_v39  ;;  %301 = vst [vmem:[#allocation3 + $0x1d4] sm:$0xf] %v300_v40  ;;  %v308_v43 = vld [vmem:[%s9114_s13 + $0x1f0] sm:$0xf] }
  0x43   :  { %303 = vst [vmem:[#allocation3 + $0x1d8] sm:$0xf] %v302_v41  ;;  %v310_v44 = vld [vmem:[%s9114_s13 + $0x1e4] sm:$0xf]  ;;  %305 = vst [vmem:[#allocation3 + $0x1dc] sm:$0xff] %v304_v42  }
  0x44   :  { %309 = vst [vmem:[#allocation3 + $0x1e4] sm:$0xf] %v308_v43  ;;  %311 = vst [vmem:[#allocation3 + $0x1e8] sm:$0xf] %v310_v44  ;;  %v312_v45 = vld [vmem:[%s9114_s13 + $0x1f4] sm:$0xf] }
  0x45   :  { %v314_v46 = vld [vmem:[%s9114_s13 + $0x1e8] sm:$0xf]  ;;  %v316_v47 = vld [vmem:[%s9114_s13 + $0x1f8] sm:$0xf]  ;;  %313 = vst [vmem:[#allocation3 + $0x1ec] sm:$0xf] %v312_v45 }
  0x46   :  { %315 = vst [vmem:[#allocation3 + $0x1f0] sm:$0xf] %v314_v46  ;;  %317 = vst [vmem:[#allocation3 + $0x1f4] sm:$0xf] %v316_v47  ;;  %v318_v48 = vld [vmem:[%s9114_s13 + $0x1ec] sm:$0xf] }
  0x47   :  { %v320_v49 = vld [vmem:[%s9114_s13 + $0x1fc] sm:$0xf]  ;;  %319 = vst [vmem:[#allocation3 + $0x1f8] sm:$0xf] %v318_v48 }
  0x48   :  { %321 = vst [vmem:[#allocation3 + $0x1fc] sm:$0xf] %v320_v49 }
  0x49   :  { %608 = vsyncadd [#allocation5], 8192  ;;  %v627_v50 = vld [vmem:[%s9112_s14] sm:$0xf]  ;;  %v629_v51 = vld [vmem:[%s9112_s14 + $0x10] sm:$0xf] }
  0x4a   :  { %628 = vst [vmem:[#allocation4] sm:$0xf] %v627_v50  ;;  %630 = vst [vmem:[#allocation4 + $0x4] sm:$0xf] %v629_v51  ;;  %v631_v52 = vld [vmem:[%s9112_s14 + $0x4] sm:$0xf] }
  0x4b   :  { %v633_v53 = vld [vmem:[%s9112_s14 + $0x14] sm:$0xf]  ;;  %v635_v54 = vld [vmem:[%s9112_s14 + $0x8] sm:$0xf]  ;;  %632 = vst [vmem:[#allocation4 + $0x8] sm:$0xf] %v631_v52 }
  0x4c   :  { %634 = vst [vmem:[#allocation4 + $0xc] sm:$0xf] %v633_v53  ;;  %636 = vst [vmem:[#allocation4 + $0x10] sm:$0xf] %v635_v54  ;;  %v637_v55 = vld [vmem:[%s9112_s14 + $0x18] sm:$0xf] }
  0x4d   :  { %v639_v56 = vld [vmem:[%s9112_s14 + $0xc] sm:$0xf]  ;;  %v641_v57 = vld [vmem:[%s9112_s14 + $0x1c] sm:$0xff]   ;;  %638 = vst [vmem:[#allocation4 + $0x14] sm:$0xf] %v637_v55 }
  0x4e   :  { %640 = vst [vmem:[#allocation4 + $0x18] sm:$0xf] %v639_v56  ;;  %642 = vst [vmem:[#allocation4 + $0x1c] sm:$0xff] %v641_v57   ;;  %v645_v58 = vld [vmem:[%s9112_s14 + $0x30] sm:$0xf]  ;;  %v657_v0 = vld [vmem:[%s9112_s14 + $0x3c] sm:$0xff]  }
  0x4f   :  { %v647_v59 = vld [vmem:[%s9112_s14 + $0x24] sm:$0xf]  ;;  %v649_v60 = vld [vmem:[%s9112_s14 + $0x34] sm:$0xf]  ;;  %646 = vst [vmem:[#allocation4 + $0x24] sm:$0xf] %v645_v58 }
  0x50   :  { %648 = vst [vmem:[#allocation4 + $0x28] sm:$0xf] %v647_v59  ;;  %650 = vst [vmem:[#allocation4 + $0x2c] sm:$0xf] %v649_v60  ;;  %v651_v61 = vld [vmem:[%s9112_s14 + $0x28] sm:$0xf] }
  0x51   :  { %v653_v62 = vld [vmem:[%s9112_s14 + $0x38] sm:$0xf]  ;;  %v655_v63 = vld [vmem:[%s9112_s14 + $0x2c] sm:$0xf]  ;;  %652 = vst [vmem:[#allocation4 + $0x30] sm:$0xf] %v651_v61 }
  0x52   :  { %654 = vst [vmem:[#allocation4 + $0x34] sm:$0xf] %v653_v62  ;;  %656 = vst [vmem:[#allocation4 + $0x38] sm:$0xf] %v655_v63  ;;  %v661_v1 = vld [vmem:[%s9112_s14 + $0x50] sm:$0xf] }
  0x53   :  { %v663_v2 = vld [vmem:[%s9112_s14 + $0x44] sm:$0xf]  ;;  %658 = vst [vmem:[#allocation4 + $0x3c] sm:$0xff] %v657_v0   ;;  %662 = vst [vmem:[#allocation4 + $0x44] sm:$0xf] %v661_v1  ;;  %v673_v7 = vld [vmem:[%s9112_s14 + $0x5c] sm:$0xff]  }
  0x54   :  { %664 = vst [vmem:[#allocation4 + $0x48] sm:$0xf] %v663_v2  ;;  %v665_v3 = vld [vmem:[%s9112_s14 + $0x54] sm:$0xf]  ;;  %v667_v4 = vld [vmem:[%s9112_s14 + $0x48] sm:$0xf] }
  0x55   :  { %v669_v5 = vld [vmem:[%s9112_s14 + $0x58] sm:$0xf]  ;;  %666 = vst [vmem:[#allocation4 + $0x4c] sm:$0xf] %v665_v3  ;;  %668 = vst [vmem:[#allocation4 + $0x50] sm:$0xf] %v667_v4 }
  0x56   :  { %670 = vst [vmem:[#allocation4 + $0x54] sm:$0xf] %v669_v5  ;;  %v671_v6 = vld [vmem:[%s9112_s14 + $0x4c] sm:$0xf]  ;;  %v677_v8 = vld [vmem:[%s9112_s14 + $0x70] sm:$0xf] }
  0x57   :  { %672 = vst [vmem:[#allocation4 + $0x58] sm:$0xf] %v671_v6  ;;  %674 = vst [vmem:[#allocation4 + $0x5c] sm:$0xff] %v673_v7   ;;  %v679_v9 = vld [vmem:[%s9112_s14 + $0x64] sm:$0xf]  ;;  %v689_v14 = vld [vmem:[%s9112_s14 + $0x7c] sm:$0xff]  }
  0x58   :  { %678 = vst [vmem:[#allocation4 + $0x64] sm:$0xf] %v677_v8  ;;  %v681_v10 = vld [vmem:[%s9112_s14 + $0x74] sm:$0xf]  ;;  %v683_v11 = vld [vmem:[%s9112_s14 + $0x68] sm:$0xf] }
  0x59   :  { %680 = vst [vmem:[#allocation4 + $0x68] sm:$0xf] %v679_v9  ;;  %682 = vst [vmem:[#allocation4 + $0x6c] sm:$0xf] %v681_v10  ;;  %v685_v12 = vld [vmem:[%s9112_s14 + $0x78] sm:$0xf] }
  0x5a   :  { %684 = vst [vmem:[#allocation4 + $0x70] sm:$0xf] %v683_v11  ;;  %v687_v13 = vld [vmem:[%s9112_s14 + $0x6c] sm:$0xf]  ;;  %686 = vst [vmem:[#allocation4 + $0x74] sm:$0xf] %v685_v12 }
  0x5b   :  { %688 = vst [vmem:[#allocation4 + $0x78] sm:$0xf] %v687_v13  ;;  %690 = vst [vmem:[#allocation4 + $0x7c] sm:$0xff] %v689_v14   ;;  %v693_v15 = vld [vmem:[%s9112_s14 + $0x90] sm:$0xf]  ;;  %v705_v21 = vld [vmem:[%s9112_s14 + $0x9c] sm:$0xff]  }
  0x5c   :  { %v695_v16 = vld [vmem:[%s9112_s14 + $0x84] sm:$0xf]  ;;  %v697_v17 = vld [vmem:[%s9112_s14 + $0x94] sm:$0xf]  ;;  %694 = vst [vmem:[#allocation4 + $0x84] sm:$0xf] %v693_v15 }
  0x5d   :  { %696 = vst [vmem:[#allocation4 + $0x88] sm:$0xf] %v695_v16  ;;  %698 = vst [vmem:[#allocation4 + $0x8c] sm:$0xf] %v697_v17  ;;  %v699_v18 = vld [vmem:[%s9112_s14 + $0x88] sm:$0xf] }
  0x5e   :  { %v701_v19 = vld [vmem:[%s9112_s14 + $0x98] sm:$0xf]  ;;  %v703_v20 = vld [vmem:[%s9112_s14 + $0x8c] sm:$0xf]  ;;  %700 = vst [vmem:[#allocation4 + $0x90] sm:$0xf] %v699_v18 }
  0x5f   :  { %702 = vst [vmem:[#allocation4 + $0x94] sm:$0xf] %v701_v19  ;;  %704 = vst [vmem:[#allocation4 + $0x98] sm:$0xf] %v703_v20  ;;  %v709_v22 = vld [vmem:[%s9112_s14 + $0xb0] sm:$0xf] }
  0x60   :  { %v711_v23 = vld [vmem:[%s9112_s14 + $0xa4] sm:$0xf]  ;;  %706 = vst [vmem:[#allocation4 + $0x9c] sm:$0xff] %v705_v21   ;;  %710 = vst [vmem:[#allocation4 + $0xa4] sm:$0xf] %v709_v22  ;;  %v721_v28 = vld [vmem:[%s9112_s14 + $0xbc] sm:$0xff]  }
  0x61   :  { %712 = vst [vmem:[#allocation4 + $0xa8] sm:$0xf] %v711_v23  ;;  %v713_v24 = vld [vmem:[%s9112_s14 + $0xb4] sm:$0xf]  ;;  %v715_v25 = vld [vmem:[%s9112_s14 + $0xa8] sm:$0xf] }
  0x62   :  { %v717_v26 = vld [vmem:[%s9112_s14 + $0xb8] sm:$0xf]  ;;  %714 = vst [vmem:[#allocation4 + $0xac] sm:$0xf] %v713_v24  ;;  %716 = vst [vmem:[#allocation4 + $0xb0] sm:$0xf] %v715_v25 }
  0x63   :  { %718 = vst [vmem:[#allocation4 + $0xb4] sm:$0xf] %v717_v26  ;;  %v719_v27 = vld [vmem:[%s9112_s14 + $0xac] sm:$0xf]  ;;  %v725_v29 = vld [vmem:[%s9112_s14 + $0xd0] sm:$0xf] }
  0x64   :  { %720 = vst [vmem:[#allocation4 + $0xb8] sm:$0xf] %v719_v27  ;;  %722 = vst [vmem:[#allocation4 + $0xbc] sm:$0xff] %v721_v28   ;;  %v727_v30 = vld [vmem:[%s9112_s14 + $0xc4] sm:$0xf]  ;;  %v737_v35 = vld [vmem:[%s9112_s14 + $0xdc] sm:$0xff]  }
  0x65   :  { %726 = vst [vmem:[#allocation4 + $0xc4] sm:$0xf] %v725_v29  ;;  %v729_v31 = vld [vmem:[%s9112_s14 + $0xd4] sm:$0xf]  ;;  %v731_v32 = vld [vmem:[%s9112_s14 + $0xc8] sm:$0xf] }
  0x66   :  { %728 = vst [vmem:[#allocation4 + $0xc8] sm:$0xf] %v727_v30  ;;  %730 = vst [vmem:[#allocation4 + $0xcc] sm:$0xf] %v729_v31  ;;  %v733_v33 = vld [vmem:[%s9112_s14 + $0xd8] sm:$0xf] }
  0x67   :  { %732 = vst [vmem:[#allocation4 + $0xd0] sm:$0xf] %v731_v32  ;;  %v735_v34 = vld [vmem:[%s9112_s14 + $0xcc] sm:$0xf]  ;;  %734 = vst [vmem:[#allocation4 + $0xd4] sm:$0xf] %v733_v33 }
  0x68   :  { %736 = vst [vmem:[#allocation4 + $0xd8] sm:$0xf] %v735_v34  ;;  %738 = vst [vmem:[#allocation4 + $0xdc] sm:$0xff] %v737_v35   ;;  %v741_v36 = vld [vmem:[%s9112_s14 + $0xf0] sm:$0xf]  ;;  %v753_v42 = vld [vmem:[%s9112_s14 + $0xfc] sm:$0xff]  }
  0x69   :  { %v743_v37 = vld [vmem:[%s9112_s14 + $0xe4] sm:$0xf]  ;;  %v745_v38 = vld [vmem:[%s9112_s14 + $0xf4] sm:$0xf]  ;;  %742 = vst [vmem:[#allocation4 + $0xe4] sm:$0xf] %v741_v36 }
  0x6a   :  { %744 = vst [vmem:[#allocation4 + $0xe8] sm:$0xf] %v743_v37  ;;  %746 = vst [vmem:[#allocation4 + $0xec] sm:$0xf] %v745_v38  ;;  %v747_v39 = vld [vmem:[%s9112_s14 + $0xe8] sm:$0xf] }
  0x6b   :  { %v749_v40 = vld [vmem:[%s9112_s14 + $0xf8] sm:$0xf]  ;;  %v751_v41 = vld [vmem:[%s9112_s14 + $0xec] sm:$0xf]  ;;  %748 = vst [vmem:[#allocation4 + $0xf0] sm:$0xf] %v747_v39 }
  0x6c   :  { %750 = vst [vmem:[#allocation4 + $0xf4] sm:$0xf] %v749_v40  ;;  %752 = vst [vmem:[#allocation4 + $0xf8] sm:$0xf] %v751_v41  ;;  %v757_v43 = vld [vmem:[%s9112_s14 + $0x110] sm:$0xf] }
  0x6d   :  { %v759_v44 = vld [vmem:[%s9112_s14 + $0x104] sm:$0xf]  ;;  %754 = vst [vmem:[#allocation4 + $0xfc] sm:$0xff] %v753_v42   ;;  %758 = vst [vmem:[#allocation4 + $0x104] sm:$0xf] %v757_v43  ;;  %v769_v49 = vld [vmem:[%s9112_s14 + $0x11c] sm:$0xff]  }
  0x6e   :  { %760 = vst [vmem:[#allocation4 + $0x108] sm:$0xf] %v759_v44  ;;  %v761_v45 = vld [vmem:[%s9112_s14 + $0x114] sm:$0xf]  ;;  %v763_v46 = vld [vmem:[%s9112_s14 + $0x108] sm:$0xf] }
  0x6f   :  { %v765_v47 = vld [vmem:[%s9112_s14 + $0x118] sm:$0xf]  ;;  %762 = vst [vmem:[#allocation4 + $0x10c] sm:$0xf] %v761_v45  ;;  %764 = vst [vmem:[#allocation4 + $0x110] sm:$0xf] %v763_v46 }
  0x70   :  { %766 = vst [vmem:[#allocation4 + $0x114] sm:$0xf] %v765_v47  ;;  %v767_v48 = vld [vmem:[%s9112_s14 + $0x10c] sm:$0xf]  ;;  %v773_v50 = vld [vmem:[%s9112_s14 + $0x130] sm:$0xf] }
  0x71   :  { %768 = vst [vmem:[#allocation4 + $0x118] sm:$0xf] %v767_v48  ;;  %770 = vst [vmem:[#allocation4 + $0x11c] sm:$0xff] %v769_v49   ;;  %v775_v51 = vld [vmem:[%s9112_s14 + $0x124] sm:$0xf]  ;;  %v785_v56 = vld [vmem:[%s9112_s14 + $0x13c] sm:$0xff]  }
  0x72   :  { %774 = vst [vmem:[#allocation4 + $0x124] sm:$0xf] %v773_v50  ;;  %v777_v52 = vld [vmem:[%s9112_s14 + $0x134] sm:$0xf]  ;;  %v779_v53 = vld [vmem:[%s9112_s14 + $0x128] sm:$0xf] }
  0x73   :  { %776 = vst [vmem:[#allocation4 + $0x128] sm:$0xf] %v775_v51  ;;  %778 = vst [vmem:[#allocation4 + $0x12c] sm:$0xf] %v777_v52  ;;  %v781_v54 = vld [vmem:[%s9112_s14 + $0x138] sm:$0xf] }
  0x74   :  { %780 = vst [vmem:[#allocation4 + $0x130] sm:$0xf] %v779_v53  ;;  %v783_v55 = vld [vmem:[%s9112_s14 + $0x12c] sm:$0xf]  ;;  %782 = vst [vmem:[#allocation4 + $0x134] sm:$0xf] %v781_v54 }
  0x75   :  { %784 = vst [vmem:[#allocation4 + $0x138] sm:$0xf] %v783_v55  ;;  %786 = vst [vmem:[#allocation4 + $0x13c] sm:$0xff] %v785_v56   ;;  %v789_v57 = vld [vmem:[%s9112_s14 + $0x150] sm:$0xf]  ;;  %v801_v63 = vld [vmem:[%s9112_s14 + $0x15c] sm:$0xff]  }
  0x76   :  { %v791_v58 = vld [vmem:[%s9112_s14 + $0x144] sm:$0xf]  ;;  %v793_v59 = vld [vmem:[%s9112_s14 + $0x154] sm:$0xf]  ;;  %790 = vst [vmem:[#allocation4 + $0x144] sm:$0xf] %v789_v57 }
  0x77   :  { %792 = vst [vmem:[#allocation4 + $0x148] sm:$0xf] %v791_v58  ;;  %794 = vst [vmem:[#allocation4 + $0x14c] sm:$0xf] %v793_v59  ;;  %v795_v60 = vld [vmem:[%s9112_s14 + $0x148] sm:$0xf] }
  0x78   :  { %v797_v61 = vld [vmem:[%s9112_s14 + $0x158] sm:$0xf]  ;;  %v799_v62 = vld [vmem:[%s9112_s14 + $0x14c] sm:$0xf]  ;;  %796 = vst [vmem:[#allocation4 + $0x150] sm:$0xf] %v795_v60 }
  0x79   :  { %798 = vst [vmem:[#allocation4 + $0x154] sm:$0xf] %v797_v61  ;;  %800 = vst [vmem:[#allocation4 + $0x158] sm:$0xf] %v799_v62  ;;  %v805_v0 = vld [vmem:[%s9112_s14 + $0x170] sm:$0xf] }
  0x7a   :  { %v807_v1 = vld [vmem:[%s9112_s14 + $0x164] sm:$0xf]  ;;  %802 = vst [vmem:[#allocation4 + $0x15c] sm:$0xff] %v801_v63   ;;  %806 = vst [vmem:[#allocation4 + $0x164] sm:$0xf] %v805_v0  ;;  %v817_v6 = vld [vmem:[%s9112_s14 + $0x17c] sm:$0xff]  }
  0x7b   :  { %808 = vst [vmem:[#allocation4 + $0x168] sm:$0xf] %v807_v1  ;;  %v809_v2 = vld [vmem:[%s9112_s14 + $0x174] sm:$0xf]  ;;  %v811_v3 = vld [vmem:[%s9112_s14 + $0x168] sm:$0xf] }
  0x7c   :  { %v813_v4 = vld [vmem:[%s9112_s14 + $0x178] sm:$0xf]  ;;  %810 = vst [vmem:[#allocation4 + $0x16c] sm:$0xf] %v809_v2  ;;  %812 = vst [vmem:[#allocation4 + $0x170] sm:$0xf] %v811_v3 }
  0x7d   :  { %814 = vst [vmem:[#allocation4 + $0x174] sm:$0xf] %v813_v4  ;;  %v815_v5 = vld [vmem:[%s9112_s14 + $0x16c] sm:$0xf]  ;;  %v821_v7 = vld [vmem:[%s9112_s14 + $0x190] sm:$0xf] }
  0x7e   :  { %816 = vst [vmem:[#allocation4 + $0x178] sm:$0xf] %v815_v5  ;;  %818 = vst [vmem:[#allocation4 + $0x17c] sm:$0xff] %v817_v6   ;;  %v823_v8 = vld [vmem:[%s9112_s14 + $0x184] sm:$0xf]  ;;  %v833_v13 = vld [vmem:[%s9112_s14 + $0x19c] sm:$0xff]  }
  0x7f   :  { %822 = vst [vmem:[#allocation4 + $0x184] sm:$0xf] %v821_v7  ;;  %v825_v9 = vld [vmem:[%s9112_s14 + $0x194] sm:$0xf]  ;;  %v827_v10 = vld [vmem:[%s9112_s14 + $0x188] sm:$0xf] }
  0x80   :  { %824 = vst [vmem:[#allocation4 + $0x188] sm:$0xf] %v823_v8  ;;  %826 = vst [vmem:[#allocation4 + $0x18c] sm:$0xf] %v825_v9  ;;  %v829_v11 = vld [vmem:[%s9112_s14 + $0x198] sm:$0xf] }
  0x81   :  { %828 = vst [vmem:[#allocation4 + $0x190] sm:$0xf] %v827_v10  ;;  %v831_v12 = vld [vmem:[%s9112_s14 + $0x18c] sm:$0xf]  ;;  %830 = vst [vmem:[#allocation4 + $0x194] sm:$0xf] %v829_v11 }
  0x82   :  { %832 = vst [vmem:[#allocation4 + $0x198] sm:$0xf] %v831_v12  ;;  %834 = vst [vmem:[#allocation4 + $0x19c] sm:$0xff] %v833_v13   ;;  %v837_v14 = vld [vmem:[%s9112_s14 + $0x1b0] sm:$0xf]  ;;  %v849_v20 = vld [vmem:[%s9112_s14 + $0x1bc] sm:$0xff]  }
  0x83   :  { %v839_v15 = vld [vmem:[%s9112_s14 + $0x1a4] sm:$0xf]  ;;  %v841_v16 = vld [vmem:[%s9112_s14 + $0x1b4] sm:$0xf]  ;;  %838 = vst [vmem:[#allocation4 + $0x1a4] sm:$0xf] %v837_v14 }
  0x84   :  { %840 = vst [vmem:[#allocation4 + $0x1a8] sm:$0xf] %v839_v15  ;;  %842 = vst [vmem:[#allocation4 + $0x1ac] sm:$0xf] %v841_v16  ;;  %v843_v17 = vld [vmem:[%s9112_s14 + $0x1a8] sm:$0xf] }
  0x85   :  { %v845_v18 = vld [vmem:[%s9112_s14 + $0x1b8] sm:$0xf]  ;;  %v847_v19 = vld [vmem:[%s9112_s14 + $0x1ac] sm:$0xf]  ;;  %844 = vst [vmem:[#allocation4 + $0x1b0] sm:$0xf] %v843_v17 }
  0x86   :  { %846 = vst [vmem:[#allocation4 + $0x1b4] sm:$0xf] %v845_v18  ;;  %848 = vst [vmem:[#allocation4 + $0x1b8] sm:$0xf] %v847_v19  ;;  %v853_v21 = vld [vmem:[%s9112_s14 + $0x1d0] sm:$0xf] }
  0x87   :  { %v855_v22 = vld [vmem:[%s9112_s14 + $0x1c4] sm:$0xf]  ;;  %850 = vst [vmem:[#allocation4 + $0x1bc] sm:$0xff] %v849_v20   ;;  %854 = vst [vmem:[#allocation4 + $0x1c4] sm:$0xf] %v853_v21  ;;  %v865_v27 = vld [vmem:[%s9112_s14 + $0x1dc] sm:$0xff]  }
  0x88   :  { %856 = vst [vmem:[#allocation4 + $0x1c8] sm:$0xf] %v855_v22  ;;  %v857_v23 = vld [vmem:[%s9112_s14 + $0x1d4] sm:$0xf]  ;;  %v859_v24 = vld [vmem:[%s9112_s14 + $0x1c8] sm:$0xf] }
  0x89   :  { %v861_v25 = vld [vmem:[%s9112_s14 + $0x1d8] sm:$0xf]  ;;  %858 = vst [vmem:[#allocation4 + $0x1cc] sm:$0xf] %v857_v23  ;;  %860 = vst [vmem:[#allocation4 + $0x1d0] sm:$0xf] %v859_v24 }
  0x8a   :  { %862 = vst [vmem:[#allocation4 + $0x1d4] sm:$0xf] %v861_v25  ;;  %v863_v26 = vld [vmem:[%s9112_s14 + $0x1cc] sm:$0xf]  ;;  %v869_v28 = vld [vmem:[%s9112_s14 + $0x1f0] sm:$0xf] }
  0x8b   :  { %864 = vst [vmem:[#allocation4 + $0x1d8] sm:$0xf] %v863_v26  ;;  %866 = vst [vmem:[#allocation4 + $0x1dc] sm:$0xff] %v865_v27   ;;  %v871_v29 = vld [vmem:[%s9112_s14 + $0x1e4] sm:$0xf]  ;;  %v881_v34 = vld [vmem:[%s9112_s14 + $0x1fc] sm:$0xff]  }
  0x8c   :  { %870 = vst [vmem:[#allocation4 + $0x1e4] sm:$0xf] %v869_v28  ;;  %v873_v30 = vld [vmem:[%s9112_s14 + $0x1f4] sm:$0xf]  ;;  %v875_v31 = vld [vmem:[%s9112_s14 + $0x1e8] sm:$0xf] }
  0x8d   :  { %872 = vst [vmem:[#allocation4 + $0x1e8] sm:$0xf] %v871_v29  ;;  %874 = vst [vmem:[#allocation4 + $0x1ec] sm:$0xf] %v873_v30  ;;  %v877_v32 = vld [vmem:[%s9112_s14 + $0x1f8] sm:$0xf] }
  0x8e   :  { %876 = vst [vmem:[#allocation4 + $0x1f0] sm:$0xf] %v875_v31  ;;  %v879_v33 = vld [vmem:[%s9112_s14 + $0x1ec] sm:$0xf]  ;;  %878 = vst [vmem:[#allocation4 + $0x1f4] sm:$0xf] %v877_v32 }
  0x8f   :  { %880 = vst [vmem:[#allocation4 + $0x1f8] sm:$0xf] %v879_v33  ;;  %882 = vst [vmem:[#allocation4 + $0x1fc] sm:$0xff] %v881_v34   ;;  %v885_v35 = vld [vmem:[%s9112_s14 + $0x210] sm:$0xf]  ;;  %v897_v41 = vld [vmem:[%s9112_s14 + $0x21c] sm:$0xff]  }
  0x90   :  { %v887_v36 = vld [vmem:[%s9112_s14 + $0x204] sm:$0xf]  ;;  %v889_v37 = vld [vmem:[%s9112_s14 + $0x214] sm:$0xf]  ;;  %886 = vst [vmem:[#allocation4 + $0x204] sm:$0xf] %v885_v35 }
  0x91   :  { %888 = vst [vmem:[#allocation4 + $0x208] sm:$0xf] %v887_v36  ;;  %890 = vst [vmem:[#allocation4 + $0x20c] sm:$0xf] %v889_v37  ;;  %v891_v38 = vld [vmem:[%s9112_s14 + $0x208] sm:$0xf] }
  0x92   :  { %v893_v39 = vld [vmem:[%s9112_s14 + $0x218] sm:$0xf]  ;;  %v895_v40 = vld [vmem:[%s9112_s14 + $0x20c] sm:$0xf]  ;;  %892 = vst [vmem:[#allocation4 + $0x210] sm:$0xf] %v891_v38 }
  0x93   :  { %894 = vst [vmem:[#allocation4 + $0x214] sm:$0xf] %v893_v39  ;;  %896 = vst [vmem:[#allocation4 + $0x218] sm:$0xf] %v895_v40  ;;  %v901_v42 = vld [vmem:[%s9112_s14 + $0x230] sm:$0xf] }
  0x94   :  { %v903_v43 = vld [vmem:[%s9112_s14 + $0x224] sm:$0xf]  ;;  %898 = vst [vmem:[#allocation4 + $0x21c] sm:$0xff] %v897_v41   ;;  %902 = vst [vmem:[#allocation4 + $0x224] sm:$0xf] %v901_v42  ;;  %v913_v48 = vld [vmem:[%s9112_s14 + $0x23c] sm:$0xff]  }
  0x95   :  { %904 = vst [vmem:[#allocation4 + $0x228] sm:$0xf] %v903_v43  ;;  %v905_v44 = vld [vmem:[%s9112_s14 + $0x234] sm:$0xf]  ;;  %v907_v45 = vld [vmem:[%s9112_s14 + $0x228] sm:$0xf] }
  0x96   :  { %v909_v46 = vld [vmem:[%s9112_s14 + $0x238] sm:$0xf]  ;;  %906 = vst [vmem:[#allocation4 + $0x22c] sm:$0xf] %v905_v44  ;;  %908 = vst [vmem:[#allocation4 + $0x230] sm:$0xf] %v907_v45 }
  0x97   :  { %910 = vst [vmem:[#allocation4 + $0x234] sm:$0xf] %v909_v46  ;;  %v911_v47 = vld [vmem:[%s9112_s14 + $0x22c] sm:$0xf]  ;;  %v917_v49 = vld [vmem:[%s9112_s14 + $0x250] sm:$0xf] }
  0x98   :  { %912 = vst [vmem:[#allocation4 + $0x238] sm:$0xf] %v911_v47  ;;  %914 = vst [vmem:[#allocation4 + $0x23c] sm:$0xff] %v913_v48   ;;  %v919_v50 = vld [vmem:[%s9112_s14 + $0x244] sm:$0xf]  ;;  %v929_v55 = vld [vmem:[%s9112_s14 + $0x25c] sm:$0xff]  }
  0x99   :  { %918 = vst [vmem:[#allocation4 + $0x244] sm:$0xf] %v917_v49  ;;  %v921_v51 = vld [vmem:[%s9112_s14 + $0x254] sm:$0xf]  ;;  %v923_v52 = vld [vmem:[%s9112_s14 + $0x248] sm:$0xf] }
  0x9a   :  { %920 = vst [vmem:[#allocation4 + $0x248] sm:$0xf] %v919_v50  ;;  %922 = vst [vmem:[#allocation4 + $0x24c] sm:$0xf] %v921_v51  ;;  %v925_v53 = vld [vmem:[%s9112_s14 + $0x258] sm:$0xf] }
  0x9b   :  { %924 = vst [vmem:[#allocation4 + $0x250] sm:$0xf] %v923_v52  ;;  %v927_v54 = vld [vmem:[%s9112_s14 + $0x24c] sm:$0xf]  ;;  %926 = vst [vmem:[#allocation4 + $0x254] sm:$0xf] %v925_v53 }
  0x9c   :  { %928 = vst [vmem:[#allocation4 + $0x258] sm:$0xf] %v927_v54  ;;  %930 = vst [vmem:[#allocation4 + $0x25c] sm:$0xff] %v929_v55   ;;  %v933_v56 = vld [vmem:[%s9112_s14 + $0x270] sm:$0xf]  ;;  %v945_v62 = vld [vmem:[%s9112_s14 + $0x27c] sm:$0xff]  }
  0x9d   :  { %v935_v57 = vld [vmem:[%s9112_s14 + $0x264] sm:$0xf]  ;;  %v937_v58 = vld [vmem:[%s9112_s14 + $0x274] sm:$0xf]  ;;  %934 = vst [vmem:[#allocation4 + $0x264] sm:$0xf] %v933_v56 }
  0x9e   :  { %936 = vst [vmem:[#allocation4 + $0x268] sm:$0xf] %v935_v57  ;;  %938 = vst [vmem:[#allocation4 + $0x26c] sm:$0xf] %v937_v58  ;;  %v939_v59 = vld [vmem:[%s9112_s14 + $0x268] sm:$0xf] }
  0x9f   :  { %v941_v60 = vld [vmem:[%s9112_s14 + $0x278] sm:$0xf]  ;;  %v943_v61 = vld [vmem:[%s9112_s14 + $0x26c] sm:$0xf]  ;;  %940 = vst [vmem:[#allocation4 + $0x270] sm:$0xf] %v939_v59 }
  0xa0   :  { %942 = vst [vmem:[#allocation4 + $0x274] sm:$0xf] %v941_v60  ;;  %944 = vst [vmem:[#allocation4 + $0x278] sm:$0xf] %v943_v61  ;;  %v949_v63 = vld [vmem:[%s9112_s14 + $0x290] sm:$0xf] }
  0xa1   :  { %v951_v0 = vld [vmem:[%s9112_s14 + $0x284] sm:$0xf]  ;;  %946 = vst [vmem:[#allocation4 + $0x27c] sm:$0xff] %v945_v62   ;;  %950 = vst [vmem:[#allocation4 + $0x284] sm:$0xf] %v949_v63  ;;  %v961_v5 = vld [vmem:[%s9112_s14 + $0x29c] sm:$0xff]  }
  0xa2   :  { %952 = vst [vmem:[#allocation4 + $0x288] sm:$0xf] %v951_v0  ;;  %v953_v1 = vld [vmem:[%s9112_s14 + $0x294] sm:$0xf]  ;;  %v955_v2 = vld [vmem:[%s9112_s14 + $0x288] sm:$0xf] }
  0xa3   :  { %v957_v3 = vld [vmem:[%s9112_s14 + $0x298] sm:$0xf]  ;;  %954 = vst [vmem:[#allocation4 + $0x28c] sm:$0xf] %v953_v1  ;;  %956 = vst [vmem:[#allocation4 + $0x290] sm:$0xf] %v955_v2 }
  0xa4   :  { %958 = vst [vmem:[#allocation4 + $0x294] sm:$0xf] %v957_v3  ;;  %v959_v4 = vld [vmem:[%s9112_s14 + $0x28c] sm:$0xf]  ;;  %v965_v6 = vld [vmem:[%s9112_s14 + $0x2b0] sm:$0xf] }
  0xa5   :  { %960 = vst [vmem:[#allocation4 + $0x298] sm:$0xf] %v959_v4  ;;  %962 = vst [vmem:[#allocation4 + $0x29c] sm:$0xff] %v961_v5   ;;  %v967_v7 = vld [vmem:[%s9112_s14 + $0x2a4] sm:$0xf]  ;;  %v977_v12 = vld [vmem:[%s9112_s14 + $0x2bc] sm:$0xff]  }
  0xa6   :  { %966 = vst [vmem:[#allocation4 + $0x2a4] sm:$0xf] %v965_v6  ;;  %v969_v8 = vld [vmem:[%s9112_s14 + $0x2b4] sm:$0xf]  ;;  %v971_v9 = vld [vmem:[%s9112_s14 + $0x2a8] sm:$0xf] }
  0xa7   :  { %968 = vst [vmem:[#allocation4 + $0x2a8] sm:$0xf] %v967_v7  ;;  %970 = vst [vmem:[#allocation4 + $0x2ac] sm:$0xf] %v969_v8  ;;  %v973_v10 = vld [vmem:[%s9112_s14 + $0x2b8] sm:$0xf] }
  0xa8   :  { %972 = vst [vmem:[#allocation4 + $0x2b0] sm:$0xf] %v971_v9  ;;  %v975_v11 = vld [vmem:[%s9112_s14 + $0x2ac] sm:$0xf]  ;;  %974 = vst [vmem:[#allocation4 + $0x2b4] sm:$0xf] %v973_v10 }
  0xa9   :  { %976 = vst [vmem:[#allocation4 + $0x2b8] sm:$0xf] %v975_v11  ;;  %978 = vst [vmem:[#allocation4 + $0x2bc] sm:$0xff] %v977_v12   ;;  %v981_v13 = vld [vmem:[%s9112_s14 + $0x2d0] sm:$0xf]  ;;  %v993_v19 = vld [vmem:[%s9112_s14 + $0x2dc] sm:$0xff]  }
  0xaa   :  { %v983_v14 = vld [vmem:[%s9112_s14 + $0x2c4] sm:$0xf]  ;;  %v985_v15 = vld [vmem:[%s9112_s14 + $0x2d4] sm:$0xf]  ;;  %982 = vst [vmem:[#allocation4 + $0x2c4] sm:$0xf] %v981_v13 }
  0xab   :  { %984 = vst [vmem:[#allocation4 + $0x2c8] sm:$0xf] %v983_v14  ;;  %986 = vst [vmem:[#allocation4 + $0x2cc] sm:$0xf] %v985_v15  ;;  %v987_v16 = vld [vmem:[%s9112_s14 + $0x2c8] sm:$0xf] }
  0xac   :  { %v989_v17 = vld [vmem:[%s9112_s14 + $0x2d8] sm:$0xf]  ;;  %v991_v18 = vld [vmem:[%s9112_s14 + $0x2cc] sm:$0xf]  ;;  %988 = vst [vmem:[#allocation4 + $0x2d0] sm:$0xf] %v987_v16 }
  0xad   :  { %990 = vst [vmem:[#allocation4 + $0x2d4] sm:$0xf] %v989_v17  ;;  %992 = vst [vmem:[#allocation4 + $0x2d8] sm:$0xf] %v991_v18  ;;  %v997_v20 = vld [vmem:[%s9112_s14 + $0x2f0] sm:$0xf] }
  0xae   :  { %v999_v21 = vld [vmem:[%s9112_s14 + $0x2e4] sm:$0xf]  ;;  %994 = vst [vmem:[#allocation4 + $0x2dc] sm:$0xff] %v993_v19   ;;  %998 = vst [vmem:[#allocation4 + $0x2e4] sm:$0xf] %v997_v20  ;;  %v1009_v26 = vld [vmem:[%s9112_s14 + $0x2fc] sm:$0xff]  }
  0xaf   :  { %1000 = vst [vmem:[#allocation4 + $0x2e8] sm:$0xf] %v999_v21  ;;  %v1001_v22 = vld [vmem:[%s9112_s14 + $0x2f4] sm:$0xf]  ;;  %v1003_v23 = vld [vmem:[%s9112_s14 + $0x2e8] sm:$0xf] }
  0xb0   :  { %v1005_v24 = vld [vmem:[%s9112_s14 + $0x2f8] sm:$0xf]  ;;  %1002 = vst [vmem:[#allocation4 + $0x2ec] sm:$0xf] %v1001_v22  ;;  %1004 = vst [vmem:[#allocation4 + $0x2f0] sm:$0xf] %v1003_v23 }
  0xb1   :  { %1006 = vst [vmem:[#allocation4 + $0x2f4] sm:$0xf] %v1005_v24  ;;  %v1007_v25 = vld [vmem:[%s9112_s14 + $0x2ec] sm:$0xf]  ;;  %v1013_v27 = vld [vmem:[%s9112_s14 + $0x310] sm:$0xf] }
  0xb2   :  { %1008 = vst [vmem:[#allocation4 + $0x2f8] sm:$0xf] %v1007_v25  ;;  %1010 = vst [vmem:[#allocation4 + $0x2fc] sm:$0xff] %v1009_v26   ;;  %v1015_v28 = vld [vmem:[%s9112_s14 + $0x304] sm:$0xf]  ;;  %v1025_v33 = vld [vmem:[%s9112_s14 + $0x31c] sm:$0xff]  }
  0xb3   :  { %1014 = vst [vmem:[#allocation4 + $0x304] sm:$0xf] %v1013_v27  ;;  %v1017_v29 = vld [vmem:[%s9112_s14 + $0x314] sm:$0xf]  ;;  %v1019_v30 = vld [vmem:[%s9112_s14 + $0x308] sm:$0xf] }
  0xb4   :  { %1016 = vst [vmem:[#allocation4 + $0x308] sm:$0xf] %v1015_v28  ;;  %1018 = vst [vmem:[#allocation4 + $0x30c] sm:$0xf] %v1017_v29  ;;  %v1021_v31 = vld [vmem:[%s9112_s14 + $0x318] sm:$0xf] }
  0xb5   :  { %1020 = vst [vmem:[#allocation4 + $0x310] sm:$0xf] %v1019_v30  ;;  %v1023_v32 = vld [vmem:[%s9112_s14 + $0x30c] sm:$0xf]  ;;  %1022 = vst [vmem:[#allocation4 + $0x314] sm:$0xf] %v1021_v31 }
  0xb6   :  { %1024 = vst [vmem:[#allocation4 + $0x318] sm:$0xf] %v1023_v32  ;;  %1026 = vst [vmem:[#allocation4 + $0x31c] sm:$0xff] %v1025_v33   ;;  %v1029_v34 = vld [vmem:[%s9112_s14 + $0x330] sm:$0xf]  ;;  %v1041_v40 = vld [vmem:[%s9112_s14 + $0x33c] sm:$0xff]  }
  0xb7   :  { %v1031_v35 = vld [vmem:[%s9112_s14 + $0x324] sm:$0xf]  ;;  %v1033_v36 = vld [vmem:[%s9112_s14 + $0x334] sm:$0xf]  ;;  %1030 = vst [vmem:[#allocation4 + $0x324] sm:$0xf] %v1029_v34 }
  0xb8   :  { %1032 = vst [vmem:[#allocation4 + $0x328] sm:$0xf] %v1031_v35  ;;  %1034 = vst [vmem:[#allocation4 + $0x32c] sm:$0xf] %v1033_v36  ;;  %v1035_v37 = vld [vmem:[%s9112_s14 + $0x328] sm:$0xf] }
  0xb9   :  { %v1037_v38 = vld [vmem:[%s9112_s14 + $0x338] sm:$0xf]  ;;  %v1039_v39 = vld [vmem:[%s9112_s14 + $0x32c] sm:$0xf]  ;;  %1036 = vst [vmem:[#allocation4 + $0x330] sm:$0xf] %v1035_v37 }
  0xba   :  { %1038 = vst [vmem:[#allocation4 + $0x334] sm:$0xf] %v1037_v38  ;;  %1040 = vst [vmem:[#allocation4 + $0x338] sm:$0xf] %v1039_v39  ;;  %v1045_v41 = vld [vmem:[%s9112_s14 + $0x350] sm:$0xf] }
  0xbb   :  { %v1047_v42 = vld [vmem:[%s9112_s14 + $0x344] sm:$0xf]  ;;  %1042 = vst [vmem:[#allocation4 + $0x33c] sm:$0xff] %v1041_v40   ;;  %1046 = vst [vmem:[#allocation4 + $0x344] sm:$0xf] %v1045_v41  ;;  %v1057_v47 = vld [vmem:[%s9112_s14 + $0x35c] sm:$0xff]  }
  0xbc   :  { %1048 = vst [vmem:[#allocation4 + $0x348] sm:$0xf] %v1047_v42  ;;  %v1049_v43 = vld [vmem:[%s9112_s14 + $0x354] sm:$0xf]  ;;  %v1051_v44 = vld [vmem:[%s9112_s14 + $0x348] sm:$0xf] }
  0xbd   :  { %v1053_v45 = vld [vmem:[%s9112_s14 + $0x358] sm:$0xf]  ;;  %1050 = vst [vmem:[#allocation4 + $0x34c] sm:$0xf] %v1049_v43  ;;  %1052 = vst [vmem:[#allocation4 + $0x350] sm:$0xf] %v1051_v44 }
  0xbe   :  { %1054 = vst [vmem:[#allocation4 + $0x354] sm:$0xf] %v1053_v45  ;;  %v1055_v46 = vld [vmem:[%s9112_s14 + $0x34c] sm:$0xf]  ;;  %v1061_v48 = vld [vmem:[%s9112_s14 + $0x370] sm:$0xf] }
  0xbf   :  { %1056 = vst [vmem:[#allocation4 + $0x358] sm:$0xf] %v1055_v46  ;;  %1058 = vst [vmem:[#allocation4 + $0x35c] sm:$0xff] %v1057_v47   ;;  %v1063_v49 = vld [vmem:[%s9112_s14 + $0x364] sm:$0xf]  ;;  %v1073_v54 = vld [vmem:[%s9112_s14 + $0x37c] sm:$0xff]  }
  0xc0   :  { %1062 = vst [vmem:[#allocation4 + $0x364] sm:$0xf] %v1061_v48  ;;  %v1065_v50 = vld [vmem:[%s9112_s14 + $0x374] sm:$0xf]  ;;  %v1067_v51 = vld [vmem:[%s9112_s14 + $0x368] sm:$0xf] }
  0xc1   :  { %1064 = vst [vmem:[#allocation4 + $0x368] sm:$0xf] %v1063_v49  ;;  %1066 = vst [vmem:[#allocation4 + $0x36c] sm:$0xf] %v1065_v50  ;;  %v1069_v52 = vld [vmem:[%s9112_s14 + $0x378] sm:$0xf] }
  0xc2   :  { %1068 = vst [vmem:[#allocation4 + $0x370] sm:$0xf] %v1067_v51  ;;  %v1071_v53 = vld [vmem:[%s9112_s14 + $0x36c] sm:$0xf]  ;;  %1070 = vst [vmem:[#allocation4 + $0x374] sm:$0xf] %v1069_v52 }
  0xc3   :  { %1072 = vst [vmem:[#allocation4 + $0x378] sm:$0xf] %v1071_v53  ;;  %1074 = vst [vmem:[#allocation4 + $0x37c] sm:$0xff] %v1073_v54   ;;  %v1077_v55 = vld [vmem:[%s9112_s14 + $0x390] sm:$0xf]  ;;  %v1089_v61 = vld [vmem:[%s9112_s14 + $0x39c] sm:$0xff]  }
  0xc4   :  { %v1079_v56 = vld [vmem:[%s9112_s14 + $0x384] sm:$0xf]  ;;  %v1081_v57 = vld [vmem:[%s9112_s14 + $0x394] sm:$0xf]  ;;  %1078 = vst [vmem:[#allocation4 + $0x384] sm:$0xf] %v1077_v55 }
  0xc5   :  { %1080 = vst [vmem:[#allocation4 + $0x388] sm:$0xf] %v1079_v56  ;;  %1082 = vst [vmem:[#allocation4 + $0x38c] sm:$0xf] %v1081_v57  ;;  %v1083_v58 = vld [vmem:[%s9112_s14 + $0x388] sm:$0xf] }
  0xc6   :  { %v1085_v59 = vld [vmem:[%s9112_s14 + $0x398] sm:$0xf]  ;;  %v1087_v60 = vld [vmem:[%s9112_s14 + $0x38c] sm:$0xf]  ;;  %1084 = vst [vmem:[#allocation4 + $0x390] sm:$0xf] %v1083_v58 }
  0xc7   :  { %1086 = vst [vmem:[#allocation4 + $0x394] sm:$0xf] %v1085_v59  ;;  %1088 = vst [vmem:[#allocation4 + $0x398] sm:$0xf] %v1087_v60  ;;  %v1093_v62 = vld [vmem:[%s9112_s14 + $0x3b0] sm:$0xf] }
  0xc8   :  { %v1095_v63 = vld [vmem:[%s9112_s14 + $0x3a4] sm:$0xf]  ;;  %1090 = vst [vmem:[#allocation4 + $0x39c] sm:$0xff] %v1089_v61   ;;  %1094 = vst [vmem:[#allocation4 + $0x3a4] sm:$0xf] %v1093_v62  ;;  %v1105_v4 = vld [vmem:[%s9112_s14 + $0x3bc] sm:$0xff]  }
  0xc9   :  { %1096 = vst [vmem:[#allocation4 + $0x3a8] sm:$0xf] %v1095_v63  ;;  %v1097_v0 = vld [vmem:[%s9112_s14 + $0x3b4] sm:$0xf]  ;;  %v1099_v1 = vld [vmem:[%s9112_s14 + $0x3a8] sm:$0xf] }
  0xca   :  { %v1101_v2 = vld [vmem:[%s9112_s14 + $0x3b8] sm:$0xf]  ;;  %1098 = vst [vmem:[#allocation4 + $0x3ac] sm:$0xf] %v1097_v0  ;;  %1100 = vst [vmem:[#allocation4 + $0x3b0] sm:$0xf] %v1099_v1 }
  0xcb   :  { %1102 = vst [vmem:[#allocation4 + $0x3b4] sm:$0xf] %v1101_v2  ;;  %v1103_v3 = vld [vmem:[%s9112_s14 + $0x3ac] sm:$0xf]  ;;  %v1109_v5 = vld [vmem:[%s9112_s14 + $0x3d0] sm:$0xf] }
  0xcc   :  { %1104 = vst [vmem:[#allocation4 + $0x3b8] sm:$0xf] %v1103_v3  ;;  %1106 = vst [vmem:[#allocation4 + $0x3bc] sm:$0xff] %v1105_v4   ;;  %v1111_v6 = vld [vmem:[%s9112_s14 + $0x3c4] sm:$0xf]  ;;  %v1121_v11 = vld [vmem:[%s9112_s14 + $0x3dc] sm:$0xff]  }
  0xcd   :  { %1110 = vst [vmem:[#allocation4 + $0x3c4] sm:$0xf] %v1109_v5  ;;  %v1113_v7 = vld [vmem:[%s9112_s14 + $0x3d4] sm:$0xf]  ;;  %v1115_v8 = vld [vmem:[%s9112_s14 + $0x3c8] sm:$0xf] }
  0xce   :  { %1112 = vst [vmem:[#allocation4 + $0x3c8] sm:$0xf] %v1111_v6  ;;  %1114 = vst [vmem:[#allocation4 + $0x3cc] sm:$0xf] %v1113_v7  ;;  %v1117_v9 = vld [vmem:[%s9112_s14 + $0x3d8] sm:$0xf] }
  0xcf   :  { %1116 = vst [vmem:[#allocation4 + $0x3d0] sm:$0xf] %v1115_v8  ;;  %v1119_v10 = vld [vmem:[%s9112_s14 + $0x3cc] sm:$0xf]  ;;  %1118 = vst [vmem:[#allocation4 + $0x3d4] sm:$0xf] %v1117_v9 }
  0xd0   :  { %1120 = vst [vmem:[#allocation4 + $0x3d8] sm:$0xf] %v1119_v10  ;;  %1122 = vst [vmem:[#allocation4 + $0x3dc] sm:$0xff] %v1121_v11   ;;  %v1125_v12 = vld [vmem:[%s9112_s14 + $0x3f0] sm:$0xf] }
  0xd1   :  { %v1127_v13 = vld [vmem:[%s9112_s14 + $0x3e4] sm:$0xf]  ;;  %v1129_v14 = vld [vmem:[%s9112_s14 + $0x3f4] sm:$0xf]  ;;  %1126 = vst [vmem:[#allocation4 + $0x3e4] sm:$0xf] %v1125_v12 }
  0xd2   :  { %1128 = vst [vmem:[#allocation4 + $0x3e8] sm:$0xf] %v1127_v13  ;;  %1130 = vst [vmem:[#allocation4 + $0x3ec] sm:$0xf] %v1129_v14  ;;  %v1131_v15 = vld [vmem:[%s9112_s14 + $0x3e8] sm:$0xf] }
  0xd3   :  { %v1133_v16 = vld [vmem:[%s9112_s14 + $0x3f8] sm:$0xf]  ;;  %v1135_v17 = vld [vmem:[%s9112_s14 + $0x3ec] sm:$0xf]  ;;  %1132 = vst [vmem:[#allocation4 + $0x3f0] sm:$0xf] %v1131_v15 }
  0xd4   :  { %1134 = vst [vmem:[#allocation4 + $0x3f4] sm:$0xf] %v1133_v16  ;;  %1136 = vst [vmem:[#allocation4 + $0x3f8] sm:$0xf] %v1135_v17  ;;  %v1137_v18 = vld [vmem:[%s9112_s14 + $0x3fc] sm:$0xf] }
  0xd5   :  { %1138 = vst [vmem:[#allocation4 + $0x3fc] sm:$0xf] %v1137_v18 }
  0xd6   :  { %1681 = vsyncadd [#allocation5 + $0x1], 16384  ;;  %v6879_v19 = vld [vmem:[%s9101_s2] sm:$0xff]   ;;  %v7069_v20 = vmov 0   ;;  %v6880_v21 = vld [vmem:[%s9101_s2 + $0x8] sm:$0xff]   ;;  %vm2586_vm0 = vcmask 261120  }
  0xd7   :  { %2201 = vmatprep.subr.bf16.mxu0 %v7069_v20  ;;  %v6881_v22 = vld [vmem:[%s9101_s2 + $0x10] sm:$0xff]   ;;  %v6882_v23 = vld [vmem:[%s9101_s2 + $0x18] sm:$0xff]   ;;  %v6883_v24 = vld [vmem:[%s9101_s2 + $0x20] sm:$0xff]   ;;  %vm7071_vm1 = vmmov 0   ;;  %vm3918_vm2 = vcmask 523264  }
  0xd8   :  { %2202 = vmatpush1.bf16.msra.mxu0 %v6879_v19  ;;  %v6897_v25 = vld [vmem:[%s9099_s0 + $0x4] ss:$8 sps:$4 sm:$0xff]   ;;  %v6885_v27 = vld [vmem:[%s9101_s2 + $0x30] sm:$0xff]   ;;  %v6886_v28 = vld [vmem:[%s9101_s2 + $0x38] sm:$0xff]  }
  0xd9   :  { %2203 = vmatprep.subr.bf16.mxu0 %v7069_v20  ;;  %v6884_v26 = vld [vmem:[%s9101_s2 + $0x28] sm:$0xff]   ;;  %2233 = vmatprep.mubr.bf16.mxu0 %v6897_v25  ;;  %v6887_v29 = vld [vmem:[%s9101_s2 + $0x40] sm:$0xff]   ;;  %v6889_v31 = vld [vmem:[%s9101_s2 + $0x50] sm:$0xff]  }
  0xda   :  { %v6888_v30 = vld [vmem:[%s9101_s2 + $0x48] sm:$0xff]   ;;  %v6890_v32 = vld [vmem:[%s9101_s2 + $0x58] sm:$0xff]   ;;  %v6891_v33 = vld [vmem:[%s9101_s2 + $0x60] sm:$0xff]  }
  0xdb   :  { %v6892_v34 = vld [vmem:[%s9101_s2 + $0x68] sm:$0xff]   ;;  %v6893_v35 = vld [vmem:[%s9101_s2 + $0x70] sm:$0xff]   ;;  %v6894_v36 = vld [vmem:[%s9101_s2 + $0x78] sm:$0xff]  }
  0xdc   :  { %2204 = vmatpush1.bf16.msra.mxu0 %v6880_v21  ;;  %v6895_v37 = vld [vmem:[%s9099_s0] ss:$8 sps:$4 sm:$0xff]   ;;  %v6898_v38 = vld [vmem:[%s9099_s0 + $0x14] ss:$8 sps:$4 sm:$0xff]   ;;  %v6900_v39 = vld [vmem:[%s9099_s0 + $0x10] ss:$8 sps:$4 sm:$0xff]  }
  0xdd   :  { %2205 = vmatprep.subr.bf16.mxu0 %v7069_v20  ;;  %v6901_v40 = vld [vmem:[%s9099_s0 + $0x24] ss:$8 sps:$4 sm:$0xff]   ;;  %v6903_v41 = vld [vmem:[%s9099_s0 + $0x20] ss:$8 sps:$4 sm:$0xff]   ;;  %v6904_v42 = vld [vmem:[%s9099_s0 + $0x34] ss:$8 sps:$4 sm:$0xff]  }
  0xde   :  { %v6906_v43 = vld [vmem:[%s9099_s0 + $0x30] ss:$8 sps:$4 sm:$0xff]   ;;  %v6907_v44 = vld [vmem:[%s9099_s0 + $0x44] ss:$8 sps:$4 sm:$0xff]   ;;  %v6909_v45 = vld [vmem:[%s9099_s0 + $0x40] ss:$8 sps:$4 sm:$0xff]  }
  0xdf   :  { %v6910_v46 = vld [vmem:[%s9099_s0 + $0x54] ss:$8 sps:$4 sm:$0xff]   ;;  %v6912_v47 = vld [vmem:[%s9099_s0 + $0x50] ss:$8 sps:$4 sm:$0xff]   ;;  %v6913_v48 = vld [vmem:[%s9099_s0 + $0x64] ss:$8 sps:$4 sm:$0xff]  }
  0xe0   :  { %2206 = vmatpush1.bf16.msra.mxu0 %v6881_v22  ;;  %v6915_v49 = vld [vmem:[%s9099_s0 + $0x60] ss:$8 sps:$4 sm:$0xff]   ;;  %v6916_v50 = vld [vmem:[%s9099_s0 + $0x74] ss:$8 sps:$4 sm:$0xff]   ;;  %v6918_v51 = vld [vmem:[%s9099_s0 + $0x70] ss:$8 sps:$4 sm:$0xff]  }
  0xe1   :  { %2207 = vmatprep.subr.bf16.mxu0 %v7069_v20  ;;  %v6919_v52 = vld [vmem:[%s9099_s0 + $0x84] ss:$8 sps:$4 sm:$0xff]   ;;  %v6921_v53 = vld [vmem:[%s9099_s0 + $0x80] ss:$8 sps:$4 sm:$0xff]   ;;  %v6922_v54 = vld [vmem:[%s9099_s0 + $0x94] ss:$8 sps:$4 sm:$0xff]  }
  0xe2   :  { %v6924_v55 = vld [vmem:[%s9099_s0 + $0x90] ss:$8 sps:$4 sm:$0xff]   ;;  %v6925_v56 = vld [vmem:[%s9099_s0 + $0xa4] ss:$8 sps:$4 sm:$0xff]   ;;  %v6927_v57 = vld [vmem:[%s9099_s0 + $0xa0] ss:$8 sps:$4 sm:$0xff]  }
  0xe3   :  { %v6928_v58 = vld [vmem:[%s9099_s0 + $0xb4] ss:$8 sps:$4 sm:$0xff]   ;;  %v6930_v59 = vld [vmem:[%s9099_s0 + $0xb0] ss:$8 sps:$4 sm:$0xff]   ;;  %v6931_v60 = vld [vmem:[%s9099_s0 + $0xc4] ss:$8 sps:$4 sm:$0xff]  }
  0xe4   :  { %2208 = vmatpush1.bf16.msra.mxu0 %v6882_v23  ;;  %v6933_v61 = vld [vmem:[%s9099_s0 + $0xc0] ss:$8 sps:$4 sm:$0xff]   ;;  %v6934_v62 = vld [vmem:[%s9099_s0 + $0xd4] ss:$8 sps:$4 sm:$0xff]   ;;  %v6936_v63 = vld [vmem:[%s9099_s0 + $0xd0] ss:$8 sps:$4 sm:$0xff]  }
  0xe5   :  { %2209 = vmatprep.subr.bf16.mxu0 %v7069_v20  ;;  %v6937_v0 = vld [vmem:[%s9099_s0 + $0xe4] ss:$8 sps:$4 sm:$0xff]   ;;  %v6939_v1 = vld [vmem:[%s9099_s0 + $0xe0] ss:$8 sps:$4 sm:$0xff]   ;;  %v6940_v2 = vld [vmem:[%s9099_s0 + $0xf4] ss:$8 sps:$4 sm:$0xff]  }
  0xe6   :  { %v6988_v3 = vld [vmem:[%s9103_s4 + $0x10] sm:$0xff]   ;;  %v6943_v5 = vld [vmem:[%s9099_s0 + $0x104] ss:$8 sps:$4 sm:$0xff]   ;;  %v6992_v6 = vld [vmem:[%s9103_s4 + $0x18] sm:$0xff]  }
  0xe7   :  { %v6942_v4 = vld [vmem:[%s9099_s0 + $0xf0] ss:$8 sps:$4 sm:$0xff]   ;;  %6460 = vmatprep.subr.bf16.mxu1 %v6988_v3  ;;  %v6945_v7 = vld [vmem:[%s9099_s0 + $0x100] ss:$8 sps:$4 sm:$0xff]   ;;  %v6946_v8 = vld [vmem:[%s9099_s0 + $0x114] ss:$8 sps:$4 sm:$0xff]  }
  0xe8   :  { %2210 = vmatpush1.bf16.msra.mxu0 %v6883_v24  ;;  %6461 = vmatpush3.bf16.msra.mxu1 %v6988_v3  ;;  %v8347_v9 = vld [vmem:[%s9103_s4] sm:$0xff]   ;;  %v6948_v10 = vld [vmem:[%s9099_s0 + $0x110] ss:$8 sps:$4 sm:$0xff]   ;;  %v6952_v13 = vld [vmem:[%s9099_s0 + $0x134] ss:$8 sps:$4 sm:$0xff]  }
  0xe9   :  { %2211 = vmatprep.subr.bf16.mxu0 %v7069_v20  ;;  %6462 = vmatprep.subr.bf16.mxu1 %v6992_v6  ;;  %v6949_v11 = vld [vmem:[%s9099_s0 + $0x124] ss:$8 sps:$4 sm:$0xff]   ;;  %v6951_v12 = vld [vmem:[%s9099_s0 + $0x120] ss:$8 sps:$4 sm:$0xff]   ;;  %v6954_v14 = vld [vmem:[%s9099_s0 + $0x130] ss:$8 sps:$4 sm:$0xff]  }
  0xea   :  { %v6955_v15 = vld [vmem:[%s9099_s0 + $0x144] ss:$8 sps:$4 sm:$0xff]   ;;  %v6957_v16 = vld [vmem:[%s9099_s0 + $0x140] ss:$8 sps:$4 sm:$0xff]   ;;  %v6958_v17 = vld [vmem:[%s9099_s0 + $0x154] ss:$8 sps:$4 sm:$0xff]  }
  0xeb   :  { %v6960_v18 = vld [vmem:[%s9099_s0 + $0x150] ss:$8 sps:$4 sm:$0xff]   ;;  %v6961_v19 = vld [vmem:[%s9099_s0 + $0x164] ss:$8 sps:$4 sm:$0xff]   ;;  %v6963_v21 = vld [vmem:[%s9099_s0 + $0x160] ss:$8 sps:$4 sm:$0xff]  }
  0xec   :  { %2212 = vmatpush1.bf16.msra.mxu0 %v6884_v26  ;;  %6463 = vmatpush3.bf16.msra.mxu1 %v6992_v6  ;;  %v6964_v22 = vld [vmem:[%s9099_s0 + $0x174] ss:$8 sps:$4 sm:$0xff]   ;;  %v6966_v23 = vld [vmem:[%s9099_s0 + $0x170] ss:$8 sps:$4 sm:$0xff]   ;;  %v6967_v24 = vld [vmem:[%s9099_s0 + $0x184] ss:$8 sps:$4 sm:$0xff]  }
  0xed   :  { %2213 = vmatprep.subr.bf16.mxu0 %v7069_v20  ;;  %6468 = vmatprep.subr.bf16.mxu1 %v8347_v9  ;;  %v6969_v25 = vld [vmem:[%s9099_s0 + $0x180] ss:$8 sps:$4 sm:$0xff]   ;;  %v6970_v26 = vld [vmem:[%s9099_s0 + $0x194] ss:$8 sps:$4 sm:$0xff]  }
  0xee   :  { %v6989_v6 = vld [vmem:[%s9099_s0 + $0x1f4] ss:$8 sps:$4 sm:$0xff]  }
  0xf0   :  { %2214 = vmatpush1.bf16.msra.mxu0 %v6885_v27  ;;  %v6972_v27 = vld [vmem:[%s9099_s0 + $0x190] ss:$8 sps:$4 sm:$0xff]  }
  0xf1   :  { %2215 = vmatprep.subr.bf16.mxu0 %v7069_v20 }
  0xf4   :  { %2216 = vmatpush1.bf16.msra.mxu0 %v6886_v28  ;;  %v6973_v28 = vld [vmem:[%s9099_s0 + $0x1a4] ss:$8 sps:$4 sm:$0xff]  }
  0xf5   :  { %2217 = vmatprep.subr.bf16.mxu0 %v7069_v20 }
  0xf8   :  { %2218 = vmatpush1.bf16.msra.mxu0 %v6887_v29  ;;  %v6975_v29 = vld [vmem:[%s9099_s0 + $0x1a0] ss:$8 sps:$4 sm:$0xff]  }
  0xf9   :  { %2219 = vmatprep.subr.bf16.mxu0 %v7069_v20 }
  0xfc   :  { %2220 = vmatpush1.bf16.msra.mxu0 %v6888_v30  ;;  %v6976_v30 = vld [vmem:[%s9099_s0 + $0x1b4] ss:$8 sps:$4 sm:$0xff]  }
  0xfd   :  { %2221 = vmatprep.subr.bf16.mxu0 %v7069_v20 }
 0x100   :  { %2222 = vmatpush1.bf16.msra.mxu0 %v6889_v31  ;;  %v8413_v31 = vld [vmem:[%s9102_s3] ss:$0 sm:$0xff] }
 0x101   :  { %2223 = vmatprep.subr.bf16.mxu0 %v7069_v20 }
 0x104   :  { %2224 = vmatpush1.bf16.msra.mxu0 %v6890_v32 }
 0x105   :  { %2225 = vmatprep.subr.bf16.mxu0 %v7069_v20 }
 0x108   :  { %2226 = vmatpush1.bf16.msra.mxu0 %v6891_v33 }
 0x109   :  { %2227 = vmatprep.subr.bf16.mxu0 %v7069_v20 }
 0x10c   :  { %2228 = vmatpush1.bf16.msra.mxu0 %v6892_v34 }
 0x10d   :  { %2229 = vmatprep.subr.bf16.mxu0 %v7069_v20 }
 0x110   :  { %2230 = vmatpush1.bf16.msra.mxu0 %v6893_v35  ;;  %v6978_v35 = vld [vmem:[%s9099_s0 + $0x1b0] ss:$8 sps:$4 sm:$0xff]  }
 0x111   :  { %2231 = vmatprep.subr.bf16.mxu0 %v7069_v20 }
 0x114   :  { %2232 = vmatpush1.bf16.msra.mxu0 %v6894_v36 }
 0x117   :  { %2234 = vmatmul.mubr.bf16.vlgmr.msra.gmra.mrb[0].mxu0 %v6895_v37  ;;  %v6979_v37 = vld [vmem:[%s9099_s0 + $0x1c4] ss:$8 sps:$4 sm:$0xff]  }
 0x118   :  { %2241 = vmatprep.mubr.bf16.mxu0 %v6898_v38 }
 0x11f   :  { %2242 = vmatmul.mubr.bf16.gmra.mrb[4].mxu0 %v6900_v39 }
 0x120   :  { %2249 = vmatprep.mubr.bf16.mxu0 %v6901_v40 }
 0x127   :  { %2250 = vmatmul.mubr.bf16.gmra.mrb[8].mxu0 %v6903_v41 }
 0x128   :  { %2257 = vmatprep.mubr.bf16.mxu0 %v6904_v42 }
 0x12f   :  { %2258 = vmatmul.mubr.bf16.gmra.mrb[12].mxu0 %v6906_v43 }
 0x130   :  { %2265 = vmatprep.mubr.bf16.mxu0 %v6907_v44 }
 0x137   :  { %2266 = vmatmul.mubr.bf16.gmra.mrb[16].mxu0 %v6909_v45 }
 0x138   :  { %2273 = vmatprep.mubr.bf16.mxu0 %v6910_v46  ;;  %v6981_v46 = vld [vmem:[%s9099_s0 + $0x1c0] ss:$8 sps:$4 sm:$0xff]  }
 0x13f   :  { %2274 = vmatmul.mubr.bf16.gmra.mrb[20].mxu0 %v6912_v47 }
 0x140   :  { %2281 = vmatprep.mubr.bf16.mxu0 %v6913_v48  ;;  %v6982_v48 = vld [vmem:[%s9099_s0 + $0x1d4] ss:$8 sps:$4 sm:$0xff]  }
 0x147   :  { %2282 = vmatmul.mubr.bf16.gmra.mrb[24].mxu0 %v6915_v49 }
 0x148   :  { %2289 = vmatprep.mubr.bf16.mxu0 %v6916_v50 }
 0x14f   :  { %2290 = vmatmul.mubr.bf16.gmra.mrb[28].mxu0 %v6918_v51 }
 0x150   :  { %2297 = vmatprep.mubr.bf16.mxu0 %v6919_v52 }
 0x157   :  { %2298 = vmatmul.mubr.bf16.gmra.mrb[32].mxu0 %v6921_v53 }
 0x158   :  { %2305 = vmatprep.mubr.bf16.mxu0 %v6922_v54 }
 0x15f   :  { %2306 = vmatmul.mubr.bf16.gmra.mrb[36].mxu0 %v6924_v55 }
 0x160   :  { %2313 = vmatprep.mubr.bf16.mxu0 %v6925_v56 }
 0x167   :  { %2314 = vmatmul.mubr.bf16.gmra.mrb[40].mxu0 %v6927_v57  ;;  %v6984_v57 = vld [vmem:[%s9099_s0 + $0x1d0] ss:$8 sps:$4 sm:$0xff]  }
 0x168   :  { %2321 = vmatprep.mubr.bf16.mxu0 %v6928_v58 }
 0x16f   :  { %2322 = vmatmul.mubr.bf16.gmra.mrb[44].mxu0 %v6930_v59  ;;  %v6985_v59 = vld [vmem:[%s9099_s0 + $0x1e4] ss:$8 sps:$4 sm:$0xff]  }
 0x170   :  { %2329 = vmatprep.mubr.bf16.mxu0 %v6931_v60 }
 0x177   :  { %2330 = vmatmul.mubr.bf16.gmra.mrb[48].mxu0 %v6933_v61 }
 0x178   :  { %2337 = vmatprep.mubr.bf16.mxu0 %v6934_v62 }
 0x17f   :  { %2338 = vmatmul.mubr.bf16.gmra.mrb[52].mxu0 %v6936_v63 }
 0x180   :  { %2345 = vmatprep.mubr.bf16.mxu0 %v6937_v0 }
 0x187   :  { %2346 = vmatmul.mubr.bf16.gmra.mrb[56].mxu0 %v6939_v1 }
 0x188   :  { %2353 = vmatprep.mubr.bf16.mxu0 %v6940_v2 }
 0x18f   :  { %2354 = vmatmul.mubr.bf16.gmra.mrb[60].mxu0 %v6942_v4  ;;  %v6987_v4 = vld [vmem:[%s9099_s0 + $0x1e0] ss:$8 sps:$4 sm:$0xff]  }
 0x190   :  { %2361 = vmatprep.mubr.bf16.mxu0 %v6943_v5 }
 0x197   :  { %2362 = vmatmul.mubr.bf16.gmra.mrb[64].mxu0 %v6945_v7 }
 0x198   :  { %2369 = vmatprep.mubr.bf16.mxu0 %v6946_v8 }
 0x19f   :  { %2370 = vmatmul.mubr.bf16.gmra.mrb[68].mxu0 %v6948_v10 }
 0x1a0   :  { %2377 = vmatprep.mubr.bf16.mxu0 %v6949_v11 }
 0x1a7   :  { %2378 = vmatmul.mubr.bf16.gmra.mrb[72].mxu0 %v6951_v12 }
 0x1a8   :  { %2385 = vmatprep.mubr.bf16.mxu0 %v6952_v13 }
 0x1af   :  { %2386 = vmatmul.mubr.bf16.gmra.mrb[76].mxu0 %v6954_v14 }
 0x1b0   :  { %2393 = vmatprep.mubr.bf16.mxu0 %v6955_v15 }
 0x1b7   :  { %2394 = vmatmul.mubr.bf16.gmra.mrb[80].mxu0 %v6957_v16 }
 0x1b8   :  { %2401 = vmatprep.mubr.bf16.mxu0 %v6958_v17  ;;  %v6991_v17 = vld [vmem:[%s9099_s0 + $0x1f0] ss:$8 sps:$4 sm:$0xff]  }
 0x1bf   :  { %2402 = vmatmul.mubr.bf16.gmra.mrb[84].mxu0 %v6960_v18 }
 0x1c0   :  { %2409 = vmatprep.mubr.bf16.mxu0 %v6961_v19 }
 0x1c7   :  { %2410 = vmatmul.mubr.bf16.gmra.mrb[88].mxu0 %v6963_v21 }
 0x1c8   :  { %2417 = vmatprep.mubr.bf16.mxu0 %v6964_v22 }
 0x1cf   :  { %2418 = vmatmul.mubr.bf16.gmra.mrb[92].mxu0 %v6966_v23 }
 0x1d0   :  { %2425 = vmatprep.mubr.bf16.mxu0 %v6967_v24 }
 0x1d7   :  { %2426 = vmatmul.mubr.bf16.gmra.mrb[96].mxu0 %v6969_v25  ;;  %v6994_v25 = vld [vmem:[%s9103_s4 + $0x8] sm:$0xff]  }
 0x1d8   :  { %2433 = vmatprep.mubr.bf16.mxu0 %v6970_v26 }
 0x1df   :  { %2434 = vmatmul.mubr.bf16.gmra.mrb[100].mxu0 %v6972_v27 }
 0x1e0   :  { %2441 = vmatprep.mubr.bf16.mxu0 %v6973_v28 }
 0x1e7   :  { %2442 = vmatmul.mubr.bf16.gmra.mrb[104].mxu0 %v6975_v29 }
 0x1e8   :  { %2449 = vmatprep.mubr.bf16.mxu0 %v6976_v30 }
 0x1ea   :  { %v2235_v32 = vpop.f32.mrb[0].mxu0 }
 0x1eb   :  { %v2236_v33 = vadd.f32 %v8413_v31, %v2235_v32  ;;  %v2237_v34 = vpop.f32.mrb[1].mxu0 }
 0x1ec   :  { %v2238_v36 = vpop.f32.mrb[2].mxu0 }
 0x1ed   :  { %v2239_v38 = vadd.f32 %v8413_v31, %v2238_v36  ;;  %v2240_v39 = vpop.f32.mrb[3].mxu0  ;;  %v2490_v40 = vmax.f32 %v2236_v33, 0.0 }
 0x1ef   :  { %v2491_v41 = vmax.f32 %v2239_v38, 0.0  ;;  %2450 = vmatmul.mubr.bf16.gmra.mrb[108].mxu0 %v6978_v35  ;;  %v6995_v35 = vld [vmem:[%s9103_s4 + $0x20] sm:$0xff]  }
 0x1f0   :  { %2457 = vmatprep.mubr.bf16.mxu0 %v6979_v37 }
 0x1f1   :  { %v2554_v42 = vpack.c.bf16 %v2491_v41, %v2490_v40 }
 0x1f2   :  { %v2243_v43 = vpop.f32.mrb[4].mxu0 }
 0x1f3   :  { %2587 = vst.msk [vmem:[#allocation2] sm:$0xff] %vm2586_vm0, %v2554_v42  ;;  %v2244_v44 = vadd.f32 %v8413_v31, %v2243_v43  ;;  %v2245_v45 = vpop.f32.mrb[5].mxu0 }
 0x1f4   :  { %v2246_v47 = vpop.f32.mrb[6].mxu0 }
 0x1f5   :  { %v2247_v49 = vadd.f32 %v8413_v31, %v2246_v47  ;;  %v2248_v50 = vpop.f32.mrb[7].mxu0  ;;  %v2492_v51 = vmax.f32 %v2244_v44, 0.0  ;;  %v6996_v44 = vld [vmem:[%s9103_s4 + $0x28] sm:$0xff]  }
 0x1f6   :  { %v6997_v50 = vld [vmem:[%s9103_s4 + $0x30] sm:$0xff]  }
 0x1f7   :  { %v2493_v52 = vmax.f32 %v2247_v49, 0.0  ;;  %2458 = vmatmul.mubr.bf16.gmra.mrb[112].mxu0 %v6981_v46 }
 0x1f8   :  { %2465 = vmatprep.mubr.bf16.mxu0 %v6982_v48 }
 0x1f9   :  { %v2555_v53 = vpack.c.bf16 %v2493_v52, %v2492_v51 }
 0x1fa   :  { %v2251_v54 = vpop.f32.mrb[8].mxu0  ;;  %v2619_v30 = vld [vmem:[#allocation2] sm:$0xff] }
 0x1fb   :  { %2588 = vst.msk [vmem:[#allocation2 + $0x8] sm:$0xff] %vm2586_vm0, %v2555_v53  ;;  %v2252_v55 = vadd.f32 %v8413_v31, %v2251_v54  ;;  %v2253_v56 = vpop.f32.mrb[9].mxu0 }
 0x1fc   :  { %v2254_v58 = vpop.f32.mrb[10].mxu0 }
 0x1fd   :  { %v2255_v60 = vadd.f32 %v8413_v31, %v2254_v58  ;;  %v2256_v61 = vpop.f32.mrb[11].mxu0  ;;  %v2494_v62 = vmax.f32 %v2252_v55, 0.0 }
 0x1ff   :  { %v2495_v63 = vmax.f32 %v2255_v60, 0.0  ;;  %2466 = vmatmul.mubr.bf16.gmra.mrb[116].mxu0 %v6984_v57  ;;  %v6998_v60 = vld [vmem:[%s9103_s4 + $0x38] sm:$0xff]  }
 0x200   :  { %2473 = vmatprep.mubr.bf16.mxu0 %v6985_v59 }
 0x201   :  { %v2556_v0 = vpack.c.bf16 %v2495_v63, %v2494_v62 }
 0x202   :  { %v2259_v1 = vpop.f32.mrb[12].mxu0  ;;  %v2620_v45 = vld [vmem:[#allocation2 + $0x8] sm:$0xff] }
 0x203   :  { %2589 = vst.msk [vmem:[#allocation2 + $0x10] sm:$0xff] %vm2586_vm0, %v2556_v0  ;;  %v2260_v2 = vadd.f32 %v8413_v31, %v2259_v1  ;;  %v2261_v3 = vpop.f32.mrb[13].mxu0 }
 0x204   :  { %v2262_v5 = vpop.f32.mrb[14].mxu0 }
 0x205   :  { %v2263_v7 = vadd.f32 %v8413_v31, %v2262_v5  ;;  %v2264_v8 = vpop.f32.mrb[15].mxu0  ;;  %v2496_v10 = vmax.f32 %v2260_v2, 0.0  ;;  %v6999_v5 = vld [vmem:[%s9103_s4 + $0x40] sm:$0xff]  }
 0x207   :  { %v2497_v11 = vmax.f32 %v2263_v7, 0.0  ;;  %2474 = vmatmul.mubr.bf16.gmra.mrb[120].mxu0 %v6987_v4 }
 0x208   :  { %2481 = vmatprep.mubr.bf16.mxu0 %v6989_v6 }
 0x209   :  { %v2557_v12 = vpack.c.bf16 %v2497_v11, %v2496_v10 }
 0x20a   :  { %v2267_v13 = vpop.f32.mrb[16].mxu0  ;;  %v2625_v14 = vld [vmem:[#allocation2 + $0x10] sm:$0xff] }
 0x20b   :  { %2590 = vst.msk [vmem:[#allocation2 + $0x18] sm:$0xff] %vm2586_vm0, %v2557_v12  ;;  %v2268_v15 = vadd.f32 %v8413_v31, %v2267_v13  ;;  %v2269_v16 = vpop.f32.mrb[17].mxu0  ;;  %6464 = vmatprep.mubr.msk.bf16.mxu1 %vm2586_vm0, %v2625_v14 }
 0x20c   :  { %v2270_v18 = vpop.f32.mrb[18].mxu0  ;;  %v7000_v16 = vld [vmem:[%s9103_s4 + $0x48] sm:$0xff]  }
 0x20d   :  { %v2271_v19 = vadd.f32 %v8413_v31, %v2270_v18  ;;  %v2272_v21 = vpop.f32.mrb[19].mxu0  ;;  %v2498_v22 = vmax.f32 %v2268_v15, 0.0 }
 0x20f   :  { %v2499_v23 = vmax.f32 %v2271_v19, 0.0  ;;  %2482 = vmatmul.mubr.bf16.gmra.mrb[124].mxu0 %v6991_v17 }
 0x211   :  { %v2558_v24 = vpack.c.bf16 %v2499_v23, %v2498_v22  ;;  %v7001_v22 = vld [vmem:[%s9103_s4 + $0x50] sm:$0xff]  }
 0x212   :  { %v2275_v26 = vpop.f32.mrb[20].mxu0  ;;  %v2626_v27 = vld [vmem:[#allocation2 + $0x18] sm:$0xff] }
 0x213   :  { %2591 = vst.msk [vmem:[#allocation2 + $0x20] sm:$0xff] %vm2586_vm0, %v2558_v24  ;;  %v2276_v28 = vadd.f32 %v8413_v31, %v2275_v26  ;;  %v2277_v29 = vpop.f32.mrb[21].mxu0  ;;  %6465 = vmatmul.mubr.msk.bf16.vlgmr.msra.gmra.mrb[0].mxu1 %vm2586_vm0, %v2626_v27 }
 0x214   :  { %v2278_v32 = vpop.f32.mrb[22].mxu0  ;;  %6472 = vmatprep.mubr.msk.bf16.mxu1 %vm2586_vm0, %v2619_v30  ;;  %6469 = vmatpush3.bf16.msra.mxu1 %v8347_v9 }
 0x215   :  { %v2279_v33 = vadd.f32 %v8413_v31, %v2278_v32  ;;  %v2280_v34 = vpop.f32.mrb[23].mxu0  ;;  %6470 = vmatprep.subr.bf16.mxu1 %v6994_v25  ;;  %v2500_v36 = vmax.f32 %v2276_v28, 0.0 }
 0x216   :  { %v7002_v34 = vld [vmem:[%s9103_s4 + $0x58] sm:$0xff]  }
 0x217   :  { %v2501_v37 = vmax.f32 %v2279_v33, 0.0 }
 0x218   :  { %6471 = vmatpush3.bf16.msra.mxu1 %v6994_v25 }
 0x219   :  { %v2559_v38 = vpack.c.bf16 %v2501_v37, %v2500_v36  ;;  %6476 = vmatprep.subr.bf16.mxu1 %v6995_v35 }
 0x21a   :  { %v2283_v39 = vpop.f32.mrb[24].mxu0  ;;  %v2766_v48 = vld [vmem:[#allocation2 + $0x20] sm:$0xff] }
 0x21b   :  { %2592 = vst.msk [vmem:[#allocation2 + $0x28] sm:$0xff] %vm2586_vm0, %v2559_v38  ;;  %v2284_v40 = vadd.f32 %v8413_v31, %v2283_v39  ;;  %v2285_v41 = vpop.f32.mrb[25].mxu0 }
 0x21c   :  { %v2286_v9 = vpop.f32.mrb[26].mxu0 }
 0x21d   :  { %v2287_v42 = vadd.f32 %v8413_v31, %v2286_v9  ;;  %v2288_v43 = vpop.f32.mrb[27].mxu0  ;;  %v2502_v46 = vmax.f32 %v2284_v40, 0.0  ;;  %v7003_v9 = vld [vmem:[%s9103_s4 + $0x60] sm:$0xff]  }
 0x21f   :  { %v2503_v47 = vmax.f32 %v2287_v42, 0.0  ;;  %6473 = vmatmul.mubr.msk.bf16.vlgmr.msra.gmra.mrb[0].mxu1 %vm2586_vm0, %v2620_v45 }
 0x220   :  { %6480 = vmatprep.mubr.msk.bf16.mxu1 %vm2586_vm0, %v2766_v48  ;;  %6477 = vmatpush3.bf16.msra.mxu1 %v6995_v35 }
 0x221   :  { %v2560_v49 = vpack.c.bf16 %v2503_v47, %v2502_v46  ;;  %6478 = vmatprep.subr.bf16.mxu1 %v6996_v44 }
 0x222   :  { %v2291_v51 = vpop.f32.mrb[28].mxu0  ;;  %v2767_v62 = vld [vmem:[#allocation2 + $0x28] sm:$0xff] }
 0x223   :  { %2593 = vst.msk [vmem:[#allocation2 + $0x30] sm:$0xff] %vm2586_vm0, %v2560_v49  ;;  %v2292_v52 = vadd.f32 %v8413_v31, %v2291_v51  ;;  %v2293_v53 = vpop.f32.mrb[29].mxu0 }
 0x224   :  { %v2294_v54 = vpop.f32.mrb[30].mxu0  ;;  %6479 = vmatpush3.bf16.msra.mxu1 %v6996_v44 }
 0x225   :  { %v2295_v55 = vadd.f32 %v8413_v31, %v2294_v54  ;;  %v2296_v56 = vpop.f32.mrb[31].mxu0  ;;  %6484 = vmatprep.subr.bf16.mxu1 %v6997_v50  ;;  %v2504_v57 = vmax.f32 %v2292_v52, 0.0 }
 0x227   :  { %v2505_v58 = vmax.f32 %v2295_v55, 0.0  ;;  %v7004_v55 = vld [vmem:[%s9103_s4 + $0x68] sm:$0xff]  }
 0x229   :  { %v2561_v59 = vpack.c.bf16 %v2505_v58, %v2504_v57 }
 0x22a   :  { %v2299_v61 = vpop.f32.mrb[32].mxu0  ;;  %v2844_v63 = vld [vmem:[#allocation2 + $0x30] sm:$0xff] }
 0x22b   :  { %2594 = vst.msk [vmem:[#allocation2 + $0x38] sm:$0xff] %vm2586_vm0, %v2561_v59  ;;  %v2300_v0 = vadd.f32 %v8413_v31, %v2299_v61  ;;  %v2301_v1 = vpop.f32.mrb[33].mxu0  ;;  %6481 = vmatmul.mubr.msk.bf16.vlgmr.msra.gmra.mrb[0].mxu1 %vm2586_vm0, %v2767_v62 }
 0x22c   :  { %v2302_v2 = vpop.f32.mrb[34].mxu0  ;;  %6488 = vmatprep.mubr.msk.bf16.mxu1 %vm2586_vm0, %v2844_v63  ;;  %6485 = vmatpush3.bf16.msra.mxu1 %v6997_v50  ;;  %v7005_v63 = vld [vmem:[%s9103_s4 + $0x70] sm:$0xff]  }
 0x22d   :  { %v2303_v3 = vadd.f32 %v8413_v31, %v2302_v2  ;;  %v2304_v4 = vpop.f32.mrb[35].mxu0  ;;  %6486 = vmatprep.subr.bf16.mxu1 %v6998_v60  ;;  %v2506_v6 = vmax.f32 %v2300_v0, 0.0 }
 0x22f   :  { %v2507_v7 = vmax.f32 %v2303_v3, 0.0 }
 0x230   :  { %6487 = vmatpush3.bf16.msra.mxu1 %v6998_v60 }
 0x231   :  { %v2562_v8 = vpack.c.bf16 %v2507_v7, %v2506_v6  ;;  %6492 = vmatprep.subr.bf16.mxu1 %v6999_v5 }
 0x232   :  { %v2307_v10 = vpop.f32.mrb[36].mxu0  ;;  %v2845_v17 = vld [vmem:[#allocation2 + $0x38] sm:$0xff] }
 0x233   :  { %2595 = vst.msk [vmem:[#allocation2 + $0x40] sm:$0xff] %vm2586_vm0, %v2562_v8  ;;  %v2308_v11 = vadd.f32 %v8413_v31, %v2307_v10  ;;  %v2309_v12 = vpop.f32.mrb[37].mxu0 }
 0x234   :  { %v2310_v13 = vpop.f32.mrb[38].mxu0 }
 0x235   :  { %v2311_v14 = vadd.f32 %v8413_v31, %v2310_v13  ;;  %v2312_v15 = vpop.f32.mrb[39].mxu0  ;;  %v2508_v18 = vmax.f32 %v2308_v11, 0.0 }
 0x237   :  { %v2509_v19 = vmax.f32 %v2311_v14, 0.0  ;;  %6489 = vmatmul.mubr.msk.bf16.vlgmr.msra.gmra.mrb[0].mxu1 %vm2586_vm0, %v2845_v17  ;;  %v7006_v14 = vld [vmem:[%s9103_s4 + $0x78] sm:$0xff]  }
 0x238   :  { %6493 = vmatpush3.bf16.msra.mxu1 %v6999_v5 }
 0x239   :  { %v2563_v21 = vpack.c.bf16 %v2509_v19, %v2508_v18  ;;  %6494 = vmatprep.subr.bf16.mxu1 %v7000_v16 }
 0x23a   :  { %v2315_v23 = vpop.f32.mrb[40].mxu0  ;;  %v2922_v24 = vld [vmem:[#allocation2 + $0x40] sm:$0xff] }
 0x23b   :  { %2596 = vst.msk [vmem:[#allocation2 + $0x48] sm:$0xff] %vm2586_vm0, %v2563_v21  ;;  %v2316_v25 = vadd.f32 %v8413_v31, %v2315_v23  ;;  %v2317_v26 = vpop.f32.mrb[41].mxu0  ;;  %6496 = vmatprep.mubr.msk.bf16.mxu1 %vm2586_vm0, %v2922_v24  ;;  %v7007_v23 = vld [vmem:[%s9103_s4 + $0x80] sm:$0xff]  }
 0x23c   :  { %v2318_v27 = vpop.f32.mrb[42].mxu0  ;;  %6495 = vmatpush3.bf16.msra.mxu1 %v7000_v16 }
 0x23d   :  { %v2319_v28 = vadd.f32 %v8413_v31, %v2318_v27  ;;  %v2320_v29 = vpop.f32.mrb[43].mxu0  ;;  %6500 = vmatprep.subr.bf16.mxu1 %v7001_v22  ;;  %v2510_v30 = vmax.f32 %v2316_v25, 0.0 }
 0x23f   :  { %v2511_v32 = vmax.f32 %v2319_v28, 0.0 }
 0x241   :  { %v2564_v33 = vpack.c.bf16 %v2511_v32, %v2510_v30 }
 0x242   :  { %v2323_v35 = vpop.f32.mrb[44].mxu0  ;;  %v2923_v36 = vld [vmem:[#allocation2 + $0x48] sm:$0xff] }
 0x243   :  { %2597 = vst.msk [vmem:[#allocation2 + $0x50] sm:$0xff] %vm2586_vm0, %v2564_v33  ;;  %v2324_v37 = vadd.f32 %v8413_v31, %v2323_v35  ;;  %v2325_v38 = vpop.f32.mrb[45].mxu0  ;;  %6497 = vmatmul.mubr.msk.bf16.vlgmr.msra.gmra.mrb[0].mxu1 %vm2586_vm0, %v2923_v36 }
 0x244   :  { %v2326_v39 = vpop.f32.mrb[46].mxu0  ;;  %6501 = vmatpush3.bf16.msra.mxu1 %v7001_v22  ;;  %v7008_v38 = vld [vmem:[%s9103_s4 + $0x88] sm:$0xff]  }
 0x245   :  { %v2327_v40 = vadd.f32 %v8413_v31, %v2326_v39  ;;  %v2328_v41 = vpop.f32.mrb[47].mxu0  ;;  %6502 = vmatprep.subr.bf16.mxu1 %v7002_v34  ;;  %v2512_v42 = vmax.f32 %v2324_v37, 0.0 }
 0x247   :  { %v2513_v43 = vmax.f32 %v2327_v40, 0.0 }
 0x248   :  { %6503 = vmatpush3.bf16.msra.mxu1 %v7002_v34 }
 0x249   :  { %v2565_v44 = vpack.c.bf16 %v2513_v43, %v2512_v42  ;;  %6508 = vmatprep.subr.bf16.mxu1 %v7003_v9  ;;  %v8559_v42 = vld [vmem:[%s9105_s6 + $0xa0] sm:$0xff]  }
 0x24a   :  { %v2331_v45 = vpop.f32.mrb[48].mxu0  ;;  %v3000_v46 = vld [vmem:[#allocation2 + $0x50] sm:$0xff] }
 0x24b   :  { %2598 = vst.msk [vmem:[#allocation2 + $0x58] sm:$0xff] %vm2586_vm0, %v2565_v44  ;;  %v2332_v47 = vadd.f32 %v8413_v31, %v2331_v45  ;;  %v2333_v48 = vpop.f32.mrb[49].mxu0  ;;  %6504 = vmatprep.mubr.msk.bf16.mxu1 %vm2586_vm0, %v3000_v46  ;;  %v7070_v44 = vmov 0.0  }
 0x24c   :  { %v2334_v49 = vpop.f32.mrb[50].mxu0  ;;  %6720 = vmatprep.subr.bf16.mxu0 %v7070_v44  ;;  %v8570_v48 = vld [vmem:[%s9105_s6 + $0xa8] sm:$0xff]   ;;  %6728 = vmatprep.mubr.msk.bf16.mxu0 %vm7071_vm1, %v7070_v44 }
 0x24d   :  { %v2335_v50 = vadd.f32 %v8413_v31, %v2334_v49  ;;  %v2336_v51 = vpop.f32.mrb[51].mxu0  ;;  %v2514_v52 = vmax.f32 %v2332_v47, 0.0  ;;  %v7009_v47 = vld [vmem:[%s9103_s4 + $0x90] sm:$0xff]   ;;  %6721 = vmatpush3.bf16.msra.mxu0 %v8559_v42 }
 0x24e   :  { %6722 = vmatprep.subr.bf16.mxu0 %v7070_v44 }
 0x24f   :  { %v2515_v53 = vmax.f32 %v2335_v50, 0.0 }
 0x251   :  { %v2566_v54 = vpack.c.bf16 %v2515_v53, %v2514_v52  ;;  %6723 = vmatpush3.bf16.msra.mxu0 %v8570_v48 }
 0x252   :  { %v2339_v56 = vpop.f32.mrb[52].mxu0  ;;  %v3001_v57 = vld [vmem:[#allocation2 + $0x58] sm:$0xff]  ;;  %6724 = vmatprep.subr.bf16.mxu0 %v7070_v44 }
 0x253   :  { %2599 = vst.msk [vmem:[#allocation2 + $0x60] sm:$0xff] %vm2586_vm0, %v2566_v54  ;;  %v2340_v58 = vadd.f32 %v8413_v31, %v2339_v56  ;;  %v2341_v59 = vpop.f32.mrb[53].mxu0  ;;  %6505 = vmatmul.mubr.msk.bf16.vlgmr.msra.gmra.mrb[0].mxu1 %vm2586_vm0, %v3001_v57 }
 0x254   :  { %v2342_v60 = vpop.f32.mrb[54].mxu0  ;;  %6509 = vmatpush3.bf16.msra.mxu1 %v7003_v9 }
 0x255   :  { %v2343_v61 = vadd.f32 %v8413_v31, %v2342_v60  ;;  %v2344_v62 = vpop.f32.mrb[55].mxu0  ;;  %6510 = vmatprep.subr.bf16.mxu1 %v7004_v55  ;;  %v2516_v0 = vmax.f32 %v2340_v58, 0.0 }
 0x256   :  { %v7010_v62 = vld [vmem:[%s9103_s4 + $0x98] sm:$0xff]  }
 0x257   :  { %v2517_v1 = vmax.f32 %v2343_v61, 0.0 }
 0x258   :  { %6511 = vmatpush3.bf16.msra.mxu1 %v7004_v55 }
 0x259   :  { %v2567_v2 = vpack.c.bf16 %v2517_v1, %v2516_v0  ;;  %6516 = vmatprep.subr.bf16.mxu1 %v7005_v63 }
 0x25a   :  { %v2347_v3 = vpop.f32.mrb[56].mxu0  ;;  %v3078_v4 = vld [vmem:[#allocation2 + $0x60] sm:$0xff] }
 0x25b   :  { %2600 = vst.msk [vmem:[#allocation2 + $0x68] sm:$0xff] %vm2586_vm0, %v2567_v2  ;;  %v2348_v5 = vadd.f32 %v8413_v31, %v2347_v3  ;;  %v2349_v6 = vpop.f32.mrb[57].mxu0  ;;  %6512 = vmatprep.mubr.msk.bf16.mxu1 %vm2586_vm0, %v3078_v4 }
 0x25c   :  { %v2350_v7 = vpop.f32.mrb[58].mxu0  ;;  %v7011_v6 = vld [vmem:[%s9103_s4 + $0xa0] sm:$0xff]  }
 0x25d   :  { %v2351_v8 = vadd.f32 %v8413_v31, %v2350_v7  ;;  %v2352_v10 = vpop.f32.mrb[59].mxu0  ;;  %v2518_v11 = vmax.f32 %v2348_v5, 0.0 }
 0x25f   :  { %v2519_v12 = vmax.f32 %v2351_v8, 0.0 }
 0x261   :  { %v2568_v13 = vpack.c.bf16 %v2519_v12, %v2518_v11 }
 0x262   :  { %v2355_v15 = vpop.f32.mrb[60].mxu0  ;;  %v3079_v16 = vld [vmem:[#allocation2 + $0x68] sm:$0xff] }
 0x263   :  { %2601 = vst.msk [vmem:[#allocation2 + $0x70] sm:$0xff] %vm2586_vm0, %v2568_v13  ;;  %v2356_v17 = vadd.f32 %v8413_v31, %v2355_v15  ;;  %v2357_v18 = vpop.f32.mrb[61].mxu0  ;;  %6513 = vmatmul.mubr.msk.bf16.vlgmr.msra.gmra.mrb[0].mxu1 %vm2586_vm0, %v3079_v16 }
 0x264   :  { %v2358_v19 = vpop.f32.mrb[62].mxu0  ;;  %6517 = vmatpush3.bf16.msra.mxu1 %v7005_v63 }
 0x265   :  { %v2359_v21 = vadd.f32 %v8413_v31, %v2358_v19  ;;  %v2360_v22 = vpop.f32.mrb[63].mxu0  ;;  %6518 = vmatprep.subr.bf16.mxu1 %v7006_v14  ;;  %v2520_v24 = vmax.f32 %v2356_v17, 0.0 }
 0x266   :  { %v7012_v22 = vld [vmem:[%s9103_s4 + $0xa8] sm:$0xff]  }
 0x267   :  { %v2521_v25 = vmax.f32 %v2359_v21, 0.0 }
 0x268   :  { %6519 = vmatpush3.bf16.msra.mxu1 %v7006_v14 }
 0x269   :  { %v2569_v26 = vpack.c.bf16 %v2521_v25, %v2520_v24  ;;  %6524 = vmatprep.subr.bf16.mxu1 %v7007_v23 }
 0x26a   :  { %v2363_v27 = vpop.f32.mrb[64].mxu0  ;;  %v3156_v28 = vld [vmem:[#allocation2 + $0x70] sm:$0xff] }
 0x26b   :  { %2602 = vst.msk [vmem:[#allocation2 + $0x78] sm:$0xff] %vm2586_vm0, %v2569_v26  ;;  %v2364_v29 = vadd.f32 %v8413_v31, %v2363_v27  ;;  %v2365_v30 = vpop.f32.mrb[65].mxu0  ;;  %6520 = vmatprep.mubr.msk.bf16.mxu1 %vm2586_vm0, %v3156_v28 }
 0x26c   :  { %v2366_v32 = vpop.f32.mrb[66].mxu0  ;;  %v7013_v30 = vld [vmem:[%s9103_s4 + $0xb0] sm:$0xff]  }
 0x26d   :  { %v2367_v33 = vadd.f32 %v8413_v31, %v2366_v32  ;;  %v2368_v34 = vpop.f32.mrb[67].mxu0  ;;  %v2522_v35 = vmax.f32 %v2364_v29, 0.0 }
 0x26f   :  { %v2523_v36 = vmax.f32 %v2367_v33, 0.0 }
 0x271   :  { %v2570_v37 = vpack.c.bf16 %v2523_v36, %v2522_v35 }
 0x272   :  { %v2371_v39 = vpop.f32.mrb[68].mxu0  ;;  %v3157_v40 = vld [vmem:[#allocation2 + $0x78] sm:$0xff] }
 0x273   :  { %2603 = vst.msk [vmem:[#allocation2 + $0x80] sm:$0xff] %vm2586_vm0, %v2570_v37  ;;  %v2372_v41 = vadd.f32 %v8413_v31, %v2371_v39  ;;  %v2373_v9 = vpop.f32.mrb[69].mxu0  ;;  %6521 = vmatmul.mubr.msk.bf16.vlgmr.msra.gmra.mrb[0].mxu1 %vm2586_vm0, %v3157_v40 }
 0x274   :  { %v2374_v43 = vpop.f32.mrb[70].mxu0  ;;  %6525 = vmatpush3.bf16.msra.mxu1 %v7007_v23 }
 0x275   :  { %v2375_v45 = vadd.f32 %v8413_v31, %v2374_v43  ;;  %v2376_v46 = vpop.f32.mrb[71].mxu0  ;;  %6526 = vmatprep.subr.bf16.mxu1 %v7008_v38  ;;  %v2524_v49 = vmax.f32 %v2372_v41, 0.0 }
 0x276   :  { %v7014_v46 = vld [vmem:[%s9103_s4 + $0xb8] sm:$0xff]  }
 0x277   :  { %v2525_v50 = vmax.f32 %v2375_v45, 0.0 }
 0x278   :  { %6527 = vmatpush3.bf16.msra.mxu1 %v7008_v38 }
 0x279   :  { %v2571_v51 = vpack.c.bf16 %v2525_v50, %v2524_v49  ;;  %6532 = vmatprep.subr.bf16.mxu1 %v7009_v47 }
 0x27a   :  { %v2379_v52 = vpop.f32.mrb[72].mxu0  ;;  %v3234_v53 = vld [vmem:[#allocation2 + $0x80] sm:$0xff] }
 0x27b   :  { %2604 = vst.msk [vmem:[#allocation2 + $0x88] sm:$0xff] %vm2586_vm0, %v2571_v51  ;;  %v2380_v54 = vadd.f32 %v8413_v31, %v2379_v52  ;;  %v2381_v55 = vpop.f32.mrb[73].mxu0  ;;  %6528 = vmatprep.mubr.msk.bf16.mxu1 %vm2586_vm0, %v3234_v53 }
 0x27c   :  { %v2382_v56 = vpop.f32.mrb[74].mxu0  ;;  %v7015_v55 = vld [vmem:[%s9103_s4 + $0xc0] sm:$0xff]  }
 0x27d   :  { %v2383_v57 = vadd.f32 %v8413_v31, %v2382_v56  ;;  %v2384_v58 = vpop.f32.mrb[75].mxu0  ;;  %v2526_v59 = vmax.f32 %v2380_v54, 0.0 }
 0x27f   :  { %v2527_v60 = vmax.f32 %v2383_v57, 0.0 }
 0x281   :  { %v2572_v61 = vpack.c.bf16 %v2527_v60, %v2526_v59 }
 0x282   :  { %v2387_v63 = vpop.f32.mrb[76].mxu0  ;;  %v3235_v0 = vld [vmem:[#allocation2 + $0x88] sm:$0xff] }
 0x283   :  { %2605 = vst.msk [vmem:[#allocation2 + $0x90] sm:$0xff] %vm2586_vm0, %v2572_v61  ;;  %v2388_v1 = vadd.f32 %v8413_v31, %v2387_v63  ;;  %v2389_v2 = vpop.f32.mrb[77].mxu0  ;;  %6529 = vmatmul.mubr.msk.bf16.vlgmr.msra.gmra.mrb[0].mxu1 %vm2586_vm0, %v3235_v0 }
 0x284   :  { %v2390_v3 = vpop.f32.mrb[78].mxu0  ;;  %6533 = vmatpush3.bf16.msra.mxu1 %v7009_v47 }
 0x285   :  { %v2391_v4 = vadd.f32 %v8413_v31, %v2390_v3  ;;  %v2392_v5 = vpop.f32.mrb[79].mxu0  ;;  %6534 = vmatprep.subr.bf16.mxu1 %v7010_v62  ;;  %v2528_v7 = vmax.f32 %v2388_v1, 0.0 }
 0x286   :  { %v7016_v5 = vld [vmem:[%s9103_s4 + $0xc8] sm:$0xff]  }
 0x287   :  { %v2529_v8 = vmax.f32 %v2391_v4, 0.0 }
 0x288   :  { %6535 = vmatpush3.bf16.msra.mxu1 %v7010_v62 }
 0x289   :  { %v2573_v10 = vpack.c.bf16 %v2529_v8, %v2528_v7  ;;  %6540 = vmatprep.subr.bf16.mxu1 %v7011_v6 }
 0x28a   :  { %v2395_v11 = vpop.f32.mrb[80].mxu0  ;;  %v3312_v12 = vld [vmem:[#allocation2 + $0x90] sm:$0xff] }
 0x28b   :  { %2606 = vst.msk [vmem:[#allocation2 + $0x98] sm:$0xff] %vm2586_vm0, %v2573_v10  ;;  %v2396_v13 = vadd.f32 %v8413_v31, %v2395_v11  ;;  %v2397_v14 = vpop.f32.mrb[81].mxu0  ;;  %6536 = vmatprep.mubr.msk.bf16.mxu1 %vm2586_vm0, %v3312_v12 }
 0x28c   :  { %v2398_v15 = vpop.f32.mrb[82].mxu0  ;;  %v7017_v14 = vld [vmem:[%s9103_s4 + $0xd0] sm:$0xff]  }
 0x28d   :  { %v2399_v16 = vadd.f32 %v8413_v31, %v2398_v15  ;;  %v2400_v17 = vpop.f32.mrb[83].mxu0  ;;  %v2530_v18 = vmax.f32 %v2396_v13, 0.0 }
 0x28f   :  { %v2531_v19 = vmax.f32 %v2399_v16, 0.0 }
 0x291   :  { %v2574_v21 = vpack.c.bf16 %v2531_v19, %v2530_v18 }
 0x292   :  { %v2403_v23 = vpop.f32.mrb[84].mxu0  ;;  %v3313_v24 = vld [vmem:[#allocation2 + $0x98] sm:$0xff] }
 0x293   :  { %2607 = vst.msk [vmem:[#allocation2 + $0xa0] sm:$0xff] %vm2586_vm0, %v2574_v21  ;;  %v2404_v25 = vadd.f32 %v8413_v31, %v2403_v23  ;;  %v2405_v26 = vpop.f32.mrb[85].mxu0  ;;  %6537 = vmatmul.mubr.msk.bf16.vlgmr.msra.gmra.mrb[0].mxu1 %vm2586_vm0, %v3313_v24 }
 0x294   :  { %v2406_v27 = vpop.f32.mrb[86].mxu0  ;;  %6541 = vmatpush3.bf16.msra.mxu1 %v7011_v6 }
 0x295   :  { %v2407_v28 = vadd.f32 %v8413_v31, %v2406_v27  ;;  %v2408_v29 = vpop.f32.mrb[87].mxu0  ;;  %6542 = vmatprep.subr.bf16.mxu1 %v7012_v22  ;;  %v2532_v32 = vmax.f32 %v2404_v25, 0.0 }
 0x296   :  { %v7018_v29 = vld [vmem:[%s9103_s4 + $0xd8] sm:$0xff]  }
 0x297   :  { %v2533_v33 = vmax.f32 %v2407_v28, 0.0 }
 0x298   :  { %6543 = vmatpush3.bf16.msra.mxu1 %v7012_v22 }
 0x299   :  { %v2575_v34 = vpack.c.bf16 %v2533_v33, %v2532_v32  ;;  %6548 = vmatprep.subr.bf16.mxu1 %v7013_v30 }
 0x29a   :  { %v2411_v35 = vpop.f32.mrb[88].mxu0  ;;  %v3390_v36 = vld [vmem:[#allocation2 + $0xa0] sm:$0xff] }
 0x29b   :  { %2608 = vst.msk [vmem:[#allocation2 + $0xa8] sm:$0xff] %vm2586_vm0, %v2575_v34  ;;  %v2412_v37 = vadd.f32 %v8413_v31, %v2411_v35  ;;  %v2413_v38 = vpop.f32.mrb[89].mxu0  ;;  %6544 = vmatprep.mubr.msk.bf16.mxu1 %vm2586_vm0, %v3390_v36 }
 0x29c   :  { %v2414_v39 = vpop.f32.mrb[90].mxu0  ;;  %v7019_v38 = vld [vmem:[%s9103_s4 + $0xe0] sm:$0xff]  }
 0x29d   :  { %v2415_v40 = vadd.f32 %v8413_v31, %v2414_v39  ;;  %v2416_v41 = vpop.f32.mrb[91].mxu0  ;;  %v2534_v9 = vmax.f32 %v2412_v37, 0.0 }
 0x29f   :  { %v2535_v43 = vmax.f32 %v2415_v40, 0.0 }
 0x2a1   :  { %v2576_v45 = vpack.c.bf16 %v2535_v43, %v2534_v9 }
 0x2a2   :  { %v2419_v47 = vpop.f32.mrb[92].mxu0  ;;  %v3391_v49 = vld [vmem:[#allocation2 + $0xa8] sm:$0xff] }
 0x2a3   :  { %2609 = vst.msk [vmem:[#allocation2 + $0xb0] sm:$0xff] %vm2586_vm0, %v2576_v45  ;;  %v2420_v50 = vadd.f32 %v8413_v31, %v2419_v47  ;;  %v2421_v51 = vpop.f32.mrb[93].mxu0  ;;  %6545 = vmatmul.mubr.msk.bf16.vlgmr.msra.gmra.mrb[0].mxu1 %vm2586_vm0, %v3391_v49 }
 0x2a4   :  { %v2422_v52 = vpop.f32.mrb[94].mxu0  ;;  %6549 = vmatpush3.bf16.msra.mxu1 %v7013_v30 }
 0x2a5   :  { %v2423_v53 = vadd.f32 %v8413_v31, %v2422_v52  ;;  %v2424_v54 = vpop.f32.mrb[95].mxu0  ;;  %6550 = vmatprep.subr.bf16.mxu1 %v7014_v46  ;;  %v2536_v56 = vmax.f32 %v2420_v50, 0.0 }
 0x2a6   :  { %v7020_v54 = vld [vmem:[%s9103_s4 + $0xe8] sm:$0xff]  }
 0x2a7   :  { %v2537_v57 = vmax.f32 %v2423_v53, 0.0 }
 0x2a8   :  { %6551 = vmatpush3.bf16.msra.mxu1 %v7014_v46 }
 0x2a9   :  { %v2577_v58 = vpack.c.bf16 %v2537_v57, %v2536_v56  ;;  %6556 = vmatprep.subr.bf16.mxu1 %v7015_v55 }
 0x2aa   :  { %v2427_v59 = vpop.f32.mrb[96].mxu0  ;;  %v3468_v60 = vld [vmem:[#allocation2 + $0xb0] sm:$0xff] }
 0x2ab   :  { %2610 = vst.msk [vmem:[#allocation2 + $0xb8] sm:$0xff] %vm2586_vm0, %v2577_v58  ;;  %v2428_v61 = vadd.f32 %v8413_v31, %v2427_v59  ;;  %v2429_v62 = vpop.f32.mrb[97].mxu0  ;;  %6552 = vmatprep.mubr.msk.bf16.mxu1 %vm2586_vm0, %v3468_v60 }
 0x2ac   :  { %v2430_v63 = vpop.f32.mrb[98].mxu0  ;;  %v7021_v62 = vld [vmem:[%s9103_s4 + $0xf0] sm:$0xff]  }
 0x2ad   :  { %v2431_v0 = vadd.f32 %v8413_v31, %v2430_v63  ;;  %v2432_v1 = vpop.f32.mrb[99].mxu0  ;;  %v2538_v2 = vmax.f32 %v2428_v61, 0.0 }
 0x2af   :  { %v2539_v3 = vmax.f32 %v2431_v0, 0.0 }
 0x2b1   :  { %v2578_v4 = vpack.c.bf16 %v2539_v3, %v2538_v2 }
 0x2b2   :  { %v2435_v6 = vpop.f32.mrb[100].mxu0  ;;  %v3469_v7 = vld [vmem:[#allocation2 + $0xb8] sm:$0xff] }
 0x2b3   :  { %2611 = vst.msk [vmem:[#allocation2 + $0xc0] sm:$0xff] %vm2586_vm0, %v2578_v4  ;;  %v2436_v8 = vadd.f32 %v8413_v31, %v2435_v6  ;;  %v2437_v10 = vpop.f32.mrb[101].mxu0  ;;  %6553 = vmatmul.mubr.msk.bf16.vlgmr.msra.gmra.mrb[0].mxu1 %vm2586_vm0, %v3469_v7 }
 0x2b4   :  { %v2438_v11 = vpop.f32.mrb[102].mxu0  ;;  %6557 = vmatpush3.bf16.msra.mxu1 %v7015_v55 }
 0x2b5   :  { %v2439_v12 = vadd.f32 %v8413_v31, %v2438_v11  ;;  %v2440_v13 = vpop.f32.mrb[103].mxu0  ;;  %6558 = vmatprep.subr.bf16.mxu1 %v7016_v5  ;;  %v2540_v15 = vmax.f32 %v2436_v8, 0.0 }
 0x2b6   :  { %v7022_v13 = vld [vmem:[%s9103_s4 + $0xf8] sm:$0xff]  }
 0x2b7   :  { %v2541_v16 = vmax.f32 %v2439_v12, 0.0 }
 0x2b8   :  { %6559 = vmatpush3.bf16.msra.mxu1 %v7016_v5 }
 0x2b9   :  { %v2579_v17 = vpack.c.bf16 %v2541_v16, %v2540_v15  ;;  %6564 = vmatprep.subr.bf16.mxu1 %v7017_v14 }
 0x2ba   :  { %v2443_v18 = vpop.f32.mrb[104].mxu0  ;;  %v3546_v19 = vld [vmem:[#allocation2 + $0xc0] sm:$0xff] }
 0x2bb   :  { %2612 = vst.msk [vmem:[#allocation2 + $0xc8] sm:$0xff] %vm2586_vm0, %v2579_v17  ;;  %v2444_v21 = vadd.f32 %v8413_v31, %v2443_v18  ;;  %v2445_v22 = vpop.f32.mrb[105].mxu0  ;;  %6560 = vmatprep.mubr.msk.bf16.mxu1 %vm2586_vm0, %v3546_v19 }
 0x2bc   :  { %v2446_v23 = vpop.f32.mrb[106].mxu0 }
 0x2bd   :  { %v2447_v24 = vadd.f32 %v8413_v31, %v2446_v23  ;;  %v2448_v25 = vpop.f32.mrb[107].mxu0  ;;  %v2542_v26 = vmax.f32 %v2444_v21, 0.0 }
 0x2bf   :  { %v2543_v27 = vmax.f32 %v2447_v24, 0.0 }
 0x2c1   :  { %v2580_v28 = vpack.c.bf16 %v2543_v27, %v2542_v26  ;;  %v8676_v26 = vld [vmem:[%s9105_s6 + $0x20] sm:$0xff]  }
 0x2c2   :  { %v2451_v30 = vpop.f32.mrb[108].mxu0  ;;  %v3547_v32 = vld [vmem:[#allocation2 + $0xc8] sm:$0xff] }
 0x2c3   :  { %2613 = vst.msk [vmem:[#allocation2 + $0xd0] sm:$0xff] %vm2586_vm0, %v2580_v28  ;;  %v2452_v33 = vadd.f32 %v8413_v31, %v2451_v30  ;;  %v2453_v34 = vpop.f32.mrb[109].mxu0  ;;  %6561 = vmatmul.mubr.msk.bf16.vlgmr.msra.gmra.mrb[0].mxu1 %vm2586_vm0, %v3547_v32  ;;  %v8691_v28 = vld [vmem:[%s9105_s6 + $0xb0] sm:$0xff]   ;;  %v8705_v30 = vld [vmem:[%s9105_s6 + $0xb8] sm:$0xff]  }
 0x2c4   :  { %v2454_v35 = vpop.f32.mrb[110].mxu0  ;;  %6565 = vmatpush3.bf16.msra.mxu1 %v7017_v14  ;;  %6725 = vmatpush3.bf16.msra.mxu0 %v8691_v28  ;;  %v8710_v32 = vld [vmem:[%s9105_s6 + $0x38] sm:$0xff]  }
 0x2c5   :  { %v2455_v36 = vadd.f32 %v8413_v31, %v2454_v35  ;;  %v2456_v37 = vpop.f32.mrb[111].mxu0  ;;  %6566 = vmatprep.subr.bf16.mxu1 %v7018_v29  ;;  %v2544_v39 = vmax.f32 %v2452_v33, 0.0  ;;  %6726 = vmatprep.subr.bf16.mxu0 %v7070_v44  ;;  %v6167_v33 = vld [vmem:[%s9104_s5] ss:$0 sm:$0xff] }
 0x2c7   :  { %v2545_v40 = vmax.f32 %v2455_v36, 0.0 }
 0x2c8   :  { %6567 = vmatpush3.bf16.msra.mxu1 %v7018_v29  ;;  %v8696_v29 = vld [vmem:[%s9105_s6 + $0x30] sm:$0xff]   ;;  %6727 = vmatpush3.bf16.msra.mxu0 %v8705_v30 }
 0x2c9   :  { %v2581_v41 = vpack.c.bf16 %v2545_v40, %v2544_v39  ;;  %6572 = vmatprep.subr.bf16.mxu1 %v7019_v38  ;;  %6744 = vmatprep.subr.bf16.mxu0 %v7070_v44 }
 0x2ca   :  { %v2459_v9 = vpop.f32.mrb[112].mxu0  ;;  %v3624_v43 = vld [vmem:[#allocation2 + $0xd0] sm:$0xff] }
 0x2cb   :  { %2614 = vst.msk [vmem:[#allocation2 + $0xd8] sm:$0xff] %vm2586_vm0, %v2581_v41  ;;  %v2460_v45 = vadd.f32 %v8413_v31, %v2459_v9  ;;  %v2461_v46 = vpop.f32.mrb[113].mxu0  ;;  %6568 = vmatprep.mubr.msk.bf16.mxu1 %vm2586_vm0, %v3624_v43 }
 0x2cc   :  { %v2462_v47 = vpop.f32.mrb[114].mxu0 }
 0x2cd   :  { %v2463_v49 = vadd.f32 %v8413_v31, %v2462_v47  ;;  %v2464_v50 = vpop.f32.mrb[115].mxu0  ;;  %v2546_v51 = vmax.f32 %v2460_v45, 0.0 }
 0x2ce   :  { %v8730_v50 = vld [vmem:[%s9105_s6 + $0xc0] sm:$0xff]  }
 0x2cf   :  { %v2547_v52 = vmax.f32 %v2463_v49, 0.0 }
 0x2d1   :  { %v2582_v53 = vpack.c.bf16 %v2547_v52, %v2546_v51  ;;  %v7032_v52 = vld [vmem:[%s9105_s6] sm:$0xff]  }
 0x2d2   :  { %v2467_v55 = vpop.f32.mrb[116].mxu0  ;;  %v3625_v56 = vld [vmem:[#allocation2 + $0xd8] sm:$0xff] }
 0x2d3   :  { %2615 = vst.msk [vmem:[#allocation2 + $0xe0] sm:$0xff] %vm2586_vm0, %v2582_v53  ;;  %v2468_v57 = vadd.f32 %v8413_v31, %v2467_v55  ;;  %v2469_v58 = vpop.f32.mrb[117].mxu0  ;;  %6569 = vmatmul.mubr.msk.bf16.vlgmr.msra.gmra.mrb[0].mxu1 %vm2586_vm0, %v3625_v56  ;;  %v7034_v55 = vld [vmem:[%s9105_s6 + $0x8] sm:$0xff]   ;;  %v8760_v56 = vld [vmem:[%s9105_s6 + $0xd0] sm:$0xff]  }
 0x2d4   :  { %v2470_v59 = vpop.f32.mrb[118].mxu0  ;;  %6573 = vmatpush3.bf16.msra.mxu1 %v7019_v38  ;;  %v8771_v58 = vld [vmem:[%s9105_s6 + $0xd8] sm:$0xff]  }
 0x2d5   :  { %v2471_v60 = vadd.f32 %v8413_v31, %v2470_v59  ;;  %v2472_v61 = vpop.f32.mrb[119].mxu0  ;;  %6574 = vmatprep.subr.bf16.mxu1 %v7020_v54  ;;  %v2548_v63 = vmax.f32 %v2468_v57, 0.0  ;;  %v7036_v57 = vld [vmem:[%s9105_s6 + $0x10] sm:$0xff]   ;;  %v7038_v59 = vld [vmem:[%s9105_s6 + $0x18] sm:$0xff]  }
 0x2d7   :  { %v2549_v0 = vmax.f32 %v2471_v60, 0.0  ;;  %v8782_v60 = vld [vmem:[%s9105_s6 + $0xe0] sm:$0xff]  }
 0x2d8   :  { %6575 = vmatpush3.bf16.msra.mxu1 %v7020_v54  ;;  %v8745_v54 = vld [vmem:[%s9105_s6 + $0xc8] sm:$0xff]  }
 0x2d9   :  { %v2583_v1 = vpack.c.bf16 %v2549_v0, %v2548_v63  ;;  %6580 = vmatprep.subr.bf16.mxu1 %v7021_v62  ;;  %v8807_v63 = vld [vmem:[%s9105_s6 + $0xf0] sm:$0xff]   ;;  %v8816_v0 = vld [vmem:[%s9105_s6 + $0xf8] sm:$0xff]  }
 0x2da   :  { %v2475_v2 = vpop.f32.mrb[120].mxu0  ;;  %v3702_v3 = vld [vmem:[#allocation2 + $0xe0] sm:$0xff] }
 0x2db   :  { %2616 = vst.msk [vmem:[#allocation2 + $0xe8] sm:$0xff] %vm2586_vm0, %v2583_v1  ;;  %v2476_v4 = vadd.f32 %v8413_v31, %v2475_v2  ;;  %v2477_v5 = vpop.f32.mrb[121].mxu0  ;;  %6576 = vmatprep.mubr.msk.bf16.mxu1 %vm2586_vm0, %v3702_v3  ;;  %v8825_v1 = vld [vmem:[%s9105_s6 + $0x100] sm:$0xff]  }
 0x2dc   :  { %v2478_v6 = vpop.f32.mrb[122].mxu0  ;;  %v8852_v5 = vld [vmem:[%s9105_s6 + $0x110] sm:$0xff]  }
 0x2dd   :  { %v2479_v7 = vadd.f32 %v8413_v31, %v2478_v6  ;;  %v2480_v8 = vpop.f32.mrb[123].mxu0  ;;  %v2550_v10 = vmax.f32 %v2476_v4, 0.0  ;;  %v8840_v4 = vld [vmem:[%s9105_s6 + $0x108] sm:$0xff]   ;;  %v8860_v6 = vld [vmem:[%s9105_s6 + $0x118] sm:$0xff]  }
 0x2de   :  { %v7047_v8 = vld [vmem:[%s9105_s6 + $0x40] sm:$0xff]  }
 0x2df   :  { %v2551_v11 = vmax.f32 %v2479_v7, 0.0 }
 0x2e1   :  { %v2584_v12 = vpack.c.bf16 %v2551_v11, %v2550_v10  ;;  %v7048_v11 = vld [vmem:[%s9105_s6 + $0x48] sm:$0xff]  }
 0x2e2   :  { %v2483_v14 = vpop.f32.mrb[124].mxu0  ;;  %v3703_v15 = vld [vmem:[#allocation2 + $0xe8] sm:$0xff] }
 0x2e3   :  { %2617 = vst.msk [vmem:[#allocation2 + $0xf0] sm:$0xff] %vm2586_vm0, %v2584_v12  ;;  %v2484_v16 = vadd.f32 %v8413_v31, %v2483_v14  ;;  %v2485_v17 = vpop.f32.mrb[125].mxu0  ;;  %6577 = vmatmul.mubr.msk.bf16.vlgmr.msra.gmra.mrb[0].mxu1 %vm2586_vm0, %v3703_v15  ;;  %v7049_v12 = vld [vmem:[%s9105_s6 + $0x50] sm:$0xff]   ;;  %v7051_v15 = vld [vmem:[%s9105_s6 + $0x60] sm:$0xff]  }
 0x2e4   :  { %v2486_v18 = vpop.f32.mrb[126].mxu0  ;;  %6581 = vmatpush3.bf16.msra.mxu1 %v7021_v62  ;;  %v8794_v62 = vld [vmem:[%s9105_s6 + $0xe8] sm:$0xff]  }
 0x2e5   :  { %v2487_v19 = vadd.f32 %v8413_v31, %v2486_v18  ;;  %v2488_v21 = vpop.f32.mrb[127].mxu0  ;;  %6582 = vmatprep.subr.bf16.mxu1 %v7022_v13  ;;  %v2552_v22 = vmax.f32 %v2484_v16, 0.0  ;;  %v8684_v31 = vld [vmem:[%s9105_s6 + $0x28] sm:$0xff]   ;;  %v7053_v18 = vld [vmem:[%s9105_s6 + $0x70] sm:$0xff]  }
 0x2e6   :  { %v7052_v17 = vld [vmem:[%s9105_s6 + $0x68] sm:$0xff]   ;;  %v7055_v21 = vld [vmem:[%s9105_s6 + $0x80] sm:$0xff]  }
 0x2e7   :  { %v2553_v23 = vmax.f32 %v2487_v19, 0.0  ;;  %v7054_v19 = vld [vmem:[%s9105_s6 + $0x78] sm:$0xff]  }
 0x2e8   :  { %6583 = vmatpush3.bf16.msra.mxu1 %v7022_v13  ;;  %v7050_v13 = vld [vmem:[%s9105_s6 + $0x58] sm:$0xff]  }
 0x2e9   :  { %v2585_v24 = vpack.c.bf16 %v2553_v23, %v2552_v22  ;;  %6588 = vmatprep.subr.bf16.mxu1 %v7070_v44  ;;  %v7056_v22 = vld [vmem:[%s9105_s6 + $0x88] sm:$0xff]   ;;  %v7057_v23 = vld [vmem:[%s9105_s6 + $0x90] sm:$0xff]  }
 0x2ea   :  { %v3780_v25 = vld [vmem:[#allocation2 + $0xf0] sm:$0xff] }
 0x2eb   :  { %2618 = vst.msk [vmem:[#allocation2 + $0xf8] sm:$0xff] %vm2586_vm0, %v2585_v24  ;;  %6584 = vmatprep.mubr.msk.bf16.mxu1 %vm2586_vm0, %v3780_v25  ;;  %v7058_v24 = vld [vmem:[%s9105_s6 + $0x98] sm:$0xff]  }
 0x2f2   :  { %v3781_v27 = vld [vmem:[#allocation2 + $0xf8] sm:$0xff] }
 0x2f3   :  { %6585 = vmatmul.mubr.msk.bf16.vlgmr.msra.gmra.mrb[0].mxu1 %vm2586_vm0, %v3781_v27 }
 0x2f4   :  { %6589 = vmatpush3.bf16.msra.mxu1 %v8676_v26  ;;  %6596 = vmatprep.mubr.msk.bf16.mxu1 %vm7071_vm1, %v7070_v44 }
 0x2f5   :  { %6590 = vmatprep.subr.bf16.mxu1 %v7070_v44 }
 0x2f8   :  { %6591 = vmatpush3.bf16.msra.mxu1 %v8684_v31 }
 0x2f9   :  { %6592 = vmatprep.subr.bf16.mxu1 %v7070_v44 }
 0x2fc   :  { %6593 = vmatpush3.bf16.msra.mxu1 %v8696_v29 }
 0x2fd   :  { %6594 = vmatprep.subr.bf16.mxu1 %v7070_v44 }
 0x300   :  { %6595 = vmatpush3.bf16.msra.mxu1 %v8710_v32 }
 0x301   :  { %6600 = vmatprep.subr.bf16.mxu1 %v7070_v44 }
 0x3c6   :  { %v6586_v34 = vpop.f32.mrb[0].mxu1 }
 0x3c7   :  { %v3867_v35 = vadd.f32 %v6586_v34, %v6167_v33  ;;  %v3839_v36 = vpop.f32.mrb[1].mxu1 }
 0x3c8   :  { %v3865_v37 = vadd.f32 %v6167_v33, %v3839_v36  ;;  %v6587_v38 = vpop.f32.mrb[2].mxu1 }
 0x3c9   :  { %v3868_v39 = vadd.f32 %v6587_v38, %v6167_v33  ;;  %v3842_v40 = vpop.f32.mrb[3].mxu1  ;;  %v3871_v9 = vmax.f32 %v3867_v35, 0.0 }
 0x3ca   :  { %v3866_v41 = vadd.f32 %v6167_v33, %v3842_v40  ;;  %v3869_v45 = vmax.f32 %v3865_v37, 0.0 }
 0x3cb   :  { %v3872_v43 = vmax.f32 %v3868_v39, 0.0 }
 0x3cc   :  { %v3870_v46 = vmax.f32 %v3866_v41, 0.0 }
 0x3cd   :  { %v8723_v47 = vpack.c.bf16 %v3872_v43, %v3871_v9 }
 0x3ce   :  { %v8725_v49 = vpack.c.bf16 %v3870_v46, %v3869_v45 }
 0x3cf   :  { %v4552_v51 = vrot.slane %v8723_v47, 2  ;;  %v4671_v61 = vrot.slane %v8723_v47, 4  ;;  %v4790_v2 = vrot.slane %v8723_v47, 5  ;;  %v4909_v7 = vrot.slane %v8723_v47, 6 }
 0x3d0   :  { %v3893_v53 = vrot.slane %v8725_v49, 1  ;;  %v4029_v3 = vrot.slane %v8725_v49, 5  ;;  %v4073_v10 = vrot.slane %v8725_v49, 4  ;;  %v4126_v14 = vrot.slane %v8725_v49, 2 }
 0x3d1   :  { %6729 = vmatmul.mubr.msk.bf16.vlgmr.msra.gmra.mrb[128].mxu0 %vm3918_vm2, %v4552_v51  ;;  %v4195_v16 = vrot.slane %v8725_v49, 6  ;;  %v4433_v25 = vrot.slane %v8723_v47, 1 }
 0x3d2   :  { %6745 = vmatpush3.bf16.msra.mxu0 %v8730_v50  ;;  %6597 = vmatmul.mubr.msk.bf16.vlgmr.msra.gmra.mrb[4].mxu1 %vm3918_vm2, %v3893_v53 }
 0x3d3   :  { %6601 = vmatpush3.bf16.msra.mxu1 %v7032_v52  ;;  %6746 = vmatprep.subr.bf16.mxu0 %v7070_v44 }
 0x3d4   :  { %6602 = vmatprep.subr.bf16.mxu1 %v7070_v44  ;;  %6752 = vmatprep.mubr.msk.bf16.mxu0 %vm7071_vm1, %v7070_v44 }
 0x3d5   :  { %6608 = vmatprep.mubr.msk.bf16.mxu1 %vm7071_vm1, %v7070_v44 }
 0x3d6   :  { %6747 = vmatpush3.bf16.msra.mxu0 %v8745_v54 }
 0x3d7   :  { %6603 = vmatpush3.bf16.msra.mxu1 %v7034_v55  ;;  %6748 = vmatprep.subr.bf16.mxu0 %v7070_v44 }
 0x3d8   :  { %6604 = vmatprep.subr.bf16.mxu1 %v7070_v44 }
 0x3da   :  { %6749 = vmatpush3.bf16.msra.mxu0 %v8760_v56 }
 0x3db   :  { %6605 = vmatpush3.bf16.msra.mxu1 %v7036_v57  ;;  %6750 = vmatprep.subr.bf16.mxu0 %v7070_v44 }
 0x3dc   :  { %6606 = vmatprep.subr.bf16.mxu1 %v7070_v44 }
 0x3de   :  { %6751 = vmatpush3.bf16.msra.mxu0 %v8771_v58 }
 0x3df   :  { %6607 = vmatpush3.bf16.msra.mxu1 %v7038_v59  ;;  %6768 = vmatprep.subr.bf16.mxu0 %v7070_v44 }
 0x3e0   :  { %6612 = vmatprep.subr.bf16.mxu1 %v7070_v44 }
 0x3e1   :  { %6753 = vmatmul.mubr.msk.bf16.vlgmr.msra.gmra.mrb[132].mxu0 %vm3918_vm2, %v4671_v61 }
 0x3e2   :  { %6609 = vmatmul.mubr.msk.bf16.vlgmr.msra.gmra.mrb[8].mxu1 %vm3918_vm2, %v8725_v49  ;;  %6769 = vmatpush3.bf16.msra.mxu0 %v8782_v60 }
 0x3e3   :  { %6613 = vmatpush3.bf16.msra.mxu1 %v8676_v26  ;;  %6770 = vmatprep.subr.bf16.mxu0 %v7070_v44 }
 0x3e4   :  { %6614 = vmatprep.subr.bf16.mxu1 %v7070_v44  ;;  %6776 = vmatprep.mubr.msk.bf16.mxu0 %vm7071_vm1, %v7070_v44 }
 0x3e5   :  { %6620 = vmatprep.mubr.msk.bf16.mxu1 %vm7071_vm1, %v7070_v44 }
 0x3e6   :  { %6771 = vmatpush3.bf16.msra.mxu0 %v8794_v62 }
 0x3e7   :  { %6615 = vmatpush3.bf16.msra.mxu1 %v8684_v31  ;;  %6772 = vmatprep.subr.bf16.mxu0 %v7070_v44 }
 0x3e8   :  { %6616 = vmatprep.subr.bf16.mxu1 %v7070_v44 }
 0x3ea   :  { %6773 = vmatpush3.bf16.msra.mxu0 %v8807_v63 }
 0x3eb   :  { %6617 = vmatpush3.bf16.msra.mxu1 %v8696_v29  ;;  %6774 = vmatprep.subr.bf16.mxu0 %v7070_v44 }
 0x3ec   :  { %6618 = vmatprep.subr.bf16.mxu1 %v7070_v44 }
 0x3ee   :  { %6775 = vmatpush3.bf16.msra.mxu0 %v8816_v0 }
 0x3ef   :  { %6619 = vmatpush3.bf16.msra.mxu1 %v8710_v32  ;;  %6792 = vmatprep.subr.bf16.mxu0 %v7070_v44 }
 0x3f0   :  { %6624 = vmatprep.subr.bf16.mxu1 %v7070_v44 }
 0x3f1   :  { %6777 = vmatmul.mubr.msk.bf16.vlgmr.msra.gmra.mrb[136].mxu0 %vm3918_vm2, %v4790_v2 }
 0x3f2   :  { %6621 = vmatmul.mubr.msk.bf16.vlgmr.msra.gmra.mrb[12].mxu1 %vm3918_vm2, %v4029_v3  ;;  %6793 = vmatpush3.bf16.msra.mxu0 %v8825_v1 }
 0x3f3   :  { %6625 = vmatpush3.bf16.msra.mxu1 %v7032_v52  ;;  %6794 = vmatprep.subr.bf16.mxu0 %v7070_v44 }
 0x3f4   :  { %6626 = vmatprep.subr.bf16.mxu1 %v7070_v44  ;;  %6800 = vmatprep.mubr.msk.bf16.mxu0 %vm7071_vm1, %v7070_v44 }
 0x3f5   :  { %6632 = vmatprep.mubr.msk.bf16.mxu1 %vm7071_vm1, %v7070_v44 }
 0x3f6   :  { %6795 = vmatpush3.bf16.msra.mxu0 %v8840_v4 }
 0x3f7   :  { %6627 = vmatpush3.bf16.msra.mxu1 %v7034_v55  ;;  %6796 = vmatprep.subr.bf16.mxu0 %v7070_v44 }
 0x3f8   :  { %6628 = vmatprep.subr.bf16.mxu1 %v7070_v44 }
 0x3fa   :  { %6797 = vmatpush3.bf16.msra.mxu0 %v8852_v5 }
 0x3fb   :  { %6629 = vmatpush3.bf16.msra.mxu1 %v7036_v57  ;;  %6798 = vmatprep.subr.bf16.mxu0 %v7070_v44 }
 0x3fc   :  { %6630 = vmatprep.subr.bf16.mxu1 %v7070_v44 }
 0x3fe   :  { %6799 = vmatpush3.bf16.msra.mxu0 %v8860_v6 }
 0x3ff   :  { %6631 = vmatpush3.bf16.msra.mxu1 %v7038_v59 }
 0x400   :  { %6636 = vmatprep.subr.bf16.mxu1 %v7070_v44 }
 0x401   :  { %6801 = vmatmul.mubr.msk.bf16.vlgmr.msra.gmra.mrb[140].mxu0 %vm3918_vm2, %v4909_v7 }
 0x402   :  { %6633 = vmatmul.mubr.msk.bf16.vlgmr.msra.gmra.mrb[16].mxu1 %vm3918_vm2, %v4073_v10 }
 0x403   :  { %6637 = vmatpush3.bf16.msra.mxu1 %v7047_v8  ;;  %6644 = vmatprep.mubr.msk.bf16.mxu1 %vm7071_vm1, %v7070_v44 }
 0x404   :  { %6638 = vmatprep.subr.bf16.mxu1 %v7070_v44 }
 0x407   :  { %6639 = vmatpush3.bf16.msra.mxu1 %v7048_v11 }
 0x408   :  { %6640 = vmatprep.subr.bf16.mxu1 %v7070_v44 }
 0x40b   :  { %6641 = vmatpush3.bf16.msra.mxu1 %v7049_v12 }
 0x40c   :  { %6642 = vmatprep.subr.bf16.mxu1 %v7070_v44 }
 0x40f   :  { %6643 = vmatpush3.bf16.msra.mxu1 %v7050_v13 }
 0x410   :  { %6648 = vmatprep.subr.bf16.mxu1 %v7070_v44 }
 0x412   :  { %6645 = vmatmul.mubr.msk.bf16.vlgmr.msra.gmra.mrb[20].mxu1 %vm3918_vm2, %v4126_v14 }
 0x413   :  { %6649 = vmatpush3.bf16.msra.mxu1 %v7047_v8  ;;  %6656 = vmatprep.mubr.msk.bf16.mxu1 %vm7071_vm1, %v7070_v44 }
 0x414   :  { %6650 = vmatprep.subr.bf16.mxu1 %v7070_v44 }
 0x417   :  { %6651 = vmatpush3.bf16.msra.mxu1 %v7048_v11 }
 0x418   :  { %6652 = vmatprep.subr.bf16.mxu1 %v7070_v44 }
 0x41b   :  { %6653 = vmatpush3.bf16.msra.mxu1 %v7049_v12 }
 0x41c   :  { %6654 = vmatprep.subr.bf16.mxu1 %v7070_v44 }
 0x41f   :  { %6655 = vmatpush3.bf16.msra.mxu1 %v7050_v13 }
 0x420   :  { %6660 = vmatprep.subr.bf16.mxu1 %v7070_v44 }
 0x422   :  { %6657 = vmatmul.mubr.msk.bf16.vlgmr.msra.gmra.mrb[24].mxu1 %vm3918_vm2, %v4195_v16 }
 0x423   :  { %6661 = vmatpush3.bf16.msra.mxu1 %v7051_v15  ;;  %6668 = vmatprep.mubr.msk.bf16.mxu1 %vm7071_vm1, %v7070_v44 }
 0x424   :  { %6662 = vmatprep.subr.bf16.mxu1 %v7070_v44 }
 0x427   :  { %6663 = vmatpush3.bf16.msra.mxu1 %v7052_v17 }
 0x428   :  { %6664 = vmatprep.subr.bf16.mxu1 %v7070_v44 }
 0x42b   :  { %6665 = vmatpush3.bf16.msra.mxu1 %v7053_v18 }
 0x42c   :  { %6666 = vmatprep.subr.bf16.mxu1 %v7070_v44 }
 0x42f   :  { %6667 = vmatpush3.bf16.msra.mxu1 %v7054_v19 }
 0x430   :  { %6672 = vmatprep.subr.bf16.mxu1 %v7070_v44 }
 0x432   :  { %6669 = vmatmul.mubr.msk.bf16.vlgmr.msra.gmra.mrb[28].mxu1 %vm3918_vm2, %v4073_v10 }
 0x433   :  { %6673 = vmatpush3.bf16.msra.mxu1 %v7051_v15  ;;  %6680 = vmatprep.mubr.msk.bf16.mxu1 %vm7071_vm1, %v7070_v44 }
 0x434   :  { %6674 = vmatprep.subr.bf16.mxu1 %v7070_v44 }
 0x437   :  { %6675 = vmatpush3.bf16.msra.mxu1 %v7052_v17 }
 0x438   :  { %6676 = vmatprep.subr.bf16.mxu1 %v7070_v44 }
 0x43b   :  { %6677 = vmatpush3.bf16.msra.mxu1 %v7053_v18 }
 0x43c   :  { %6678 = vmatprep.subr.bf16.mxu1 %v7070_v44 }
 0x43f   :  { %6679 = vmatpush3.bf16.msra.mxu1 %v7054_v19 }
 0x440   :  { %6684 = vmatprep.subr.bf16.mxu1 %v7070_v44 }
 0x442   :  { %6681 = vmatmul.mubr.msk.bf16.vlgmr.msra.gmra.mrb[32].mxu1 %vm3918_vm2, %v8723_v47 }
 0x443   :  { %6685 = vmatpush3.bf16.msra.mxu1 %v7055_v21  ;;  %6692 = vmatprep.mubr.msk.bf16.mxu1 %vm7071_vm1, %v7070_v44 }
 0x444   :  { %6686 = vmatprep.subr.bf16.mxu1 %v7070_v44 }
 0x447   :  { %6687 = vmatpush3.bf16.msra.mxu1 %v7056_v22 }
 0x448   :  { %6688 = vmatprep.subr.bf16.mxu1 %v7070_v44 }
 0x44b   :  { %6689 = vmatpush3.bf16.msra.mxu1 %v7057_v23 }
 0x44c   :  { %6690 = vmatprep.subr.bf16.mxu1 %v7070_v44 }
 0x44f   :  { %6691 = vmatpush3.bf16.msra.mxu1 %v7058_v24 }
 0x450   :  { %6696 = vmatprep.subr.bf16.mxu1 %v7070_v44 }
 0x452   :  { %6693 = vmatmul.mubr.msk.bf16.vlgmr.msra.gmra.mrb[36].mxu1 %vm3918_vm2, %v4029_v3 }
 0x453   :  { %6697 = vmatpush3.bf16.msra.mxu1 %v7055_v21  ;;  %6704 = vmatprep.mubr.msk.bf16.mxu1 %vm7071_vm1, %v7070_v44 }
 0x454   :  { %6698 = vmatprep.subr.bf16.mxu1 %v7070_v44 }
 0x457   :  { %6699 = vmatpush3.bf16.msra.mxu1 %v7056_v22 }
 0x458   :  { %6700 = vmatprep.subr.bf16.mxu1 %v7070_v44 }
 0x45b   :  { %6701 = vmatpush3.bf16.msra.mxu1 %v7057_v23 }
 0x45c   :  { %6702 = vmatprep.subr.bf16.mxu1 %v7070_v44 }
 0x45f   :  { %6703 = vmatpush3.bf16.msra.mxu1 %v7058_v24 }
 0x460   :  { %6708 = vmatprep.subr.bf16.mxu1 %v7070_v44 }
 0x462   :  { %6705 = vmatmul.mubr.msk.bf16.vlgmr.msra.gmra.mrb[40].mxu1 %vm3918_vm2, %v4433_v25 }
 0x463   :  { %6709 = vmatpush3.bf16.msra.mxu1 %v8559_v42  ;;  %6716 = vmatprep.mubr.msk.bf16.mxu1 %vm7071_vm1, %v7070_v44 }
 0x464   :  { %6710 = vmatprep.subr.bf16.mxu1 %v7070_v44 }
 0x467   :  { %6711 = vmatpush3.bf16.msra.mxu1 %v8570_v48 }
 0x468   :  { %6712 = vmatprep.subr.bf16.mxu1 %v7070_v44 }
 0x46b   :  { %6713 = vmatpush3.bf16.msra.mxu1 %v8691_v28 }
 0x46c   :  { %6714 = vmatprep.subr.bf16.mxu1 %v7070_v44 }
 0x46f   :  { %6715 = vmatpush3.bf16.msra.mxu1 %v8705_v30 }
 0x470   :  { %6732 = vmatprep.subr.bf16.mxu1 %v7070_v44 }
 0x472   :  { %6717 = vmatmul.mubr.msk.bf16.vlgmr.msra.gmra.mrb[44].mxu1 %vm3918_vm2, %v4195_v16 }
 0x473   :  { %6733 = vmatpush3.bf16.msra.mxu1 %v8730_v50  ;;  %6740 = vmatprep.mubr.msk.bf16.mxu1 %vm7071_vm1, %v7070_v44 }
 0x474   :  { %6734 = vmatprep.subr.bf16.mxu1 %v7070_v44 }
 0x477   :  { %6735 = vmatpush3.bf16.msra.mxu1 %v8745_v54 }
 0x478   :  { %6736 = vmatprep.subr.bf16.mxu1 %v7070_v44 }
 0x47b   :  { %6737 = vmatpush3.bf16.msra.mxu1 %v8760_v56 }
 0x47c   :  { %6738 = vmatprep.subr.bf16.mxu1 %v7070_v44 }
 0x47f   :  { %6739 = vmatpush3.bf16.msra.mxu1 %v8771_v58 }
 0x480   :  { %6756 = vmatprep.subr.bf16.mxu1 %v7070_v44 }
 0x482   :  { %6741 = vmatmul.mubr.msk.bf16.vlgmr.msra.gmra.mrb[48].mxu1 %vm3918_vm2, %v8723_v47 }
 0x483   :  { %6757 = vmatpush3.bf16.msra.mxu1 %v8782_v60  ;;  %6764 = vmatprep.mubr.msk.bf16.mxu1 %vm7071_vm1, %v7070_v44 }
 0x484   :  { %6758 = vmatprep.subr.bf16.mxu1 %v7070_v44 }
 0x487   :  { %6759 = vmatpush3.bf16.msra.mxu1 %v8794_v62 }
 0x488   :  { %6760 = vmatprep.subr.bf16.mxu1 %v7070_v44 }
 0x48b   :  { %6761 = vmatpush3.bf16.msra.mxu1 %v8807_v63 }
 0x48c   :  { %6762 = vmatprep.subr.bf16.mxu1 %v7070_v44 }
 0x48f   :  { %6763 = vmatpush3.bf16.msra.mxu1 %v8816_v0 }
 0x490   :  { %6780 = vmatprep.subr.bf16.mxu1 %v7070_v44 }
 0x492   :  { %6765 = vmatmul.mubr.msk.bf16.vlgmr.msra.gmra.mrb[52].mxu1 %vm3918_vm2, %v4433_v25 }
 0x493   :  { %6781 = vmatpush3.bf16.msra.mxu1 %v8825_v1  ;;  %6788 = vmatprep.mubr.msk.bf16.mxu1 %vm7071_vm1, %v7070_v44 }
 0x494   :  { %6782 = vmatprep.subr.bf16.mxu1 %v7070_v44 }
 0x497   :  { %6783 = vmatpush3.bf16.msra.mxu1 %v8840_v4 }
 0x498   :  { %6784 = vmatprep.subr.bf16.mxu1 %v7070_v44 }
 0x49b   :  { %6785 = vmatpush3.bf16.msra.mxu1 %v8852_v5 }
 0x49c   :  { %6786 = vmatprep.subr.bf16.mxu1 %v7070_v44 }
 0x49f   :  { %6787 = vmatpush3.bf16.msra.mxu1 %v8860_v6 }
 0x4a2   :  { %6789 = vmatmul.mubr.msk.bf16.vlgmr.msra.gmra.mrb[56].mxu1 %vm3918_vm2, %v4552_v51 }
 0x4a4   :  { %v9000_v42 = vpop.f32.mrb[128].mxu0 }
 0x4a5   :  { %v3956_v48 = vpop.f32.mrb[4].mxu1  ;;  %v6730_v26 = vpop.f32.mrb[129].mxu0 }
 0x4a6   :  { %v6598_v27 = vpop.f32.mrb[5].mxu1  ;;  %v4593_v31 = vpop.f32.mrb[130].mxu0 }
 0x4a7   :  { %v3959_v28 = vpop.f32.mrb[6].mxu1  ;;  %v6731_v29 = vpop.f32.mrb[131].mxu0 }
 0x4a8   :  { %v6599_v30 = vpop.f32.mrb[7].mxu1  ;;  %v6286_v28 = vld [vmem:[%s9106_s7] ss:$0 sm:$0xff] }
 0x4b4   :  { %v4709_v32 = vpop.f32.mrb[132].mxu0 }
 0x4b5   :  { %v4023_v33 = vpop.f32.mrb[8].mxu1  ;;  %v6754_v34 = vpop.f32.mrb[133].mxu0 }
 0x4b6   :  { %v4024_v35 = vadd.f32 %v4023_v33, %v3956_v48  ;;  %v6610_v44 = vpop.f32.mrb[9].mxu1  ;;  %v4712_v36 = vpop.f32.mrb[134].mxu0 }
 0x4b7   :  { %v4026_v37 = vpop.f32.mrb[10].mxu1  ;;  %v6755_v38 = vpop.f32.mrb[135].mxu0 }
 0x4b8   :  { %v6611_v39 = vpop.f32.mrb[11].mxu1 }
 0x4c4   :  { %v4828_v40 = vpop.f32.mrb[136].mxu0 }
 0x4c5   :  { %v4067_v41 = vpop.f32.mrb[12].mxu1  ;;  %v6778_v9 = vpop.f32.mrb[137].mxu0 }
 0x4c6   :  { %v6622_v43 = vpop.f32.mrb[13].mxu1  ;;  %v4831_v45 = vpop.f32.mrb[138].mxu0 }
 0x4c7   :  { %v4070_v46 = vpop.f32.mrb[14].mxu1  ;;  %v6779_v47 = vpop.f32.mrb[139].mxu0 }
 0x4c8   :  { %v6623_v49 = vpop.f32.mrb[15].mxu1 }
 0x4d4   :  { %v4947_v50 = vpop.f32.mrb[140].mxu0 }
 0x4d5   :  { %v4111_v51 = vpop.f32.mrb[16].mxu1  ;;  %v6802_v52 = vpop.f32.mrb[141].mxu0 }
 0x4d6   :  { %v4112_v53 = vadd.f32 %v4111_v51, %v4067_v41  ;;  %v6634_v54 = vpop.f32.mrb[17].mxu1  ;;  %v4950_v55 = vpop.f32.mrb[142].mxu0 }
 0x4d7   :  { %v4114_v56 = vpop.f32.mrb[18].mxu1  ;;  %v6803_v57 = vpop.f32.mrb[143].mxu0 }
 0x4d8   :  { %v6635_v58 = vpop.f32.mrb[19].mxu1 }
 0x4e5   :  { %v4188_v59 = vpop.f32.mrb[20].mxu1 }
 0x4e6   :  { %v4194_v60 = vadd.f32 %v4188_v59, %v4024_v35  ;;  %v6646_v61 = vpop.f32.mrb[21].mxu1 }
 0x4e7   :  { %v4191_v62 = vpop.f32.mrb[22].mxu1 }
 0x4e8   :  { %v6647_v63 = vpop.f32.mrb[23].mxu1 }
 0x4f5   :  { %v4233_v0 = vpop.f32.mrb[24].mxu1 }
 0x4f6   :  { %v4239_v1 = vadd.f32 %v4233_v0, %v4112_v53  ;;  %v6658_v2 = vpop.f32.mrb[25].mxu1 }
 0x4f7   :  { %v4236_v3 = vpop.f32.mrb[26].mxu1 }
 0x4f8   :  { %v6659_v4 = vpop.f32.mrb[27].mxu1 }
 0x505   :  { %v4307_v5 = vpop.f32.mrb[28].mxu1 }
 0x506   :  { %v4313_v6 = vadd.f32 %v4307_v5, %v4194_v60  ;;  %v6670_v7 = vpop.f32.mrb[29].mxu1 }
 0x507   :  { %v4310_v8 = vpop.f32.mrb[30].mxu1 }
 0x508   :  { %v6671_v10 = vpop.f32.mrb[31].mxu1 }
 0x515   :  { %v4351_v11 = vpop.f32.mrb[32].mxu1 }
 0x516   :  { %v4357_v12 = vadd.f32 %v4351_v11, %v4239_v1  ;;  %v6682_v13 = vpop.f32.mrb[33].mxu1 }
 0x517   :  { %v4354_v14 = vpop.f32.mrb[34].mxu1 }
 0x518   :  { %v6683_v15 = vpop.f32.mrb[35].mxu1 }
 0x525   :  { %v4425_v16 = vpop.f32.mrb[36].mxu1 }
 0x526   :  { %v4431_v17 = vadd.f32 %v4425_v16, %v4313_v6  ;;  %v6694_v18 = vpop.f32.mrb[37].mxu1 }
 0x527   :  { %v4428_v19 = vpop.f32.mrb[38].mxu1 }
 0x528   :  { %v6695_v21 = vpop.f32.mrb[39].mxu1 }
 0x535   :  { %v4471_v22 = vpop.f32.mrb[40].mxu1 }
 0x536   :  { %v4477_v23 = vadd.f32 %v4471_v22, %v4357_v12  ;;  %v6706_v24 = vpop.f32.mrb[41].mxu1 }
 0x537   :  { %v4474_v25 = vpop.f32.mrb[42].mxu1 }
 0x538   :  { %v4596_v48 = vadd.f32 %v9000_v42, %v4477_v23  ;;  %v6707_v26 = vpop.f32.mrb[43].mxu1 }
 0x53a   :  { %v4715_v27 = vadd.f32 %v4709_v32, %v4596_v48 }
 0x53c   :  { %v4834_v31 = vadd.f32 %v4828_v40, %v4715_v27 }
 0x53e   :  { %v4953_v29 = vadd.f32 %v4947_v50, %v4834_v31 }
 0x540   :  { %v4964_v30 = vadd.f32 %v6286_v28, %v4953_v29 }
 0x542   :  { %v4965_v33 = vmax.f32 %v4964_v30, 0.0 }
 0x544   :  { %v9006_v34 = vpack.c.bf16 %v4965_v33, %v4965_v33 }
 0x545   :  { %v4545_v35 = vpop.f32.mrb[44].mxu1 }
 0x546   :  { %v4551_v44 = vadd.f32 %v4545_v35, %v4431_v17  ;;  %v6718_v36 = vpop.f32.mrb[45].mxu1 }
 0x547   :  { %v4548_v37 = vpop.f32.mrb[46].mxu1 }
 0x548   :  { %v6719_v38 = vpop.f32.mrb[47].mxu1 }
 0x555   :  { %v4664_v39 = vpop.f32.mrb[48].mxu1 }
 0x556   :  { %v4670_v41 = vadd.f32 %v4664_v39, %v4551_v44  ;;  %v6742_v42 = vpop.f32.mrb[49].mxu1 }
 0x557   :  { %v4667_v9 = vpop.f32.mrb[50].mxu1 }
 0x558   :  { %v6743_v32 = vpop.f32.mrb[51].mxu1 }
 0x565   :  { %v4783_v40 = vpop.f32.mrb[52].mxu1 }
 0x566   :  { %v4789_v43 = vadd.f32 %v4783_v40, %v4670_v41  ;;  %v6766_v45 = vpop.f32.mrb[53].mxu1 }
 0x567   :  { %v4786_v46 = vpop.f32.mrb[54].mxu1 }
 0x568   :  { %v6767_v47 = vpop.f32.mrb[55].mxu1 }
 0x575   :  { %v4902_v49 = vpop.f32.mrb[56].mxu1 }
 0x576   :  { %v4908_v50 = vadd.f32 %v4902_v49, %v4789_v43  ;;  %v6790_v51 = vpop.f32.mrb[57].mxu1 }
 0x577   :  { %v4905_v52 = vpop.f32.mrb[58].mxu1 }
 0x578   :  { %v4961_v53 = vadd.f32 %v6286_v28, %v4908_v50  ;;  %v6791_v54 = vpop.f32.mrb[59].mxu1 }
 0x57a   :  { %v4962_v55 = vmax.f32 %v4961_v53, 0.0 }
 0x57c   :  { %v9008_v56 = vpack.c.bf16 %v4962_v55, %v4962_v55 }
 0x57d   :  { %7065 = dma.done.wait [#allocation5], 8192 }
 0x57e   :  { %7066 = vsyncadd [#allocation5], 4294959104  ;;  %5028 = vmatprep.mubr.bf16.mxu1 %v7069_v20  ;;  %5069 = vmatprep.mubr.bf16.mxu0 %v7069_v20  ;;  %v4978_v57 = vld [vmem:[#allocation3 + $0x8] sm:$0xff]  ;;  %v4980_v58 = vld [vmem:[#allocation3 + $0x18] sm:$0xff]  ;;  %vm5098_vm3 = vcmask 1045504   ;;  %vm5094_vm4 = vcmask 97280  }
 0x57f   :  { %v4977_v59 = vld [vmem:[#allocation3] sm:$0xff]  ;;  %4996 = vmatprep.subr.bf16.mxu1 %v4978_v57  ;;  %5037 = vmatprep.subr.bf16.mxu0 %v4980_v58  ;;  %v4979_v60 = vld [vmem:[#allocation3 + $0x10] sm:$0xff]  ;;  %v4982_v61 = vld [vmem:[#allocation3 + $0x28] sm:$0xff]  ;;  %v5211_v27 = vrot.slane %v9008_v56, 1 }
 0x580   :  { %v4984_v62 = vld [vmem:[#allocation3 + $0x38] sm:$0xff]  ;;  %4997 = vmatpush1.bf16.msra.mxu1 %v4977_v59  ;;  %5038 = vmatpush1.bf16.msra.mxu0 %v4979_v60  ;;  %v4981_v63 = vld [vmem:[#allocation3 + $0x20] sm:$0xff]  ;;  %v4983_v0 = vld [vmem:[#allocation3 + $0x30] sm:$0xff]  ;;  %v5425_v60 = vrot.slane %v9006_v34, 1 }
 0x581   :  { %4998 = vmatprep.subr.bf16.mxu1 %v4982_v61  ;;  %5039 = vmatprep.subr.bf16.mxu0 %v4984_v62  ;;  %v4986_v1 = vld [vmem:[#allocation3 + $0x48] sm:$0xff]  ;;  %v4988_v2 = vld [vmem:[#allocation3 + $0x58] sm:$0xff]  ;;  %v4985_v3 = vld [vmem:[#allocation3 + $0x40] sm:$0xff] }
 0x582   :  { %v4987_v4 = vld [vmem:[#allocation3 + $0x50] sm:$0xff]  ;;  %v4990_v5 = vld [vmem:[#allocation3 + $0x68] sm:$0xff]  ;;  %v4992_v6 = vld [vmem:[#allocation3 + $0x78] sm:$0xff] }
 0x583   :  { %v4989_v7 = vld [vmem:[#allocation3 + $0x60] sm:$0xff]  ;;  %v4991_v8 = vld [vmem:[#allocation3 + $0x70] sm:$0xff]  ;;  %v5195_v12 = vld [vmem:[#allocation3 + $0x88] sm:$0xff] }
 0x584   :  { %4999 = vmatpush1.bf16.msra.mxu1 %v4981_v63  ;;  %5040 = vmatpush1.bf16.msra.mxu0 %v4983_v0  ;;  %v7059_v10 = vld [vmem:[%s9107_s8 + $0x4] ss:$16 sps:$4 sm:$0x3f]   ;;  %v7061_v11 = vld [vmem:[%s9107_s8] ss:$16 sps:$4 sm:$0x3f]  }
 0x585   :  { %5000 = vmatprep.subr.bf16.mxu1 %v4986_v1  ;;  %5041 = vmatprep.subr.bf16.mxu0 %v4988_v2  ;;  %v5100_v13 = vsel %vm5098_vm3, %v7061_v11, 0  ;;  %v5194_v14 = vld [vmem:[#allocation3 + $0x80] sm:$0xff]  ;;  %v5199_v15 = vld [vmem:[#allocation3 + $0xa8] sm:$0xff]  ;;  %v5197_v25 = vld [vmem:[#allocation3 + $0x98] sm:$0xff] }
 0x586   :  { %v7062_v16 = vld [vmem:[%s9107_s8 + $0xc] ss:$16 sps:$4 sm:$0x3f]   ;;  %v5198_v17 = vld [vmem:[#allocation3 + $0xa0] sm:$0xff]  ;;  %v5196_v31 = vld [vmem:[#allocation3 + $0x90] sm:$0xff] }
 0x587   :  { %v7064_v18 = vld [vmem:[%s9107_s8 + $0x8] ss:$16 sps:$4 sm:$0x3f]   ;;  %v4972_v21 = vld [vmem:[%s9100_s1] sm:$0x1]  ;;  %v5200_v33 = vld [vmem:[#allocation3 + $0xb0] sm:$0xff] }
 0x588   :  { %5001 = vmatpush1.bf16.msra.mxu1 %v4985_v3  ;;  %5042 = vmatpush1.bf16.msra.mxu0 %v4987_v4  ;;  %v5203_v19 = vld [vmem:[#allocation3 + $0xc8] sm:$0xff]  ;;  %v5106_v22 = vsel %vm5098_vm3, %v7064_v18, 0  ;;  %v5202_v23 = vld [vmem:[#allocation3 + $0xc0] sm:$0xff]  ;;  %v5201_v29 = vld [vmem:[#allocation3 + $0xb8] sm:$0xff] }
 0x589   :  { %5002 = vmatprep.subr.bf16.mxu1 %v4990_v5  ;;  %5043 = vmatprep.subr.bf16.mxu0 %v4992_v6  ;;  %v5207_v24 = vld [vmem:[#allocation3 + $0xe8] sm:$0xff]  ;;  %v5206_v48 = vld [vmem:[#allocation3 + $0xe0] sm:$0xff]  ;;  %v5205_v44 = vld [vmem:[#allocation3 + $0xd8] sm:$0xff] }
 0x58a   :  { %v5303_v26 = vld [vmem:[#allocation3 + $0x108] sm:$0xff]  ;;  %v5302_v28 = vld [vmem:[#allocation3 + $0x100] sm:$0xff]  ;;  %v5204_v37 = vld [vmem:[#allocation3 + $0xd0] sm:$0xff] }
 0x58b   :  { %v5307_v30 = vld [vmem:[#allocation3 + $0x128] sm:$0xff]  ;;  %v5306_v35 = vld [vmem:[#allocation3 + $0x120] sm:$0xff]  ;;  %v5209_v39 = vld [vmem:[#allocation3 + $0xf8] sm:$0xff] }
 0x58c   :  { %5003 = vmatpush1.bf16.msra.mxu1 %v4989_v7  ;;  %5044 = vmatpush1.bf16.msra.mxu0 %v4991_v8  ;;  %v5311_v36 = vld [vmem:[#allocation3 + $0x148] sm:$0xff]  ;;  %v5310_v38 = vld [vmem:[#allocation3 + $0x140] sm:$0xff]  ;;  %v5208_v42 = vld [vmem:[#allocation3 + $0xf0] sm:$0xff] }
 0x58d   :  { %6293 = vmatprep.subr.msk.bf16.mxu1 %vm5098_vm3, %v7059_v10  ;;  %5215 = vmatprep.subr.bf16.mxu0 %v5195_v12  ;;  %v5315_v41 = vld [vmem:[#allocation3 + $0x168] sm:$0xff]  ;;  %v5314_v9 = vld [vmem:[#allocation3 + $0x160] sm:$0xff]  ;;  %v5305_v32 = vld [vmem:[#allocation3 + $0x118] sm:$0xff] }
 0x58e   :  { %v5409_v40 = vld [vmem:[#allocation3 + $0x188] sm:$0xff]  ;;  %v5304_v43 = vld [vmem:[#allocation3 + $0x110] sm:$0xff]  ;;  %v5408_v45 = vld [vmem:[#allocation3 + $0x180] sm:$0xff] }
 0x58f   :  { %6287 = vmatmul.mubr.msk.bf16.vlgmr.msra.gmra.mrb[60].mxu1 %vm3918_vm2, %v9008_v56  ;;  %6288 = vmatmul.mubr.msk.bf16.vlgmr.msra.gmra.mrb[144].mxu0 %vm3918_vm2, %v9008_v56  ;;  %v5309_v46 = vld [vmem:[#allocation3 + $0x138] sm:$0xff]  ;;  %v5413_v47 = vld [vmem:[#allocation3 + $0x1a8] sm:$0xff]  ;;  %v5308_v49 = vld [vmem:[#allocation3 + $0x130] sm:$0xff] }
 0x590   :  { %5112 = vmatpush1.bf16.msra.mxu1 %v5100_v13  ;;  %5216 = vmatpush1.bf16.msra.mxu0 %v5194_v14  ;;  %v5412_v50 = vld [vmem:[#allocation3 + $0x1a0] sm:$0xff]  ;;  %v5313_v51 = vld [vmem:[#allocation3 + $0x158] sm:$0xff]  ;;  %v5417_v52 = vld [vmem:[#allocation3 + $0x1c8] sm:$0xff] }
 0x591   :  { %5217 = vmatprep.subr.bf16.mxu0 %v5199_v15  ;;  %5143 = vmatprep.mubr.bf16.mxu1 %v7069_v20  ;;  %v5312_v53 = vld [vmem:[#allocation3 + $0x150] sm:$0xff]  ;;  %v5416_v54 = vld [vmem:[#allocation3 + $0x1c0] sm:$0xff]  ;;  %v5317_v55 = vld [vmem:[#allocation3 + $0x178] sm:$0xff] }
 0x592   :  { %6295 = vmatprep.subr.msk.bf16.mxu1 %vm5098_vm3, %v7062_v16  ;;  %5247 = vmatprep.mubr.bf16.mxu0 %v7069_v20  ;;  %v5421_v56 = vld [vmem:[#allocation3 + $0x1e8] sm:$0xff]  ;;  %v5316_v57 = vld [vmem:[#allocation3 + $0x170] sm:$0xff]  ;;  %v5420_v58 = vld [vmem:[#allocation3 + $0x1e0] sm:$0xff] }
 0x593   :  { %v5411_v59 = vld [vmem:[#allocation3 + $0x198] sm:$0xff]  ;;  %v5410_v61 = vld [vmem:[#allocation3 + $0x190] sm:$0xff] }
 0x594   :  { %5218 = vmatpush1.bf16.msra.mxu0 %v5198_v17  ;;  %v5415_v62 = vld [vmem:[#allocation3 + $0x1b8] sm:$0xff]  ;;  %v5414_v63 = vld [vmem:[#allocation3 + $0x1b0] sm:$0xff] }
 0x595   :  { %5219 = vmatprep.subr.bf16.mxu0 %v5203_v19  ;;  %v5419_v0 = vld [vmem:[#allocation3 + $0x1d8] sm:$0xff]  ;;  %v5418_v1 = vld [vmem:[#allocation3 + $0x1d0] sm:$0xff] }
 0x596   :  { %v5423_v2 = vld [vmem:[#allocation3 + $0x1f8] sm:$0xff]  ;;  %v5422_v3 = vld [vmem:[#allocation3 + $0x1f0] sm:$0xff] }
 0x597   :  { %6294 = vmatmul.mubr.msk.bf16.vlgmr.msra.gmra.mrb[64].mxu1 %vm5094_vm4, %v4972_v21 }
 0x598   :  { %5153 = vmatpush1.bf16.msra.mxu1 %v5106_v22  ;;  %5220 = vmatpush1.bf16.msra.mxu0 %v5202_v23 }
 0x599   :  { %5221 = vmatprep.subr.bf16.mxu0 %v5207_v24  ;;  %5184 = vmatprep.mubr.bf16.mxu1 %v7069_v20 }
 0x59a   :  { %5256 = vmatprep.subr.bf16.mxu1 %v5197_v25 }
 0x59c   :  { %5222 = vmatpush1.bf16.msra.mxu0 %v5206_v48 }
 0x59d   :  { %5321 = vmatprep.subr.bf16.mxu0 %v5303_v26 }
 0x59f   :  { %6296 = vmatmul.mubr.msk.bf16.vlgmr.msra.gmra.mrb[68].mxu1 %vm5094_vm4, %v4972_v21  ;;  %6297 = vmatmul.mubr.msk.bf16.vlgmr.msra.gmra.mrb[148].mxu0 %vm3918_vm2, %v5211_v27 }
 0x5a0   :  { %5257 = vmatpush1.bf16.msra.mxu1 %v5196_v31  ;;  %5322 = vmatpush1.bf16.msra.mxu0 %v5302_v28 }
 0x5a1   :  { %5258 = vmatprep.subr.bf16.mxu1 %v5201_v29  ;;  %5323 = vmatprep.subr.bf16.mxu0 %v5307_v30 }
 0x5a2   :  { %5288 = vmatprep.mubr.bf16.mxu1 %v7069_v20  ;;  %5353 = vmatprep.mubr.bf16.mxu0 %v7069_v20 }
 0x5a4   :  { %5259 = vmatpush1.bf16.msra.mxu1 %v5200_v33  ;;  %5324 = vmatpush1.bf16.msra.mxu0 %v5306_v35 }
 0x5a5   :  { %5260 = vmatprep.subr.bf16.mxu1 %v5205_v44  ;;  %5325 = vmatprep.subr.bf16.mxu0 %v5311_v36 }
 0x5a8   :  { %5261 = vmatpush1.bf16.msra.mxu1 %v5204_v37  ;;  %5326 = vmatpush1.bf16.msra.mxu0 %v5310_v38 }
 0x5a9   :  { %5262 = vmatprep.subr.bf16.mxu1 %v5209_v39  ;;  %5327 = vmatprep.subr.bf16.mxu0 %v5315_v41 }
 0x5ac   :  { %5263 = vmatpush1.bf16.msra.mxu1 %v5208_v42  ;;  %5328 = vmatpush1.bf16.msra.mxu0 %v5314_v9  ;;  %v5517_v9 = vlaneseq }
 0x5ad   :  { %5362 = vmatprep.subr.bf16.mxu1 %v5305_v32  ;;  %5429 = vmatprep.subr.bf16.mxu0 %v5409_v40 }
 0x5ae   :  { %v5518_v32 = vshrl.u32 %v5517_v9, 7 }
 0x5af   :  { %6298 = vmatmul.mubr.msk.bf16.vlgmr.msra.gmra.mrb[72].mxu1 %vm3918_vm2, %v5211_v27  ;;  %6299 = vmatmul.mubr.msk.bf16.vlgmr.msra.gmra.mrb[152].mxu0 %vm3918_vm2, %v9006_v34 }
 0x5b0   :  { %5363 = vmatpush1.bf16.msra.mxu1 %v5304_v43  ;;  %5430 = vmatpush1.bf16.msra.mxu0 %v5408_v45  ;;  %v9055_v40 = vsub.s32 0, %v5518_v32  ;;  %v5515_v43 = vld [vmem:[%s9108_s9] sm:$0xf]  ;;  %v9060_v45 = vsub.s32 1, %v5518_v32 }
 0x5b1   :  { %5364 = vmatprep.subr.bf16.mxu1 %v5309_v46  ;;  %5431 = vmatprep.subr.bf16.mxu0 %v5413_v47 }
 0x5b2   :  { %5394 = vmatprep.mubr.bf16.mxu1 %v7069_v20  ;;  %5461 = vmatprep.mubr.bf16.mxu0 %v7069_v20  ;;  %v5520_v46 = vrot.slane %v5515_v43, %v9055_v40 }
 0x5b4   :  { %5365 = vmatpush1.bf16.msra.mxu1 %v5308_v49  ;;  %5432 = vmatpush1.bf16.msra.mxu0 %v5412_v50  ;;  %v5524_v50 = vrot.slane %v5515_v43, %v9060_v45 }
 0x5b5   :  { %5366 = vmatprep.subr.bf16.mxu1 %v5313_v51  ;;  %5433 = vmatprep.subr.bf16.mxu0 %v5417_v52 }
 0x5b8   :  { %5367 = vmatpush1.bf16.msra.mxu1 %v5312_v53  ;;  %5434 = vmatpush1.bf16.msra.mxu0 %v5416_v54 }
 0x5b9   :  { %5368 = vmatprep.subr.bf16.mxu1 %v5317_v55  ;;  %5435 = vmatprep.subr.bf16.mxu0 %v5421_v56 }
 0x5bc   :  { %5369 = vmatpush1.bf16.msra.mxu1 %v5316_v57  ;;  %5436 = vmatpush1.bf16.msra.mxu0 %v5420_v58 }
 0x5bd   :  { %5470 = vmatprep.subr.bf16.mxu1 %v5411_v59 }
 0x5bf   :  { %6300 = vmatmul.mubr.msk.bf16.vlgmr.msra.gmra.mrb[76].mxu1 %vm3918_vm2, %v9006_v34  ;;  %6301 = vmatmul.mubr.msk.bf16.vlgmr.msra.gmra.mrb[156].mxu0 %vm3918_vm2, %v5425_v60 }
 0x5c0   :  { %5471 = vmatpush1.bf16.msra.mxu1 %v5410_v61  ;;  %5502 = vmatprep.mubr.bf16.mxu1 %v7069_v20 }
 0x5c1   :  { %5472 = vmatprep.subr.bf16.mxu1 %v5415_v62 }
 0x5c4   :  { %5473 = vmatpush1.bf16.msra.mxu1 %v5414_v63 }
 0x5c5   :  { %5474 = vmatprep.subr.bf16.mxu1 %v5419_v0 }
 0x5c8   :  { %5475 = vmatpush1.bf16.msra.mxu1 %v5418_v1 }
 0x5c9   :  { %5476 = vmatprep.subr.bf16.mxu1 %v5423_v2 }
 0x5cc   :  { %5477 = vmatpush1.bf16.msra.mxu1 %v5422_v3  ;;  %v9066_v3 = vsub.s32 2, %v5518_v32 }
 0x5cf   :  { %6302 = vmatmul.mubr.msk.bf16.vlgmr.msra.gmra.mrb[80].mxu1 %vm3918_vm2, %v5425_v60 }
 0x662   :  { %v5030_v4 = vpop.f32.mrb[60].mxu1  ;;  %v5071_v34 = vpop.f32.mrb[144].mxu0 }
 0x663   :  { %v5032_v5 = vpop.f32.mrb[61].mxu1  ;;  %v5073_v6 = vpop.f32.mrb[145].mxu0 }
 0x664   :  { %v5034_v7 = vpop.f32.mrb[62].mxu1  ;;  %v5075_v8 = vpop.f32.mrb[146].mxu0 }
 0x665   :  { %v5035_v20 = vpop.f32.mrb[63].mxu1  ;;  %v5076_v10 = vpop.f32.mrb[147].mxu0 }
 0x66a   :  { %v5145_v11 = vpop.f32.mrb[64].mxu1 }
 0x66b   :  { %v5146_v12 = vadd.f32 %v5145_v11, %v5030_v4  ;;  %v5147_v13 = vpop.f32.mrb[65].mxu1  ;;  %v9068_v4 = vsub.s32 3, %v5518_v32 }
 0x66c   :  { %v5148_v14 = vadd.f32 %v5147_v13, %v5032_v5  ;;  %v5149_v15 = vpop.f32.mrb[66].mxu1 }
 0x66d   :  { %v5150_v16 = vpop.f32.mrb[67].mxu1 }
 0x672   :  { %v5186_v17 = vpop.f32.mrb[68].mxu1  ;;  %v5249_v18 = vpop.f32.mrb[148].mxu0 }
 0x673   :  { %v5187_v19 = vadd.f32 %v5186_v17, %v5071_v34  ;;  %v5297_v21 = vadd.f32 %v5249_v18, %v5146_v12  ;;  %v5188_v22 = vpop.f32.mrb[69].mxu1  ;;  %v5251_v23 = vpop.f32.mrb[149].mxu0  ;;  %v5528_v34 = vrot.slane %v5515_v43, %v9066_v3 }
 0x674   :  { %v5189_v24 = vadd.f32 %v5188_v22, %v5073_v6  ;;  %v5298_v25 = vadd.f32 %v5251_v23, %v5148_v14  ;;  %v5190_v48 = vpop.f32.mrb[70].mxu1  ;;  %v5253_v26 = vpop.f32.mrb[150].mxu0  ;;  %v5532_v6 = vrot.slane %v5515_v43, %v9068_v4 }
 0x675   :  { %v5191_v27 = vpop.f32.mrb[71].mxu1  ;;  %v5254_v31 = vpop.f32.mrb[151].mxu0 }
 0x682   :  { %v5290_v28 = vpop.f32.mrb[72].mxu1  ;;  %v5355_v29 = vpop.f32.mrb[152].mxu0 }
 0x683   :  { %v5299_v30 = vadd.f32 %v5290_v28, %v5187_v19  ;;  %v5292_v33 = vpop.f32.mrb[73].mxu1  ;;  %v5403_v35 = vadd.f32 %v5355_v29, %v5297_v21  ;;  %v5357_v44 = vpop.f32.mrb[153].mxu0 }
 0x684   :  { %v5300_v36 = vadd.f32 %v5292_v33, %v5189_v24  ;;  %v5294_v37 = vpop.f32.mrb[74].mxu1  ;;  %v5404_v38 = vadd.f32 %v5357_v44, %v5298_v25  ;;  %v5359_v39 = vpop.f32.mrb[154].mxu0 }
 0x685   :  { %v5295_v41 = vpop.f32.mrb[75].mxu1  ;;  %v5360_v42 = vpop.f32.mrb[155].mxu0 }
 0x692   :  { %v5396_v47 = vpop.f32.mrb[76].mxu1  ;;  %v5463_v49 = vpop.f32.mrb[156].mxu0 }
 0x693   :  { %v5405_v51 = vadd.f32 %v5396_v47, %v5299_v30  ;;  %v5398_v52 = vpop.f32.mrb[77].mxu1  ;;  %v5511_v53 = vadd.f32 %v5463_v49, %v5403_v35  ;;  %v5465_v54 = vpop.f32.mrb[157].mxu0 }
 0x694   :  { %v5406_v55 = vadd.f32 %v5398_v52, %v5300_v36  ;;  %v5400_v56 = vpop.f32.mrb[78].mxu1  ;;  %v5512_v57 = vadd.f32 %v5465_v54, %v5404_v38  ;;  %v5467_v58 = vpop.f32.mrb[158].mxu0 }
 0x695   :  { %v5537_v59 = vadd.f32 %v5520_v46, %v5511_v53  ;;  %v5401_v60 = vpop.f32.mrb[79].mxu1  ;;  %v5468_v61 = vpop.f32.mrb[159].mxu0 }
 0x696   :  { %v5538_v62 = vadd.f32 %v5524_v50, %v5512_v57 }
 0x697   :  { %v5541_v63 = vmax.f32 %v5537_v59, 0.0 }
 0x698   :  { %v5542_v0 = vmax.f32 %v5538_v62, 0.0 }
 0x699   :  { %v9064_v1 = vpack.c.bf16 %v5541_v63, %v5541_v63 }
 0x69a   :  { %v5546_v2 = vpack.c.bf16 %v5542_v0, %v5542_v0 }
 0x6a2   :  { %v5504_v5 = vpop.f32.mrb[80].mxu1 }
 0x6a3   :  { %v5513_v7 = vadd.f32 %v5504_v5, %v5405_v51  ;;  %v5506_v8 = vpop.f32.mrb[81].mxu1 }
 0x6a4   :  { %v5514_v20 = vadd.f32 %v5506_v8, %v5406_v55  ;;  %v5508_v10 = vpop.f32.mrb[82].mxu1 }
 0x6a5   :  { %v5539_v11 = vadd.f32 %v5528_v34, %v5513_v7  ;;  %v5509_v12 = vpop.f32.mrb[83].mxu1 }
 0x6a6   :  { %v5540_v13 = vadd.f32 %v5532_v6, %v5514_v20 }
 0x6a7   :  { %v5543_v14 = vmax.f32 %v5539_v11, 0.0 }
 0x6a8   :  { %v5544_v15 = vmax.f32 %v5540_v13, 0.0 }
 0x6a9   :  { %v9072_v16 = vpack.c.bf16 %v5543_v14, %v5543_v14 }
 0x6aa   :  { %v9074_v17 = vpack.c.bf16 %v5544_v15, %v5544_v15 }
 0x6ab   :  { %7067 = dma.done.wait [#allocation5 + $0x1], 16384 }
 0x6ac   :  { %7068 = vsyncadd [#allocation5 + $0x1], 4294950912  ;;  %5735 = vmatprep.mubr.bf16.mxu0 %v5546_v2  ;;  %5817 = vmatprep.mubr.bf16.mxu1 %v5546_v2  ;;  %v5554_v18 = vld [vmem:[#allocation4 + $0x8] sm:$0xff]  ;;  %v5556_v19 = vld [vmem:[#allocation4 + $0x18] sm:$0xff]  ;;  %vm5897_vm5 = vcmask 1041408   ;;  %vm5915_vm6 = vcmask 1024  }
 0x6ad   :  { %v5553_v21 = vld [vmem:[#allocation4] sm:$0xff]  ;;  %5703 = vmatprep.subr.bf16.mxu0 %v5554_v18  ;;  %5785 = vmatprep.subr.bf16.mxu1 %v5556_v19  ;;  %v5555_v22 = vld [vmem:[#allocation4 + $0x10] sm:$0xff]  ;;  %v5558_v23 = vld [vmem:[#allocation4 + $0x28] sm:$0xff] }
 0x6ae   :  { %v5560_v24 = vld [vmem:[#allocation4 + $0x38] sm:$0xff]  ;;  %5704 = vmatpush1.bf16.msra.mxu0 %v5553_v21  ;;  %5786 = vmatpush1.bf16.msra.mxu1 %v5555_v22  ;;  %v5557_v25 = vld [vmem:[#allocation4 + $0x20] sm:$0xff]  ;;  %v5559_v48 = vld [vmem:[#allocation4 + $0x30] sm:$0xff] }
 0x6af   :  { %5705 = vmatprep.subr.bf16.mxu0 %v5558_v23  ;;  %5787 = vmatprep.subr.bf16.mxu1 %v5560_v24  ;;  %v5562_v26 = vld [vmem:[#allocation4 + $0x48] sm:$0xff]  ;;  %v5564_v27 = vld [vmem:[#allocation4 + $0x58] sm:$0xff]  ;;  %v5561_v31 = vld [vmem:[#allocation4 + $0x40] sm:$0xff] }
 0x6b0   :  { %v5563_v28 = vld [vmem:[#allocation4 + $0x50] sm:$0xff]  ;;  %v5566_v29 = vld [vmem:[#allocation4 + $0x68] sm:$0xff]  ;;  %v5568_v30 = vld [vmem:[#allocation4 + $0x78] sm:$0xff] }
 0x6b1   :  { %v5565_v33 = vld [vmem:[#allocation4 + $0x60] sm:$0xff]  ;;  %v5567_v35 = vld [vmem:[#allocation4 + $0x70] sm:$0xff]  ;;  %v5570_v44 = vld [vmem:[#allocation4 + $0x88] sm:$0xff] }
 0x6b2   :  { %5706 = vmatpush1.bf16.msra.mxu0 %v5557_v25  ;;  %5788 = vmatpush1.bf16.msra.mxu1 %v5559_v48  ;;  %v5572_v36 = vld [vmem:[#allocation4 + $0x98] sm:$0xff]  ;;  %v5569_v37 = vld [vmem:[#allocation4 + $0x80] sm:$0xff]  ;;  %v5571_v38 = vld [vmem:[#allocation4 + $0x90] sm:$0xff] }
 0x6b3   :  { %5707 = vmatprep.subr.bf16.mxu0 %v5562_v26  ;;  %5789 = vmatprep.subr.bf16.mxu1 %v5564_v27  ;;  %v5574_v39 = vld [vmem:[#allocation4 + $0xa8] sm:$0xff]  ;;  %v5576_v41 = vld [vmem:[#allocation4 + $0xb8] sm:$0xff]  ;;  %v5573_v42 = vld [vmem:[#allocation4 + $0xa0] sm:$0xff] }
 0x6b4   :  { %v5575_v9 = vld [vmem:[#allocation4 + $0xb0] sm:$0xff]  ;;  %v5578_v32 = vld [vmem:[#allocation4 + $0xc8] sm:$0xff]  ;;  %v5580_v43 = vld [vmem:[#allocation4 + $0xd8] sm:$0xff] }
 0x6b5   :  { %v5577_v46 = vld [vmem:[#allocation4 + $0xc0] sm:$0xff]  ;;  %v5579_v47 = vld [vmem:[#allocation4 + $0xd0] sm:$0xff]  ;;  %v5582_v49 = vld [vmem:[#allocation4 + $0xe8] sm:$0xff] }
 0x6b6   :  { %5708 = vmatpush1.bf16.msra.mxu0 %v5561_v31  ;;  %5790 = vmatpush1.bf16.msra.mxu1 %v5563_v28  ;;  %v5584_v50 = vld [vmem:[#allocation4 + $0xf8] sm:$0xff]  ;;  %v5581_v51 = vld [vmem:[#allocation4 + $0xe0] sm:$0xff]  ;;  %v5583_v52 = vld [vmem:[#allocation4 + $0xf0] sm:$0xff] }
 0x6b7   :  { %5709 = vmatprep.subr.bf16.mxu0 %v5566_v29  ;;  %5791 = vmatprep.subr.bf16.mxu1 %v5568_v30  ;;  %v5586_v53 = vld [vmem:[#allocation4 + $0x108] sm:$0xff]  ;;  %v5588_v54 = vld [vmem:[#allocation4 + $0x118] sm:$0xff]  ;;  %v5585_v55 = vld [vmem:[#allocation4 + $0x100] sm:$0xff] }
 0x6b8   :  { %v5587_v56 = vld [vmem:[#allocation4 + $0x110] sm:$0xff]  ;;  %v5590_v57 = vld [vmem:[#allocation4 + $0x128] sm:$0xff]  ;;  %v5592_v58 = vld [vmem:[#allocation4 + $0x138] sm:$0xff] }
 0x6b9   :  { %v5589_v59 = vld [vmem:[#allocation4 + $0x120] sm:$0xff]  ;;  %v5591_v60 = vld [vmem:[#allocation4 + $0x130] sm:$0xff]  ;;  %v5594_v61 = vld [vmem:[#allocation4 + $0x148] sm:$0xff] }
 0x6ba   :  { %5710 = vmatpush1.bf16.msra.mxu0 %v5565_v33  ;;  %5792 = vmatpush1.bf16.msra.mxu1 %v5567_v35  ;;  %v5596_v62 = vld [vmem:[#allocation4 + $0x158] sm:$0xff]  ;;  %v5593_v63 = vld [vmem:[#allocation4 + $0x140] sm:$0xff]  ;;  %v5595_v0 = vld [vmem:[#allocation4 + $0x150] sm:$0xff] }
 0x6bb   :  { %5711 = vmatprep.subr.bf16.mxu0 %v5570_v44  ;;  %5793 = vmatprep.subr.bf16.mxu1 %v5572_v36  ;;  %v5598_v2 = vld [vmem:[#allocation4 + $0x168] sm:$0xff]  ;;  %v5600_v34 = vld [vmem:[#allocation4 + $0x178] sm:$0xff]  ;;  %v5597_v5 = vld [vmem:[#allocation4 + $0x160] sm:$0xff] }
 0x6bc   :  { %v5599_v6 = vld [vmem:[#allocation4 + $0x170] sm:$0xff]  ;;  %v5602_v7 = vld [vmem:[#allocation4 + $0x188] sm:$0xff]  ;;  %v5604_v8 = vld [vmem:[#allocation4 + $0x198] sm:$0xff] }
 0x6bd   :  { %v5601_v20 = vld [vmem:[#allocation4 + $0x180] sm:$0xff]  ;;  %v5603_v10 = vld [vmem:[#allocation4 + $0x190] sm:$0xff]  ;;  %v5606_v11 = vld [vmem:[#allocation4 + $0x1a8] sm:$0xff] }
 0x6be   :  { %5712 = vmatpush1.bf16.msra.mxu0 %v5569_v37  ;;  %5794 = vmatpush1.bf16.msra.mxu1 %v5571_v38  ;;  %v5608_v12 = vld [vmem:[#allocation4 + $0x1b8] sm:$0xff]  ;;  %v5605_v13 = vld [vmem:[#allocation4 + $0x1a0] sm:$0xff]  ;;  %v5607_v14 = vld [vmem:[#allocation4 + $0x1b0] sm:$0xff] }
 0x6bf   :  { %5713 = vmatprep.subr.bf16.mxu0 %v5574_v39  ;;  %5795 = vmatprep.subr.bf16.mxu1 %v5576_v41  ;;  %v5610_v15 = vld [vmem:[#allocation4 + $0x1c8] sm:$0xff]  ;;  %v5612_v18 = vld [vmem:[#allocation4 + $0x1d8] sm:$0xff]  ;;  %v5609_v19 = vld [vmem:[#allocation4 + $0x1c0] sm:$0xff] }
 0x6c0   :  { %v5611_v21 = vld [vmem:[#allocation4 + $0x1d0] sm:$0xff]  ;;  %v5614_v22 = vld [vmem:[#allocation4 + $0x1e8] sm:$0xff]  ;;  %v5616_v23 = vld [vmem:[#allocation4 + $0x1f8] sm:$0xff] }
 0x6c1   :  { %v5613_v24 = vld [vmem:[#allocation4 + $0x1e0] sm:$0xff]  ;;  %v5615_v25 = vld [vmem:[#allocation4 + $0x1f0] sm:$0xff]  ;;  %v5618_v48 = vld [vmem:[#allocation4 + $0x208] sm:$0xff] }
 0x6c2   :  { %5714 = vmatpush1.bf16.msra.mxu0 %v5573_v42  ;;  %5796 = vmatpush1.bf16.msra.mxu1 %v5575_v9  ;;  %v5620_v26 = vld [vmem:[#allocation4 + $0x218] sm:$0xff]  ;;  %v5617_v27 = vld [vmem:[#allocation4 + $0x200] sm:$0xff]  ;;  %v5619_v31 = vld [vmem:[#allocation4 + $0x210] sm:$0xff] }
 0x6c3   :  { %5715 = vmatprep.subr.bf16.mxu0 %v5578_v32  ;;  %5797 = vmatprep.subr.bf16.mxu1 %v5580_v43  ;;  %v5622_v28 = vld [vmem:[#allocation4 + $0x228] sm:$0xff]  ;;  %v5624_v29 = vld [vmem:[#allocation4 + $0x238] sm:$0xff]  ;;  %v5621_v30 = vld [vmem:[#allocation4 + $0x220] sm:$0xff] }
 0x6c4   :  { %v5623_v33 = vld [vmem:[#allocation4 + $0x230] sm:$0xff]  ;;  %v5626_v35 = vld [vmem:[#allocation4 + $0x248] sm:$0xff]  ;;  %v5628_v44 = vld [vmem:[#allocation4 + $0x258] sm:$0xff] }
 0x6c5   :  { %v5625_v36 = vld [vmem:[#allocation4 + $0x240] sm:$0xff]  ;;  %v5627_v37 = vld [vmem:[#allocation4 + $0x250] sm:$0xff]  ;;  %v5630_v38 = vld [vmem:[#allocation4 + $0x268] sm:$0xff] }
 0x6c6   :  { %5716 = vmatpush1.bf16.msra.mxu0 %v5577_v46  ;;  %5798 = vmatpush1.bf16.msra.mxu1 %v5579_v47  ;;  %v5629_v39 = vld [vmem:[#allocation4 + $0x260] sm:$0xff]  ;;  %v5631_v41 = vld [vmem:[#allocation4 + $0x270] sm:$0xff]  ;;  %v5634_v42 = vld [vmem:[#allocation4 + $0x288] sm:$0xff] }
 0x6c7   :  { %5717 = vmatprep.subr.bf16.mxu0 %v5582_v49  ;;  %5799 = vmatprep.subr.bf16.mxu1 %v5584_v50  ;;  %v5636_v9 = vld [vmem:[#allocation4 + $0x298] sm:$0xff]  ;;  %v5635_v32 = vld [vmem:[#allocation4 + $0x290] sm:$0xff]  ;;  %v5638_v43 = vld [vmem:[#allocation4 + $0x2a8] sm:$0xff] }
 0x6c8   :  { %v5640_v46 = vld [vmem:[#allocation4 + $0x2b8] sm:$0xff]  ;;  %v5637_v47 = vld [vmem:[#allocation4 + $0x2a0] sm:$0xff]  ;;  %v5639_v49 = vld [vmem:[#allocation4 + $0x2b0] sm:$0xff] }
 0x6c9   :  { %v5642_v50 = vld [vmem:[#allocation4 + $0x2c8] sm:$0xff] }
 0x6ca   :  { %5718 = vmatpush1.bf16.msra.mxu0 %v5581_v51  ;;  %5800 = vmatpush1.bf16.msra.mxu1 %v5583_v52  ;;  %v5644_v51 = vld [vmem:[#allocation4 + $0x2d8] sm:$0xff]  ;;  %v5641_v52 = vld [vmem:[#allocation4 + $0x2c0] sm:$0xff] }
 0x6cb   :  { %5719 = vmatprep.subr.bf16.mxu0 %v5586_v53  ;;  %5801 = vmatprep.subr.bf16.mxu1 %v5588_v54  ;;  %v5643_v53 = vld [vmem:[#allocation4 + $0x2d0] sm:$0xff]  ;;  %v5646_v54 = vld [vmem:[#allocation4 + $0x2e8] sm:$0xff] }
 0x6ce   :  { %5720 = vmatpush1.bf16.msra.mxu0 %v5585_v55  ;;  %5802 = vmatpush1.bf16.msra.mxu1 %v5587_v56  ;;  %v5648_v55 = vld [vmem:[#allocation4 + $0x2f8] sm:$0xff]  ;;  %v5645_v56 = vld [vmem:[#allocation4 + $0x2e0] sm:$0xff] }
 0x6cf   :  { %5721 = vmatprep.subr.bf16.mxu0 %v5590_v57  ;;  %5803 = vmatprep.subr.bf16.mxu1 %v5592_v58  ;;  %v5647_v57 = vld [vmem:[#allocation4 + $0x2f0] sm:$0xff]  ;;  %v5650_v58 = vld [vmem:[#allocation4 + $0x308] sm:$0xff] }
 0x6d2   :  { %5722 = vmatpush1.bf16.msra.mxu0 %v5589_v59  ;;  %5804 = vmatpush1.bf16.msra.mxu1 %v5591_v60  ;;  %v5652_v59 = vld [vmem:[#allocation4 + $0x318] sm:$0xff]  ;;  %v5649_v60 = vld [vmem:[#allocation4 + $0x300] sm:$0xff] }
 0x6d3   :  { %5723 = vmatprep.subr.bf16.mxu0 %v5594_v61  ;;  %5805 = vmatprep.subr.bf16.mxu1 %v5596_v62  ;;  %v5651_v61 = vld [vmem:[#allocation4 + $0x310] sm:$0xff]  ;;  %v5654_v62 = vld [vmem:[#allocation4 + $0x328] sm:$0xff] }
 0x6d6   :  { %5724 = vmatpush1.bf16.msra.mxu0 %v5593_v63  ;;  %5806 = vmatpush1.bf16.msra.mxu1 %v5595_v0  ;;  %v5656_v63 = vld [vmem:[#allocation4 + $0x338] sm:$0xff]  ;;  %v5653_v0 = vld [vmem:[#allocation4 + $0x320] sm:$0xff] }
 0x6d7   :  { %5725 = vmatprep.subr.bf16.mxu0 %v5598_v2  ;;  %5807 = vmatprep.subr.bf16.mxu1 %v5600_v34  ;;  %v5655_v2 = vld [vmem:[#allocation4 + $0x330] sm:$0xff]  ;;  %v5658_v34 = vld [vmem:[#allocation4 + $0x348] sm:$0xff] }
 0x6da   :  { %5726 = vmatpush1.bf16.msra.mxu0 %v5597_v5  ;;  %5808 = vmatpush1.bf16.msra.mxu1 %v5599_v6  ;;  %v5660_v5 = vld [vmem:[#allocation4 + $0x358] sm:$0xff]  ;;  %v5657_v6 = vld [vmem:[#allocation4 + $0x340] sm:$0xff] }
 0x6db   :  { %5727 = vmatprep.subr.bf16.mxu0 %v5602_v7  ;;  %5809 = vmatprep.subr.bf16.mxu1 %v5604_v8  ;;  %v5659_v7 = vld [vmem:[#allocation4 + $0x350] sm:$0xff]  ;;  %v5662_v8 = vld [vmem:[#allocation4 + $0x368] sm:$0xff] }
 0x6de   :  { %5728 = vmatpush1.bf16.msra.mxu0 %v5601_v20  ;;  %5810 = vmatpush1.bf16.msra.mxu1 %v5603_v10  ;;  %v5664_v20 = vld [vmem:[#allocation4 + $0x378] sm:$0xff]  ;;  %v5661_v10 = vld [vmem:[#allocation4 + $0x360] sm:$0xff] }
 0x6df   :  { %5729 = vmatprep.subr.bf16.mxu0 %v5606_v11  ;;  %5811 = vmatprep.subr.bf16.mxu1 %v5608_v12  ;;  %v5663_v11 = vld [vmem:[#allocation4 + $0x370] sm:$0xff]  ;;  %v5666_v12 = vld [vmem:[#allocation4 + $0x388] sm:$0xff] }
 0x6e2   :  { %5730 = vmatpush1.bf16.msra.mxu0 %v5605_v13  ;;  %5812 = vmatpush1.bf16.msra.mxu1 %v5607_v14  ;;  %v5668_v13 = vld [vmem:[#allocation4 + $0x398] sm:$0xff]  ;;  %v5665_v14 = vld [vmem:[#allocation4 + $0x380] sm:$0xff] }
 0x6e3   :  { %5731 = vmatprep.subr.bf16.mxu0 %v5610_v15  ;;  %5813 = vmatprep.subr.bf16.mxu1 %v5612_v18  ;;  %v5667_v15 = vld [vmem:[#allocation4 + $0x390] sm:$0xff]  ;;  %v5670_v18 = vld [vmem:[#allocation4 + $0x3a8] sm:$0xff] }
 0x6e6   :  { %5732 = vmatpush1.bf16.msra.mxu0 %v5609_v19  ;;  %5814 = vmatpush1.bf16.msra.mxu1 %v5611_v21  ;;  %v5672_v19 = vld [vmem:[#allocation4 + $0x3b8] sm:$0xff]  ;;  %v5669_v21 = vld [vmem:[#allocation4 + $0x3a0] sm:$0xff] }
 0x6e7   :  { %5733 = vmatprep.subr.bf16.mxu0 %v5614_v22  ;;  %5815 = vmatprep.subr.bf16.mxu1 %v5616_v23  ;;  %v5671_v22 = vld [vmem:[#allocation4 + $0x3b0] sm:$0xff]  ;;  %v5674_v23 = vld [vmem:[#allocation4 + $0x3c8] sm:$0xff] }
 0x6ea   :  { %5734 = vmatpush1.bf16.msra.mxu0 %v5613_v24  ;;  %5816 = vmatpush1.bf16.msra.mxu1 %v5615_v25  ;;  %v5676_v24 = vld [vmem:[#allocation4 + $0x3d8] sm:$0xff]  ;;  %v5673_v25 = vld [vmem:[#allocation4 + $0x3c0] sm:$0xff] }
 0x6eb   :  { %5744 = vmatprep.subr.bf16.mxu0 %v5618_v48  ;;  %5826 = vmatprep.subr.bf16.mxu1 %v5620_v26  ;;  %v5675_v48 = vld [vmem:[#allocation4 + $0x3d0] sm:$0xff]  ;;  %v5678_v26 = vld [vmem:[#allocation4 + $0x3e8] sm:$0xff] }
 0x6ed   :  { %5736 = vmatmul.mubr.bf16.vlgmr.msra.gmra.mrb[160].mxu0 %v9064_v1  ;;  %5818 = vmatmul.mubr.bf16.vlgmr.msra.gmra.mrb[84].mxu1 %v9064_v1  ;;  %v5632_v1 = vld [vmem:[#allocation4 + $0x278] sm:$0xff] }
 0x6ee   :  { %5745 = vmatpush1.bf16.msra.mxu0 %v5617_v27  ;;  %5827 = vmatpush1.bf16.msra.mxu1 %v5619_v31  ;;  %v5680_v27 = vld [vmem:[#allocation4 + $0x3f8] sm:$0xff]  ;;  %v5677_v31 = vld [vmem:[#allocation4 + $0x3e0] sm:$0xff] }
 0x6ef   :  { %5746 = vmatprep.subr.bf16.mxu0 %v5622_v28  ;;  %5828 = vmatprep.subr.bf16.mxu1 %v5624_v29  ;;  %v5679_v28 = vld [vmem:[#allocation4 + $0x3f0] sm:$0xff]  ;;  %v5681_v29 = vld [vmem:[%s9109_s10] sm:$0xf] }
 0x6f0   :  { %5776 = vmatprep.mubr.bf16.mxu0 %v9074_v17  ;;  %5858 = vmatprep.mubr.bf16.mxu1 %v9074_v17  ;;  %v5633_v17 = vld [vmem:[#allocation4 + $0x280] sm:$0xff] }
 0x6f2   :  { %5747 = vmatpush1.bf16.msra.mxu0 %v5621_v30  ;;  %5829 = vmatpush1.bf16.msra.mxu1 %v5623_v33  ;;  %v5686_v30 = vrot.slane %v5681_v29, %v9055_v40  ;;  %v5694_v33 = vrot.slane %v5681_v29, %v9066_v3 }
 0x6f3   :  { %5748 = vmatprep.subr.bf16.mxu0 %v5626_v35  ;;  %5830 = vmatprep.subr.bf16.mxu1 %v5628_v44  ;;  %v5871_v35 = vld [vmem:[%s9110_s11] sm:$0xf]  ;;  %v5690_v44 = vrot.slane %v5681_v29, %v9060_v45 }
 0x6f6   :  { %5749 = vmatpush1.bf16.msra.mxu0 %v5625_v36  ;;  %5831 = vmatpush1.bf16.msra.mxu1 %v5627_v37  ;;  %v5698_v36 = vrot.slane %v5681_v29, %v9068_v4 }
 0x6f7   :  { %5750 = vmatprep.subr.bf16.mxu0 %v5630_v38  ;;  %5832 = vmatprep.subr.bf16.mxu1 %v5632_v1 }
 0x6fa   :  { %5751 = vmatpush1.bf16.msra.mxu0 %v5629_v39  ;;  %5833 = vmatpush1.bf16.msra.mxu1 %v5631_v41 }
 0x6fb   :  { %5752 = vmatprep.subr.bf16.mxu0 %v5634_v42  ;;  %5834 = vmatprep.subr.bf16.mxu1 %v5636_v9  ;;  %v5884_v9 = vrot.slane %v5871_v35, %v9066_v3 }
 0x6fe   :  { %5753 = vmatpush1.bf16.msra.mxu0 %v5633_v17  ;;  %5835 = vmatpush1.bf16.msra.mxu1 %v5635_v32  ;;  %v5880_v32 = vrot.slane %v5871_v35, %v9060_v45 }
 0x6ff   :  { %5754 = vmatprep.subr.bf16.mxu0 %v5638_v43  ;;  %5836 = vmatprep.subr.bf16.mxu1 %v5640_v46 }
 0x702   :  { %5755 = vmatpush1.bf16.msra.mxu0 %v5637_v47  ;;  %5837 = vmatpush1.bf16.msra.mxu1 %v5639_v49 }
 0x703   :  { %5756 = vmatprep.subr.bf16.mxu0 %v5642_v50  ;;  %5838 = vmatprep.subr.bf16.mxu1 %v5644_v51 }
 0x706   :  { %5757 = vmatpush1.bf16.msra.mxu0 %v5641_v52  ;;  %5839 = vmatpush1.bf16.msra.mxu1 %v5643_v53 }
 0x707   :  { %5758 = vmatprep.subr.bf16.mxu0 %v5646_v54  ;;  %5840 = vmatprep.subr.bf16.mxu1 %v5648_v55  ;;  %v5888_v55 = vrot.slane %v5871_v35, %v9068_v4 }
 0x70a   :  { %5759 = vmatpush1.bf16.msra.mxu0 %v5645_v56  ;;  %5841 = vmatpush1.bf16.msra.mxu1 %v5647_v57 }
 0x70b   :  { %5760 = vmatprep.subr.bf16.mxu0 %v5650_v58  ;;  %5842 = vmatprep.subr.bf16.mxu1 %v5652_v59 }
 0x70e   :  { %5761 = vmatpush1.bf16.msra.mxu0 %v5649_v60  ;;  %5843 = vmatpush1.bf16.msra.mxu1 %v5651_v61 }
 0x70f   :  { %5762 = vmatprep.subr.bf16.mxu0 %v5654_v62  ;;  %5844 = vmatprep.subr.bf16.mxu1 %v5656_v63 }
 0x712   :  { %5763 = vmatpush1.bf16.msra.mxu0 %v5653_v0  ;;  %5845 = vmatpush1.bf16.msra.mxu1 %v5655_v2  ;;  %v6303_v0 = vld [vmem:[#allocation6] ss:$0 sm:$0xff] }
 0x713   :  { %5764 = vmatprep.subr.bf16.mxu0 %v5658_v34  ;;  %5846 = vmatprep.subr.bf16.mxu1 %v5660_v5 }
 0x716   :  { %5765 = vmatpush1.bf16.msra.mxu0 %v5657_v6  ;;  %5847 = vmatpush1.bf16.msra.mxu1 %v5659_v7 }
 0x717   :  { %5766 = vmatprep.subr.bf16.mxu0 %v5662_v8  ;;  %5848 = vmatprep.subr.bf16.mxu1 %v5664_v20 }
 0x71a   :  { %5767 = vmatpush1.bf16.msra.mxu0 %v5661_v10  ;;  %5849 = vmatpush1.bf16.msra.mxu1 %v5663_v11 }
 0x71b   :  { %5768 = vmatprep.subr.bf16.mxu0 %v5666_v12  ;;  %5850 = vmatprep.subr.bf16.mxu1 %v5668_v13 }
 0x71e   :  { %5769 = vmatpush1.bf16.msra.mxu0 %v5665_v14  ;;  %5851 = vmatpush1.bf16.msra.mxu1 %v5667_v15 }
 0x71f   :  { %5770 = vmatprep.subr.bf16.mxu0 %v5670_v18  ;;  %5852 = vmatprep.subr.bf16.mxu1 %v5672_v19 }
 0x722   :  { %5771 = vmatpush1.bf16.msra.mxu0 %v5669_v21  ;;  %5853 = vmatpush1.bf16.msra.mxu1 %v5671_v22 }
 0x723   :  { %5772 = vmatprep.subr.bf16.mxu0 %v5674_v23  ;;  %5854 = vmatprep.subr.bf16.mxu1 %v5676_v24 }
 0x726   :  { %5773 = vmatpush1.bf16.msra.mxu0 %v5673_v25  ;;  %5855 = vmatpush1.bf16.msra.mxu1 %v5675_v48 }
 0x727   :  { %5774 = vmatprep.subr.bf16.mxu0 %v5678_v26  ;;  %5856 = vmatprep.subr.bf16.mxu1 %v5680_v27 }
 0x72a   :  { %5775 = vmatpush1.bf16.msra.mxu0 %v5677_v31  ;;  %5857 = vmatpush1.bf16.msra.mxu1 %v5679_v28 }
 0x72d   :  { %5777 = vmatmul.mubr.bf16.vlgmr.msra.gmra.mrb[160].mxu0 %v9072_v16  ;;  %5859 = vmatmul.mubr.bf16.vlgmr.msra.gmra.mrb[84].mxu1 %v9072_v16  ;;  %v5876_v16 = vrot.slane %v5871_v35, %v9055_v40 }
 0x800   :  { %v5778_v37 = vpop.f32.mrb[160].mxu0  ;;  %v5860_v38 = vpop.f32.mrb[84].mxu1 }
 0x801   :  { %v6804_v1 = vadd.f32 %v5778_v37, %v5686_v30  ;;  %v6806_v39 = vadd.f32 %v5860_v38, %v5694_v33  ;;  %v5780_v41 = vpop.f32.mrb[161].mxu0  ;;  %v5862_v42 = vpop.f32.mrb[85].mxu1 }
 0x802   :  { %v6805_v17 = vadd.f32 %v5780_v41, %v5690_v44  ;;  %v6807_v43 = vadd.f32 %v5862_v42, %v5698_v36  ;;  %v5782_v46 = vpop.f32.mrb[162].mxu0  ;;  %v5864_v47 = vpop.f32.mrb[86].mxu1 }
 0x803   :  { %v5867_v49 = vmax.f32 %v6804_v1, 0.0  ;;  %v5869_v50 = vmax.f32 %v6806_v39, 0.0  ;;  %v5783_v51 = vpop.f32.mrb[163].mxu0  ;;  %v5865_v52 = vpop.f32.mrb[87].mxu1 }
 0x804   :  { %v5868_v53 = vmax.f32 %v6805_v17, 0.0  ;;  %v5870_v54 = vmax.f32 %v6807_v43, 0.0 }
 0x805   :  { %v5893_v40 = vmul.f32 %v5876_v16, %v5867_v49  ;;  %v5895_v56 = vmul.f32 %v5884_v9, %v5869_v50 }
 0x806   :  { %v5894_v57 = vmul.f32 %v5880_v32, %v5868_v53  ;;  %v5896_v3 = vmul.f32 %v5888_v55, %v5870_v54 }
 0x807   :  { %v5898_v58 = vsel %vm5897_vm5, %v5893_v40, 0.0  ;;  %v5901_v45 = vsel %vm5897_vm5, %v5895_v56, 0.0 }
 0x808   :  { %v5899_v59 = vsel %vm5897_vm5, %v5894_v57, 0.0  ;;  %v5903_v62 = vsel %vm5897_vm5, %v5896_v3, 0.0 }
 0x809   :  { %v5900_v60 = vadd.f32 %v5899_v59, %v5898_v58 }
 0x80b   :  { %v5902_v61 = vadd.f32 %v5901_v45, %v5900_v60 }
 0x80d   :  { %v5904_v63 = vadd.f32 %v5903_v62, %v5902_v61 }
 0x80f   :  { %5905 = vadd.xlane.f32.xlu0 %v5904_v63 }
 0x89c   :  { %v5906_v2 = vpop.xlane.xlu0 %5905 }
 0x89d   :  { %v5914_v34 = vadd.f32 %v6303_v0, %v5906_v2 }
 0x89f   :  { %5916 = vst.msk [vmem:[%s9113_s15] sm:$0x3] %vm5915_vm6, %v5914_v34 }
 0x8a0   :  { %5921 = vsyncmov [#allocation5] }
 0x8a3   :  { %s5922_s19 = vpop.sfrf %5921 }
 0x8a4   :  { %p6304_p0 = scmp.ne.s32.totalorder %s5922_s19, 0 }
 0x8a6   :  { %5926 = shalt.err (%p6304_p0)  }
 0x8a7   :  { %5928 = vsyncmov [#allocation5 + $0x1] }
 0x8aa   :  { %s5929_s20 = vpop.sfrf %5928 }
 0x8ab   :  { %p6305_p1 = scmp.ne.s32.totalorder %s5929_s20, 0 }
 0x8ad   :  { %5933 = shalt.err (%p6305_p1)  }

</bundles_post_ra>
